<compile_context>
chip_gen: v6e
topology: v6e:2x2x1
jax: 0.10.0
libtpu: 0.0.40
codegen_flags: <defaults>
</compile_context>

<pallas_src>
import numpy as np
import jax
import jax.numpy as jnp
from jax.experimental import pallas as pl
from jax.experimental.pallas import tpu as pltpu

HID = 64       # hid_dim
E_H = 32       # edge_mlp hidden
E_OUT = 30     # edge_mlp out
GNN_OUT = 13   # gnn_out
OUT_DIM = 1    # out_dim

CONST_ORDER = ('gsrcT', 'gtgtT', 'gdiff', 'ebiasT',
               'w1spT', 'w1sfT', 'w1tpT', 'w1tfT',
               'w2T', 'b2T', 'w3T', 'b3T',
               'wxgT', 'wxpT', 'wxfT', 'bxT',
               'whT', 'bhT', 'wo_col', 'bo_row')


def _make_kernel(N, Bg, pred_len):
    f32 = jnp.float32

    def kernel(pred0_ref, feat_ref,
               gsrcT_ref, gtgtT_ref, gdiff_ref, ebiasT_ref,
               w1spT_ref, w1sfT_ref, w1tpT_ref, w1tfT_ref,
               w2T_ref, b2T_ref, w3T_ref, b3T_ref,
               wxgT_ref, wxpT_ref, wxfT_ref, bxT_ref,
               whT_ref, bhT_ref, wo_ref, bo_ref,
               out_ref, agg_scr):
        BgN = Bg * N

        # ---- loop-invariant loads (weights / graph stay VMEM resident) ----
        gsrcT = gsrcT_ref[...].astype(f32)          # (N, E)   one-hot by edge src
        gtgtT = gtgtT_ref[...].astype(f32)          # (N, E)   one-hot by edge target
        gdiff = gdiff_ref[...].astype(f32)          # (E, N)   +1 target / -1 source
        ebiasT = ebiasT_ref[...]                    # (E_H, E) ew @ w1e + b1 (precomputed)
        w1spT, w1sfT = w1spT_ref[...], w1sfT_ref[...]
        w1tpT, w1tfT = w1tpT_ref[...], w1tfT_ref[...]
        w2T, b2T = w2T_ref[...], b2T_ref[...]
        w3T, b3T = w3T_ref[...], b3T_ref[...]
        wxgT, wxpT = wxgT_ref[...], wxpT_ref[...]
        wxfT, bxT = wxfT_ref[...], bxT_ref[...]
        whT, bhT = whT_ref[...], bhT_ref[...]
        wo_col, bo_row = wo_ref[...], bo_ref[...]

        def dot(a, b):
            return jnp.dot(a, b, preferred_element_type=f32)

        def step(t, carry):
            hT, pred_row = carry                    # (HID, BgN), (1, BgN)
            featT = feat_ref[t]                     # (F, BgN); slot 0 holds node_vec feats

            # edge-MLP layer 1, hoisted over batches:
            # (x @ w1s)^T == w1s_feat^T @ feat^T + w1s_pred^T * pred_row
            xw1sT = dot(w1sfT, featT) + w1spT * pred_row          # (E_H, BgN)
            xw1tT = dot(w1tfT, featT) + w1tpT * pred_row          # (E_H, BgN)

            def graph_batch(b):
                c0, c1 = b * N, (b + 1) * N
                srcT = dot(xw1sT[:, c0:c1], gsrcT)                # (E_H, E) gather src
                tgtT = dot(xw1tT[:, c0:c1], gtgtT)                # (E_H, E) gather tgt
                h1T = jax.nn.sigmoid(srcT + tgtT + ebiasT)        # (E_H, E)
                eoutT = jax.nn.sigmoid(dot(w2T, h1T) + b2T)       # (E_OUT, E)
                # scatter_add(+, tgt) + scatter_add(-, src) == eoutT @ (gtgt - gsrc)
                return dot(eoutT, gdiff)                          # (E_OUT, N)

            if Bg == 1:
                aggT = graph_batch(0)                             # (E_OUT, BgN)
            else:
                for b in range(Bg):
                    agg_scr[:, b * N:(b + 1) * N] = graph_batch(b)
                aggT = agg_scr[...]

            gnnT = jax.nn.sigmoid(dot(w3T, aggT) + b3T)           # (GNN_OUT, BgN)

            # GRU with the three gates fused on the sublane axis: rows [r | z | n].
            gateX = dot(wxgT, gnnT) + dot(wxfT, featT) + wxpT * pred_row + bxT
            gateH = dot(whT, hT) + bhT                            # (3*HID, BgN)
            rz = jax.nn.sigmoid(gateX[0:2 * HID] + gateH[0:2 * HID])
            r = rz[0:HID]
            z = rz[HID:2 * HID]
            n = jnp.tanh(gateX[2 * HID:3 * HID] + r * gateH[2 * HID:3 * HID])
            hT_new = n + z * (hT - n)                             # (HID, BgN)

            # fc_out (out_dim == 1): VPU mul + sublane reduce -> lane-dense row.
            pred_new = jnp.sum(wo_col * hT_new, axis=0, keepdims=True) + bo_row
            out_ref[pl.ds(t, 1), :] = pred_new                    # row t of (pred_len, BgN)
            return hT_new, pred_new

        h0 = jnp.zeros((HID, BgN), f32)
        jax.lax.fori_loop(0, pred_len, step, (h0, pred0_ref[...]))

    return kernel


def _const_spec(arr):
    nd = arr.ndim
    return pl.BlockSpec(arr.shape, lambda g: (0,) * nd)


def build_ls_gnn_call(G, Bg, N, F, pred_len, const_arrays):
    BgN = Bg * N
    in_specs = [
        pl.BlockSpec((None, 1, BgN), lambda g: (g, 0, 0)),               # x0[..., 0]
        pl.BlockSpec((None, pred_len, F, BgN), lambda g: (g, 0, 0, 0)),  # feature slab
    ] + [_const_spec(a) for a in const_arrays]
    out_specs = pl.BlockSpec((None, pred_len, BgN), lambda g: (g, 0, 0))
    out_shape = jax.ShapeDtypeStruct((G, pred_len, BgN), jnp.float32)

    return pl.pallas_call(
        _make_kernel(N, Bg, pred_len),
        grid=(G,),
        in_specs=in_specs,
        out_specs=out_specs,
        out_shape=out_shape,
        scratch_shapes=[pltpu.VMEM((E_OUT, BgN), jnp.float32)],  # per-group agg assembly
        compiler_params=pltpu.CompilerParams(
            dimension_semantics=("parallel",)),   # batch groups -> both TCs on v7x
    )


def init_params(key, in_dim):
    """PyTorch-layout parameters: weights stored (in_features, out_features)."""
    ks = jax.random.split(key, 12)
    u = lambda k, s: jax.random.uniform(k, s, jnp.float32, -0.1, 0.1)
    return dict(
        w1=u(ks[0], (2 * in_dim + 1, E_H)), b1=u(ks[1], (1, E_H)),            # edge_mlp.0
        w2=u(ks[2], (E_H, E_OUT)), b2=u(ks[3], (1, E_OUT)),                   # edge_mlp.2
        w3=u(ks[4], (E_OUT, GNN_OUT)), b3=u(ks[5], (1, GNN_OUT)),             # node_mlp
        wx=u(ks[6], (GNN_OUT + in_dim, 3 * HID)), bx=u(ks[7], (1, 3 * HID)),  # gru x2h
        wh=u(ks[8], (HID, 3 * HID)), bh=u(ks[9], (1, 3 * HID)),               # gru h2h
        wo=u(ks[10], (HID, OUT_DIM)), bo=u(ks[11], (1, OUT_DIM)),             # fc_out
    )
    # TODO(synk): GraphGNN.w / GraphGNN.b, fc_in and fc_out_encoder are declared in
    # the PyTorch __init__ but never used in its forward pass, so they are omitted.


def prepare_kernel_consts(params, cur_adj_np, in_dim):
    """Host-side glue: dense_to_sparse, edge padding and re-layout of the
    weights into the transposed (features-on-sublanes) kernel layout."""
    N = cur_adj_np.shape[0]
    src_np, tgt_np = np.nonzero(cur_adj_np)           # dense_to_sparse
    e_raw = int(src_np.shape[0])
    E = ((e_raw + 7) // 8) * 8                         # pad edge count to sublane multiple

    ew = np.zeros((E, 1), np.float32)
    ew[:e_raw, 0] = cur_adj_np[src_np, tgt_np]
    gsrc = np.zeros((E, N), np.float32)
    gtgt = np.zeros((E, N), np.float32)
    gsrc[np.arange(e_raw), src_np] = 1.0
    gtgt[np.arange(e_raw), tgt_np] = 1.0
    gdiff = gtgt - gsrc                                # padded rows all-zero -> inert

    w1 = np.asarray(params['w1'], np.float32)
    w1sT = w1[:in_dim].T                               # (E_H, in_dim)
    w1tT = w1[in_dim:2 * in_dim].T
    w1e = w1[2 * in_dim:]                              # (1, E_H)
    ebiasT = (ew @ w1e + np.asarray(params['b1'], np.float32)).T   # (E_H, E)

    wxT = jnp.transpose(params['wx'])                  # (3*HID, GNN_OUT + in_dim)

    f32, bf16 = jnp.float32, jnp.bfloat16
    return dict(
        gsrcT=jnp.asarray(gsrc.T, bf16),               # (N, E); 0/1 exact in bf16
        gtgtT=jnp.asarray(gtgt.T, bf16),               # (N, E)
        gdiff=jnp.asarray(gdiff, bf16),                # (E, N); 0/±1 exact in bf16
        ebiasT=jnp.asarray(ebiasT, f32),               # (E_H, E)
        w1spT=jnp.asarray(w1sT[:, 0:1], f32),          # prev-prediction column (src half)
        w1sfT=jnp.asarray(w1sT[:, 1:], f32),           # feature columns (src half)
        w1tpT=jnp.asarray(w1tT[:, 0:1], f32),
        w1tfT=jnp.asarray(w1tT[:, 1:], f32),
        w2T=jnp.transpose(params['w2']), b2T=jnp.transpose(params['b2']),
        w3T=jnp.transpose(params['w3']), b3T=jnp.transpose(params['b3']),
        wxgT=wxT[:, :GNN_OUT],                         # (192, GNN_OUT)
        wxpT=wxT[:, GNN_OUT:GNN_OUT + 1],              # (192, 1) prev-prediction column
        wxfT=wxT[:, GNN_OUT + 1:],                     # (192, F)
        bxT=jnp.transpose(params['bx']),
        whT=jnp.transpose(params['wh']), bhT=jnp.transpose(params['bh']),
        wo_col=params['wo'],                           # (HID, 1)
        bo_row=params['bo'],                           # (1, 1)
    )


def ls_gnn_forward(params, node_vec, cur_adj_np, feature, hist_len, pred_len,
                   num_groups=2):
    B, N, in_dim = node_vec.shape
    F = in_dim - 1
    if num_groups < 1 or B % num_groups != 0:
        num_groups = 1
    G, Bg = num_groups, B // num_groups
    BgN = Bg * N

    consts = prepare_kernel_consts(params, np.asarray(cur_adj_np), in_dim)

    # Column 0 of x (the "previous prediction" slot) and the dense feature
    # part, laid out feature-major with batch*stations on lanes, grouped by
    # batch group (group axis leading so its block dim can be squeezed).
    pred0 = node_vec[..., 0].reshape(G, 1, BgN)                    # (G, 1, BgN)

    featw = feature[:, hist_len:hist_len + pred_len]               # (B, pred_len, N, F)
    featw = featw.at[:, 0].set(node_vec[..., 1:])                  # t == 0 uses node_vec
    featT = jnp.transpose(featw, (1, 3, 0, 2)).reshape(pred_len, F, G, BgN)
    featT = jnp.transpose(featT, (2, 0, 1, 3))                     # (G, pred_len, F, BgN)

    const_arrays = [consts[k] for k in CONST_ORDER]
    call = build_ls_gnn_call(G, Bg, N, F, pred_len, const_arrays)
    out = call(pred0, featT, *const_arrays)                        # (G, pred_len, BgN)

    out = out.reshape(G, pred_len, Bg, N)
    out = jnp.transpose(out, (0, 2, 1, 3)).reshape(B, pred_len, N)
    return out[..., None]                                          # (B, pred_len, N, 1)


def reference_forward(params, node_vec, cur_adj_np, feature, hist_len, pred_len):
    """Pure-JAX reference mirroring the PyTorch semantics."""
    B, N, in_dim = node_vec.shape
    src_np, tgt_np = np.nonzero(cur_adj_np)
    src = jnp.asarray(src_np)
    tgt = jnp.asarray(tgt_np)
    E = src_np.shape[0]
    ew = jnp.asarray(cur_adj_np[src_np, tgt_np].astype(np.float32))[:, None]
    w1 = params['w1']
    wx = params['wx']

    h = jnp.zeros((B * N, HID), jnp.float32)
    preds = []
    x = node_vec
    xn = None
    for i in range(pred_len):
        if i > 0:
            x = jnp.concatenate([xn, feature[:, hist_len + i]], axis=-1)
        node_src = x[:, src]
        node_tgt = x[:, tgt]
        edge_w = jnp.broadcast_to(ew[None], (B, E, 1))
        out = jnp.concatenate([node_src, node_tgt, edge_w], axis=-1)
        out = jax.nn.sigmoid(out @ w1 + params['b1'])
        out = jax.nn.sigmoid(out @ params['w2'] + params['b2'])
        out_add = jnp.zeros((B, N, E_OUT)).at[:, tgt].add(out)
        out_sub = jnp.zeros((B, N, E_OUT)).at[:, src].add(-out)
        gnn = jax.nn.sigmoid((out_add + out_sub) @ params['w3'] + params['b3'])
        xcat = jnp.concatenate([gnn, x], axis=-1).reshape(B * N, -1)
        gate_x = xcat @ wx + params['bx']
        gate_h = h @ params['wh'] + params['bh']
        i_r, i_i, i_n = jnp.split(gate_x, 3, axis=1)
        h_r, h_i, h_n = jnp.split(gate_h, 3, axis=1)
        r = jax.nn.sigmoid(i_r + h_r)
        z = jax.nn.sigmoid(i_i + h_i)
        nn_ = jnp.tanh(i_n + r * h_n)
        h = nn_ + z * (h - nn_)
        xn = h.reshape(B, N, HID) @ params['wo'] + params['bo']
        preds.append(xn)
    return jnp.stack(preds, axis=1)


if __name__ == "__main__":
    B = 4          # batch_size (split into 2 "parallel" groups)
    N = 8          # station_num
    IN_DIM = 4     # in_dim (out_dim(1) + feature_dim(3))
    HIST_LEN = 2
    PRED_LEN = 3
    T = HIST_LEN + PRED_LEN

    key = jax.random.PRNGKey(0)
    k_par, k_nv, k_feat = jax.random.split(key, 3)
    params = init_params(k_par, IN_DIM)
    node_vec = jax.random.normal(k_nv, (B, N, IN_DIM), jnp.float32)
    feature = jax.random.normal(k_feat, (B, T, N, IN_DIM - 1), jnp.float32)

    # deterministic sparse-ish adjacency (cur_adj), zero diagonal
    rng = np.random.RandomState(0)
    adj = rng.rand(N, N).astype(np.float32)
    adj = adj * (rng.rand(N, N) > 0.6)
    np.fill_diagonal(adj, 0.0)
    assert np.count_nonzero(adj) > 0

    out = ls_gnn_forward(params, node_vec, adj, feature, HIST_LEN, PRED_LEN,
                         num_groups=2)
    out = jax.block_until_ready(out)
    assert out.shape == (B, PRED_LEN, N, OUT_DIM)

    ref = jax.block_until_ready(
        reference_forward(params, node_vec, adj, feature, HIST_LEN, PRED_LEN))
    assert np.allclose(np.asarray(out), np.asarray(ref), rtol=2e-2, atol=2e-2), \
        "Pallas kernel output does not match reference"

    print("KERNEL_OK")
</pallas_src>

<mosaic_0001>
module attributes {stable_mosaic.version = 11 : i64} {
  func.func @kernel(%arg0: i32, %arg1: memref<1x1x16xf32, #tpu.memory_space<vmem>>, %arg2: memref<1x3x3x16xf32, #tpu.memory_space<vmem>>, %arg3: memref<8x24xbf16, #tpu.memory_space<vmem>>, %arg4: memref<8x24xbf16, #tpu.memory_space<vmem>>, %arg5: memref<24x8xbf16, #tpu.memory_space<vmem>>, %arg6: memref<32x24xf32, #tpu.memory_space<vmem>>, %arg7: memref<32x1xf32, #tpu.memory_space<vmem>>, %arg8: memref<32x3xf32, #tpu.memory_space<vmem>>, %arg9: memref<32x1xf32, #tpu.memory_space<vmem>>, %arg10: memref<32x3xf32, #tpu.memory_space<vmem>>, %arg11: memref<30x32xf32, #tpu.memory_space<vmem>>, %arg12: memref<30x1xf32, #tpu.memory_space<vmem>>, %arg13: memref<13x30xf32, #tpu.memory_space<vmem>>, %arg14: memref<13x1xf32, #tpu.memory_space<vmem>>, %arg15: memref<192x13xf32, #tpu.memory_space<vmem>>, %arg16: memref<192x1xf32, #tpu.memory_space<vmem>>, %arg17: memref<192x3xf32, #tpu.memory_space<vmem>>, %arg18: memref<192x1xf32, #tpu.memory_space<vmem>>, %arg19: memref<192x64xf32, #tpu.memory_space<vmem>>, %arg20: memref<192x1xf32, #tpu.memory_space<vmem>>, %arg21: memref<64x1xf32, #tpu.memory_space<vmem>>, %arg22: memref<1x1xf32, #tpu.memory_space<vmem>>, %arg23: memref<1x3x16xf32, #tpu.memory_space<vmem>>, %arg24: memref<30x16xf32, #tpu.memory_space<vmem>>) attributes {dimension_semantics = [#tpu.dimension_semantics<parallel>], iteration_bounds = array<i64: 2>, scalar_prefetch = 0 : i64, scratch_operands = 1 : i64, tpu.core_type = #tpu.core_type<tc>, window_params = [{transform_indices = @transform_0, window_bounds = array<i64: 1, 1, 16>}, {transform_indices = @transform_1, window_bounds = array<i64: 1, 3, 3, 16>}, {pipeline_mode = #tpu.pipeline_mode<synchronous>, transform_indices = @transform_2, window_bounds = array<i64: 8, 24>}, {pipeline_mode = #tpu.pipeline_mode<synchronous>, transform_indices = @transform_3, window_bounds = array<i64: 8, 24>}, {pipeline_mode = #tpu.pipeline_mode<synchronous>, transform_indices = @transform_4, window_bounds = array<i64: 24, 8>}, {pipeline_mode = #tpu.pipeline_mode<synchronous>, transform_indices = @transform_5, window_bounds = array<i64: 32, 24>}, {pipeline_mode = #tpu.pipeline_mode<synchronous>, transform_indices = @transform_6, window_bounds = array<i64: 32, 1>}, {pipeline_mode = #tpu.pipeline_mode<synchronous>, transform_indices = @transform_7, window_bounds = array<i64: 32, 3>}, {pipeline_mode = #tpu.pipeline_mode<synchronous>, transform_indices = @transform_8, window_bounds = array<i64: 32, 1>}, {pipeline_mode = #tpu.pipeline_mode<synchronous>, transform_indices = @transform_9, window_bounds = array<i64: 32, 3>}, {pipeline_mode = #tpu.pipeline_mode<synchronous>, transform_indices = @transform_10, window_bounds = array<i64: 30, 32>}, {pipeline_mode = #tpu.pipeline_mode<synchronous>, transform_indices = @transform_11, window_bounds = array<i64: 30, 1>}, {pipeline_mode = #tpu.pipeline_mode<synchronous>, transform_indices = @transform_12, window_bounds = array<i64: 13, 30>}, {pipeline_mode = #tpu.pipeline_mode<synchronous>, transform_indices = @transform_13, window_bounds = array<i64: 13, 1>}, {pipeline_mode = #tpu.pipeline_mode<synchronous>, transform_indices = @transform_14, window_bounds = array<i64: 192, 13>}, {pipeline_mode = #tpu.pipeline_mode<synchronous>, transform_indices = @transform_15, window_bounds = array<i64: 192, 1>}, {pipeline_mode = #tpu.pipeline_mode<synchronous>, transform_indices = @transform_16, window_bounds = array<i64: 192, 3>}, {pipeline_mode = #tpu.pipeline_mode<synchronous>, transform_indices = @transform_17, window_bounds = array<i64: 192, 1>}, {pipeline_mode = #tpu.pipeline_mode<synchronous>, transform_indices = @transform_18, window_bounds = array<i64: 192, 64>}, {pipeline_mode = #tpu.pipeline_mode<synchronous>, transform_indices = @transform_19, window_bounds = array<i64: 192, 1>}, {pipeline_mode = #tpu.pipeline_mode<synchronous>, transform_indices = @transform_20, window_bounds = array<i64: 64, 1>}, {pipeline_mode = #tpu.pipeline_mode<synchronous>, transform_indices = @transform_21, window_bounds = array<i64: 1, 1>}, {transform_indices = @transform_22, window_bounds = array<i64: 1, 3, 16>}]} {
    %c0 = arith.constant 0 : index
    %c0_0 = arith.constant 0 : index
    %0 = vector.load %arg3[%c0, %c0_0] : memref<8x24xbf16, #tpu.memory_space<vmem>>, vector<8x24xbf16>
    %1 = arith.extf %0 : vector<8x24xbf16> to vector<8x24xf32>
    %c0_1 = arith.constant 0 : index
    %c0_2 = arith.constant 0 : index
    %2 = vector.load %arg4[%c0_1, %c0_2] : memref<8x24xbf16, #tpu.memory_space<vmem>>, vector<8x24xbf16>
    %3 = arith.extf %2 : vector<8x24xbf16> to vector<8x24xf32>
    %c0_3 = arith.constant 0 : index
    %c0_4 = arith.constant 0 : index
    %4 = vector.load %arg5[%c0_3, %c0_4] : memref<24x8xbf16, #tpu.memory_space<vmem>>, vector<24x8xbf16>
    %5 = arith.extf %4 : vector<24x8xbf16> to vector<24x8xf32>
    %c0_5 = arith.constant 0 : index
    %c0_6 = arith.constant 0 : index
    %6 = vector.load %arg6[%c0_5, %c0_6] : memref<32x24xf32, #tpu.memory_space<vmem>>, vector<32x24xf32>
    %c0_7 = arith.constant 0 : index
    %c0_8 = arith.constant 0 : index
    %7 = vector.load %arg7[%c0_7, %c0_8] : memref<32x1xf32, #tpu.memory_space<vmem>>, vector<32x1xf32>
    %c0_9 = arith.constant 0 : index
    %c0_10 = arith.constant 0 : index
    %8 = vector.load %arg8[%c0_9, %c0_10] : memref<32x3xf32, #tpu.memory_space<vmem>>, vector<32x3xf32>
    %c0_11 = arith.constant 0 : index
    %c0_12 = arith.constant 0 : index
    %9 = vector.load %arg9[%c0_11, %c0_12] : memref<32x1xf32, #tpu.memory_space<vmem>>, vector<32x1xf32>
    %c0_13 = arith.constant 0 : index
    %c0_14 = arith.constant 0 : index
    %10 = vector.load %arg10[%c0_13, %c0_14] : memref<32x3xf32, #tpu.memory_space<vmem>>, vector<32x3xf32>
    %c0_15 = arith.constant 0 : index
    %c0_16 = arith.constant 0 : index
    %11 = vector.load %arg11[%c0_15, %c0_16] : memref<30x32xf32, #tpu.memory_space<vmem>>, vector<30x32xf32>
    %c0_17 = arith.constant 0 : index
    %c0_18 = arith.constant 0 : index
    %12 = vector.load %arg12[%c0_17, %c0_18] : memref<30x1xf32, #tpu.memory_space<vmem>>, vector<30x1xf32>
    %c0_19 = arith.constant 0 : index
    %c0_20 = arith.constant 0 : index
    %13 = vector.load %arg13[%c0_19, %c0_20] : memref<13x30xf32, #tpu.memory_space<vmem>>, vector<13x30xf32>
    %c0_21 = arith.constant 0 : index
    %c0_22 = arith.constant 0 : index
    %14 = vector.load %arg14[%c0_21, %c0_22] : memref<13x1xf32, #tpu.memory_space<vmem>>, vector<13x1xf32>
    %c0_23 = arith.constant 0 : index
    %c0_24 = arith.constant 0 : index
    %15 = vector.load %arg15[%c0_23, %c0_24] : memref<192x13xf32, #tpu.memory_space<vmem>>, vector<192x13xf32>
    %c0_25 = arith.constant 0 : index
    %c0_26 = arith.constant 0 : index
    %16 = vector.load %arg16[%c0_25, %c0_26] : memref<192x1xf32, #tpu.memory_space<vmem>>, vector<192x1xf32>
    %c0_27 = arith.constant 0 : index
    %c0_28 = arith.constant 0 : index
    %17 = vector.load %arg17[%c0_27, %c0_28] : memref<192x3xf32, #tpu.memory_space<vmem>>, vector<192x3xf32>
    %c0_29 = arith.constant 0 : index
    %c0_30 = arith.constant 0 : index
    %18 = vector.load %arg18[%c0_29, %c0_30] : memref<192x1xf32, #tpu.memory_space<vmem>>, vector<192x1xf32>
    %c0_31 = arith.constant 0 : index
    %c0_32 = arith.constant 0 : index
    %19 = vector.load %arg19[%c0_31, %c0_32] : memref<192x64xf32, #tpu.memory_space<vmem>>, vector<192x64xf32>
    %c0_33 = arith.constant 0 : index
    %c0_34 = arith.constant 0 : index
    %20 = vector.load %arg20[%c0_33, %c0_34] : memref<192x1xf32, #tpu.memory_space<vmem>>, vector<192x1xf32>
    %c0_35 = arith.constant 0 : index
    %c0_36 = arith.constant 0 : index
    %21 = vector.load %arg21[%c0_35, %c0_36] : memref<64x1xf32, #tpu.memory_space<vmem>>, vector<64x1xf32>
    %c0_37 = arith.constant 0 : index
    %c0_38 = arith.constant 0 : index
    %22 = vector.load %arg22[%c0_37, %c0_38] : memref<1x1xf32, #tpu.memory_space<vmem>>, vector<1x1xf32>
    %cst = arith.constant 0.000000e+00 : f32
    %23 = vector.broadcast %cst : f32 to vector<64x16xf32>
    %c0_39 = arith.constant 0 : index
    %c0_40 = arith.constant 0 : index
    %c0_41 = arith.constant 0 : index
    %24 = vector.load %arg1[%c0_39, %c0_40, %c0_41] : memref<1x1x16xf32, #tpu.memory_space<vmem>>, vector<1x1x16xf32>
    %25 = vector.shape_cast %24 : vector<1x1x16xf32> to vector<1x16xf32>
    %c0_i32 = arith.constant 0 : i32
    %c3_i32 = arith.constant 3 : i32
    %26 = arith.addi %c0_i32, %c3_i32 : i32
    %c1_i32 = arith.constant 1 : i32
    %27:2 = scf.for %arg25 = %c0_i32 to %26 step %c1_i32 iter_args(%arg26 = %23, %arg27 = %25) -> (vector<64x16xf32>, vector<1x16xf32>)  : i32 {
      %c0_43 = arith.constant 0 : index
      %28 = arith.index_cast %arg25 : i32 to index
      %c0_44 = arith.constant 0 : index
      %c0_45 = arith.constant 0 : index
      %29 = vector.load %arg2[%c0_43, %28, %c0_44, %c0_45] : memref<1x3x3x16xf32, #tpu.memory_space<vmem>>, vector<1x1x3x16xf32>
      %30 = vector.shape_cast %29 : vector<1x1x3x16xf32> to vector<3x16xf32>
      %cst_46 = arith.constant dense<0.000000e+00> : vector<32x16xf32>
      %31 = tpu.matmul %8, %30, %cst_46 {dimension_numbers = #tpu.dot_dimension_numbers<[1], [0], [0], [1], [0, 0, 1, 1], [], []>} : vector<32x3xf32>, vector<3x16xf32>, vector<32x16xf32> -> vector<32x16xf32>
      %32 = vector.broadcast %7 : vector<32x1xf32> to vector<32x16xf32>
      %33 = vector.broadcast %arg27 : vector<1x16xf32> to vector<32x16xf32>
      %34 = arith.mulf %32, %33 : vector<32x16xf32>
      %35 = arith.addf %31, %34 : vector<32x16xf32>
      %cst_47 = arith.constant dense<0.000000e+00> : vector<32x16xf32>
      %36 = tpu.matmul %10, %30, %cst_47 {dimension_numbers = #tpu.dot_dimension_numbers<[1], [0], [0], [1], [0, 0, 1, 1], [], []>} : vector<32x3xf32>, vector<3x16xf32>, vector<32x16xf32> -> vector<32x16xf32>
      %37 = vector.broadcast %9 : vector<32x1xf32> to vector<32x16xf32>
      %38 = vector.broadcast %arg27 : vector<1x16xf32> to vector<32x16xf32>
      %39 = arith.mulf %37, %38 : vector<32x16xf32>
      %40 = arith.addf %36, %39 : vector<32x16xf32>
      %41 = vector.extract_strided_slice %35 {offsets = [0, 0], sizes = [32, 8], strides = [1, 1]} : vector<32x16xf32> to vector<32x8xf32>
      %cst_48 = arith.constant dense<0.000000e+00> : vector<32x24xf32>
      %42 = tpu.matmul %41, %1, %cst_48 {dimension_numbers = #tpu.dot_dimension_numbers<[1], [0], [0], [1], [0, 0, 1, 1], [], []>} : vector<32x8xf32>, vector<8x24xf32>, vector<32x24xf32> -> vector<32x24xf32>
      %43 = vector.extract_strided_slice %40 {offsets = [0, 0], sizes = [32, 8], strides = [1, 1]} : vector<32x16xf32> to vector<32x8xf32>
      %cst_49 = arith.constant dense<0.000000e+00> : vector<32x24xf32>
      %44 = tpu.matmul %43, %3, %cst_49 {dimension_numbers = #tpu.dot_dimension_numbers<[1], [0], [0], [1], [0, 0, 1, 1], [], []>} : vector<32x8xf32>, vector<8x24xf32>, vector<32x24xf32> -> vector<32x24xf32>
      %45 = arith.addf %42, %44 : vector<32x24xf32>
      %46 = arith.addf %45, %6 : vector<32x24xf32>
      %47 = arith.negf %46 : vector<32x24xf32>
      %48 = math.exp %47 : vector<32x24xf32>
      %cst_50 = arith.constant 1.000000e+00 : f32
      %49 = vector.broadcast %cst_50 : f32 to vector<32x24xf32>
      %50 = arith.addf %49, %48 : vector<32x24xf32>
      %51 = arith.divf %49, %50 : vector<32x24xf32>
      %cst_51 = arith.constant dense<0.000000e+00> : vector<30x24xf32>
      %52 = tpu.matmul %11, %51, %cst_51 {dimension_numbers = #tpu.dot_dimension_numbers<[1], [0], [0], [1], [0, 0, 1, 1], [], []>} : vector<30x32xf32>, vector<32x24xf32>, vector<30x24xf32> -> vector<30x24xf32>
      %53 = vector.broadcast %12 : vector<30x1xf32> to vector<30x24xf32>
      %54 = arith.addf %52, %53 : vector<30x24xf32>
      %55 = arith.negf %54 : vector<30x24xf32>
      %56 = math.exp %55 : vector<30x24xf32>
      %cst_52 = arith.constant 1.000000e+00 : f32
      %57 = vector.broadcast %cst_52 : f32 to vector<30x24xf32>
      %58 = arith.addf %57, %56 : vector<30x24xf32>
      %59 = arith.divf %57, %58 : vector<30x24xf32>
      %cst_53 = arith.constant dense<0.000000e+00> : vector<30x8xf32>
      %60 = tpu.matmul %59, %5, %cst_53 {dimension_numbers = #tpu.dot_dimension_numbers<[1], [0], [0], [1], [0, 0, 1, 1], [], []>} : vector<30x24xf32>, vector<24x8xf32>, vector<30x8xf32> -> vector<30x8xf32>
      %c0_54 = arith.constant 0 : index
      %c0_55 = arith.constant 0 : index
      %61 = vector.load %arg24[%c0_54, %c0_55] : memref<30x16xf32, #tpu.memory_space<vmem>>, vector<30x8xf32>
      tpu.vector_store %arg24[%c0_54, %c0_55], %60 {strides = array<i32>} : memref<30x16xf32, #tpu.memory_space<vmem>>, vector<30x8xf32>,
      %62 = vector.extract_strided_slice %35 {offsets = [0, 8], sizes = [32, 8], strides = [1, 1]} : vector<32x16xf32> to vector<32x8xf32>
      %cst_56 = arith.constant dense<0.000000e+00> : vector<32x24xf32>
      %63 = tpu.matmul %62, %1, %cst_56 {dimension_numbers = #tpu.dot_dimension_numbers<[1], [0], [0], [1], [0, 0, 1, 1], [], []>} : vector<32x8xf32>, vector<8x24xf32>, vector<32x24xf32> -> vector<32x24xf32>
      %64 = vector.extract_strided_slice %40 {offsets = [0, 8], sizes = [32, 8], strides = [1, 1]} : vector<32x16xf32> to vector<32x8xf32>
      %cst_57 = arith.constant dense<0.000000e+00> : vector<32x24xf32>
      %65 = tpu.matmul %64, %3, %cst_57 {dimension_numbers = #tpu.dot_dimension_numbers<[1], [0], [0], [1], [0, 0, 1, 1], [], []>} : vector<32x8xf32>, vector<8x24xf32>, vector<32x24xf32> -> vector<32x24xf32>
      %66 = arith.addf %63, %65 : vector<32x24xf32>
      %67 = arith.addf %66, %6 : vector<32x24xf32>
      %68 = arith.negf %67 : vector<32x24xf32>
      %69 = math.exp %68 : vector<32x24xf32>
      %cst_58 = arith.constant 1.000000e+00 : f32
      %70 = vector.broadcast %cst_58 : f32 to vector<32x24xf32>
      %71 = arith.addf %70, %69 : vector<32x24xf32>
      %72 = arith.divf %70, %71 : vector<32x24xf32>
      %cst_59 = arith.constant dense<0.000000e+00> : vector<30x24xf32>
      %73 = tpu.matmul %11, %72, %cst_59 {dimension_numbers = #tpu.dot_dimension_numbers<[1], [0], [0], [1], [0, 0, 1, 1], [], []>} : vector<30x32xf32>, vector<32x24xf32>, vector<30x24xf32> -> vector<30x24xf32>
      %74 = vector.broadcast %12 : vector<30x1xf32> to vector<30x24xf32>
      %75 = arith.addf %73, %74 : vector<30x24xf32>
      %76 = arith.negf %75 : vector<30x24xf32>
      %77 = math.exp %76 : vector<30x24xf32>
      %cst_60 = arith.constant 1.000000e+00 : f32
      %78 = vector.broadcast %cst_60 : f32 to vector<30x24xf32>
      %79 = arith.addf %78, %77 : vector<30x24xf32>
      %80 = arith.divf %78, %79 : vector<30x24xf32>
      %cst_61 = arith.constant dense<0.000000e+00> : vector<30x8xf32>
      %81 = tpu.matmul %80, %5, %cst_61 {dimension_numbers = #tpu.dot_dimension_numbers<[1], [0], [0], [1], [0, 0, 1, 1], [], []>} : vector<30x24xf32>, vector<24x8xf32>, vector<30x8xf32> -> vector<30x8xf32>
      %c0_62 = arith.constant 0 : index
      %c8 = arith.constant 8 : index
      %82 = vector.load %arg24[%c0_62, %c8] : memref<30x16xf32, #tpu.memory_space<vmem>>, vector<30x8xf32>
      tpu.vector_store %arg24[%c0_62, %c8], %81 {strides = array<i32>} : memref<30x16xf32, #tpu.memory_space<vmem>>, vector<30x8xf32>,
      %c0_63 = arith.constant 0 : index
      %c0_64 = arith.constant 0 : index
      %83 = vector.load %arg24[%c0_63, %c0_64] : memref<30x16xf32, #tpu.memory_space<vmem>>, vector<30x16xf32>
      %cst_65 = arith.constant dense<0.000000e+00> : vector<13x16xf32>
      %84 = tpu.matmul %13, %83, %cst_65 {dimension_numbers = #tpu.dot_dimension_numbers<[1], [0], [0], [1], [0, 0, 1, 1], [], []>} : vector<13x30xf32>, vector<30x16xf32>, vector<13x16xf32> -> vector<13x16xf32>
      %85 = vector.broadcast %14 : vector<13x1xf32> to vector<13x16xf32>
      %86 = arith.addf %84, %85 : vector<13x16xf32>
      %87 = arith.negf %86 : vector<13x16xf32>
      %88 = math.exp %87 : vector<13x16xf32>
      %cst_66 = arith.constant 1.000000e+00 : f32
      %89 = vector.broadcast %cst_66 : f32 to vector<13x16xf32>
      %90 = arith.addf %89, %88 : vector<13x16xf32>
      %91 = arith.divf %89, %90 : vector<13x16xf32>
      %cst_67 = arith.constant dense<0.000000e+00> : vector<192x16xf32>
      %92 = tpu.matmul %15, %91, %cst_67 {dimension_numbers = #tpu.dot_dimension_numbers<[1], [0], [0], [1], [0, 0, 1, 1], [], []>} : vector<192x13xf32>, vector<13x16xf32>, vector<192x16xf32> -> vector<192x16xf32>
      %cst_68 = arith.constant dense<0.000000e+00> : vector<192x16xf32>
      %93 = tpu.matmul %17, %30, %cst_68 {dimension_numbers = #tpu.dot_dimension_numbers<[1], [0], [0], [1], [0, 0, 1, 1], [], []>} : vector<192x3xf32>, vector<3x16xf32>, vector<192x16xf32> -> vector<192x16xf32>
      %94 = arith.addf %92, %93 : vector<192x16xf32>
      %95 = vector.broadcast %16 : vector<192x1xf32> to vector<192x16xf32>
      %96 = vector.broadcast %arg27 : vector<1x16xf32> to vector<192x16xf32>
      %97 = arith.mulf %95, %96 : vector<192x16xf32>
      %98 = arith.addf %94, %97 : vector<192x16xf32>
      %99 = vector.broadcast %18 : vector<192x1xf32> to vector<192x16xf32>
      %100 = arith.addf %98, %99 : vector<192x16xf32>
      %cst_69 = arith.constant dense<0.000000e+00> : vector<192x16xf32>
      %101 = tpu.matmul %19, %arg26, %cst_69 {dimension_numbers = #tpu.dot_dimension_numbers<[1], [0], [0], [1], [0, 0, 1, 1], [], []>} : vector<192x64xf32>, vector<64x16xf32>, vector<192x16xf32> -> vector<192x16xf32>
      %102 = vector.broadcast %20 : vector<192x1xf32> to vector<192x16xf32>
      %103 = arith.addf %101, %102 : vector<192x16xf32>
      %104 = vector.extract_strided_slice %100 {offsets = [0, 0], sizes = [128, 16], strides = [1, 1]} : vector<192x16xf32> to vector<128x16xf32>
      %105 = vector.extract_strided_slice %103 {offsets = [0, 0], sizes = [128, 16], strides = [1, 1]} : vector<192x16xf32> to vector<128x16xf32>
      %106 = arith.addf %104, %105 : vector<128x16xf32>
      %107 = arith.negf %106 : vector<128x16xf32>
      %108 = math.exp %107 : vector<128x16xf32>
      %cst_70 = arith.constant 1.000000e+00 : f32
      %109 = vector.broadcast %cst_70 : f32 to vector<128x16xf32>
      %110 = arith.addf %109, %108 : vector<128x16xf32>
      %111 = arith.divf %109, %110 : vector<128x16xf32>
      %112 = vector.extract_strided_slice %111 {offsets = [0, 0], sizes = [64, 16], strides = [1, 1]} : vector<128x16xf32> to vector<64x16xf32>
      %113 = vector.extract_strided_slice %111 {offsets = [64, 0], sizes = [64, 16], strides = [1, 1]} : vector<128x16xf32> to vector<64x16xf32>
      %114 = vector.extract_strided_slice %100 {offsets = [128, 0], sizes = [64, 16], strides = [1, 1]} : vector<192x16xf32> to vector<64x16xf32>
      %115 = vector.extract_strided_slice %103 {offsets = [128, 0], sizes = [64, 16], strides = [1, 1]} : vector<192x16xf32> to vector<64x16xf32>
      %116 = arith.mulf %112, %115 : vector<64x16xf32>
      %117 = arith.addf %114, %116 : vector<64x16xf32>
      %118 = math.tanh %117 : vector<64x16xf32>
      %119 = arith.subf %arg26, %118 : vector<64x16xf32>
      %120 = arith.mulf %113, %119 : vector<64x16xf32>
      %121 = arith.addf %118, %120 : vector<64x16xf32>
      %122 = vector.broadcast %21 : vector<64x1xf32> to vector<64x16xf32>
      %123 = arith.mulf %122, %121 : vector<64x16xf32>
      %cst_71 = arith.constant dense<0.000000e+00> : vector<16xf32>
      %124 = vector.multi_reduction <add>, %123, %cst_71 [0] : vector<64x16xf32> to vector<16xf32>
      %125 = vector.shape_cast %124 : vector<16xf32> to vector<1x16xf32>
      %126 = vector.broadcast %22 : vector<1x1xf32> to vector<1x16xf32>
      %127 = arith.addf %125, %126 : vector<1x16xf32>
      %c0_72 = arith.constant 0 : index
      %128 = arith.index_cast %arg25 : i32 to index
      %c0_73 = arith.constant 0 : index
      %129 = vector.load %arg23[%c0_72, %128, %c0_73] : memref<1x3x16xf32, #tpu.memory_space<vmem>>, vector<1x1x16xf32>
      %130 = vector.shape_cast %129 : vector<1x1x16xf32> to vector<1x16xf32>
      %131 = vector.shape_cast %127 : vector<1x16xf32> to vector<1x1x16xf32>
      tpu.vector_store %arg23[%c0_72, %128, %c0_73], %131 {strides = array<i32>} : memref<1x3x16xf32, #tpu.memory_space<vmem>>, vector<1x1x16xf32>,
      scf.yield %121, %127 : vector<64x16xf32>, vector<1x16xf32>
    }
    %c3_i32_42 = arith.constant 3 : i32
    return
  }
  func.func @transform_0(%arg0: i32) -> (i32, i32, i32) {
    %c0_i32 = arith.constant 0 : i32
    %c0_i32_0 = arith.constant 0 : i32
    %c0_i32_1 = arith.constant 0 : i32
    return %arg0, %c0_i32, %c0_i32_0 : i32, i32, i32
  }
  func.func @transform_1(%arg0: i32) -> (i32, i32, i32, i32) {
    %c0_i32 = arith.constant 0 : i32
    %c0_i32_0 = arith.constant 0 : i32
    %c0_i32_1 = arith.constant 0 : i32
    %c0_i32_2 = arith.constant 0 : i32
    return %arg0, %c0_i32, %c0_i32_0, %c0_i32_1 : i32, i32, i32, i32
  }
  func.func @transform_2(%arg0: i32) -> (i32, i32) {
    %c0_i32 = arith.constant 0 : i32
    %c0_i32_0 = arith.constant 0 : i32
    %c0_i32_1 = arith.constant 0 : i32
    return %c0_i32, %c0_i32_0 : i32, i32
  }
  func.func @transform_3(%arg0: i32) -> (i32, i32) {
    %c0_i32 = arith.constant 0 : i32
    %c0_i32_0 = arith.constant 0 : i32
    %c0_i32_1 = arith.constant 0 : i32
    return %c0_i32, %c0_i32_0 : i32, i32
  }
  func.func @transform_4(%arg0: i32) -> (i32, i32) {
    %c0_i32 = arith.constant 0 : i32
    %c0_i32_0 = arith.constant 0 : i32
    %c0_i32_1 = arith.constant 0 : i32
    return %c0_i32, %c0_i32_0 : i32, i32
  }
  func.func @transform_5(%arg0: i32) -> (i32, i32) {
    %c0_i32 = arith.constant 0 : i32
    %c0_i32_0 = arith.constant 0 : i32
    %c0_i32_1 = arith.constant 0 : i32
    return %c0_i32, %c0_i32_0 : i32, i32
  }
  func.func @transform_6(%arg0: i32) -> (i32, i32) {
    %c0_i32 = arith.constant 0 : i32
    %c0_i32_0 = arith.constant 0 : i32
    %c0_i32_1 = arith.constant 0 : i32
    return %c0_i32, %c0_i32_0 : i32, i32
  }
  func.func @transform_7(%arg0: i32) -> (i32, i32) {
    %c0_i32 = arith.constant 0 : i32
    %c0_i32_0 = arith.constant 0 : i32
    %c0_i32_1 = arith.constant 0 : i32
    return %c0_i32, %c0_i32_0 : i32, i32
  }
  func.func @transform_8(%arg0: i32) -> (i32, i32) {
    %c0_i32 = arith.constant 0 : i32
    %c0_i32_0 = arith.constant 0 : i32
    %c0_i32_1 = arith.constant 0 : i32
    return %c0_i32, %c0_i32_0 : i32, i32
  }
  func.func @transform_9(%arg0: i32) -> (i32, i32) {
    %c0_i32 = arith.constant 0 : i32
    %c0_i32_0 = arith.constant 0 : i32
    %c0_i32_1 = arith.constant 0 : i32
    return %c0_i32, %c0_i32_0 : i32, i32
  }
  func.func @transform_10(%arg0: i32) -> (i32, i32) {
    %c0_i32 = arith.constant 0 : i32
    %c0_i32_0 = arith.constant 0 : i32
    %c0_i32_1 = arith.constant 0 : i32
    return %c0_i32, %c0_i32_0 : i32, i32
  }
  func.func @transform_11(%arg0: i32) -> (i32, i32) {
    %c0_i32 = arith.constant 0 : i32
    %c0_i32_0 = arith.constant 0 : i32
    %c0_i32_1 = arith.constant 0 : i32
    return %c0_i32, %c0_i32_0 : i32, i32
  }
  func.func @transform_12(%arg0: i32) -> (i32, i32) {
    %c0_i32 = arith.constant 0 : i32
    %c0_i32_0 = arith.constant 0 : i32
    %c0_i32_1 = arith.constant 0 : i32
    return %c0_i32, %c0_i32_0 : i32, i32
  }
  func.func @transform_13(%arg0: i32) -> (i32, i32) {
    %c0_i32 = arith.constant 0 : i32
    %c0_i32_0 = arith.constant 0 : i32
    %c0_i32_1 = arith.constant 0 : i32
    return %c0_i32, %c0_i32_0 : i32, i32
  }
  func.func @transform_14(%arg0: i32) -> (i32, i32) {
    %c0_i32 = arith.constant 0 : i32
    %c0_i32_0 = arith.constant 0 : i32
    %c0_i32_1 = arith.constant 0 : i32
    return %c0_i32, %c0_i32_0 : i32, i32
  }
  func.func @transform_15(%arg0: i32) -> (i32, i32) {
    %c0_i32 = arith.constant 0 : i32
    %c0_i32_0 = arith.constant 0 : i32
    %c0_i32_1 = arith.constant 0 : i32
    return %c0_i32, %c0_i32_0 : i32, i32
  }
  func.func @transform_16(%arg0: i32) -> (i32, i32) {
    %c0_i32 = arith.constant 0 : i32
    %c0_i32_0 = arith.constant 0 : i32
    %c0_i32_1 = arith.constant 0 : i32
    return %c0_i32, %c0_i32_0 : i32, i32
  }
  func.func @transform_17(%arg0: i32) -> (i32, i32) {
    %c0_i32 = arith.constant 0 : i32
    %c0_i32_0 = arith.constant 0 : i32
    %c0_i32_1 = arith.constant 0 : i32
    return %c0_i32, %c0_i32_0 : i32, i32
  }
  func.func @transform_18(%arg0: i32) -> (i32, i32) {
    %c0_i32 = arith.constant 0 : i32
    %c0_i32_0 = arith.constant 0 : i32
    %c0_i32_1 = arith.constant 0 : i32
    return %c0_i32, %c0_i32_0 : i32, i32
  }
  func.func @transform_19(%arg0: i32) -> (i32, i32) {
    %c0_i32 = arith.constant 0 : i32
    %c0_i32_0 = arith.constant 0 : i32
    %c0_i32_1 = arith.constant 0 : i32
    return %c0_i32, %c0_i32_0 : i32, i32
  }
  func.func @transform_20(%arg0: i32) -> (i32, i32) {
    %c0_i32 = arith.constant 0 : i32
    %c0_i32_0 = arith.constant 0 : i32
    %c0_i32_1 = arith.constant 0 : i32
    return %c0_i32, %c0_i32_0 : i32, i32
  }
  func.func @transform_21(%arg0: i32) -> (i32, i32) {
    %c0_i32 = arith.constant 0 : i32
    %c0_i32_0 = arith.constant 0 : i32
    %c0_i32_1 = arith.constant 0 : i32
    return %c0_i32, %c0_i32_0 : i32, i32
  }
  func.func @transform_22(%arg0: i32) -> (i32, i32, i32) {
    %c0_i32 = arith.constant 0 : i32
    %c0_i32_0 = arith.constant 0 : i32
    %c0_i32_1 = arith.constant 0 : i32
    return %arg0, %c0_i32, %c0_i32_0 : i32, i32, i32
  }
}

</mosaic_0001>

<bundles_post_ra>
// kernel: tpu_custom_call.1
= control target key start
LH: loop header
LB: loop body
LE: loop exit
PB: predicated region body
PF: predicated region fallthrough
CT: control target
= control target key end

     0   :  { %s4764_s29 = smov 0   ;;  %s6609_s0 = inlined_call_operand.vmem [shape: f32[2,1,16], index: 0, kind: input, shape index: {}]   ;;  %s6610_s1 = inlined_call_operand.vmem [shape: f32[2,3,3,16], index: 1, kind: input, shape index: {}]   ;;  %s6611_s2 = inlined_call_operand.vmem [shape: bf16[8,24], index: 2, kind: input, shape index: {}]   ;;  %s6612_s3 = inlined_call_operand.vmem [shape: bf16[8,24], index: 3, kind: input, shape index: {}]   ;;  %s6613_s4 = inlined_call_operand.vmem [shape: bf16[24,8], index: 4, kind: input, shape index: {}]   ;;  %s6614_s5 = inlined_call_operand.vmem [shape: f32[32,24], index: 5, kind: input, shape index: {}]   ;;  %s6615_s6 = inlined_call_operand.vmem [shape: f32[32,1], index: 6, kind: input, shape index: {}]   ;;  %s6616_s7 = inlined_call_operand.vmem [shape: f32[32,3], index: 7, kind: input, shape index: {}]   ;;  %s6617_s8 = inlined_call_operand.vmem [shape: f32[32,1], index: 8, kind: input, shape index: {}]   ;;  %s6618_s9 = inlined_call_operand.vmem [shape: f32[32,3], index: 9, kind: input, shape index: {}]   ;;  %s6619_s10 = inlined_call_operand.vmem [shape: f32[30,32], index: 10, kind: input, shape index: {}]   ;;  %s6620_s11 = inlined_call_operand.vmem [shape: f32[30,1], index: 11, kind: input, shape index: {}]   ;;  %s6621_s12 = inlined_call_operand.vmem [shape: f32[13,30], index: 12, kind: input, shape index: {}]   ;;  %s6622_s13 = inlined_call_operand.vmem [shape: f32[13,1], index: 13, kind: input, shape index: {}]   ;;  %s6623_s14 = inlined_call_operand.vmem [shape: f32[192,13], index: 14, kind: input, shape index: {}]   ;;  %s6624_s15 = inlined_call_operand.vmem [shape: f32[192,1], index: 15, kind: input, shape index: {}]   ;;  %s6625_s16 = inlined_call_operand.vmem [shape: f32[192,3], index: 16, kind: input, shape index: {}]   ;;  %s6626_s17 = inlined_call_operand.vmem [shape: f32[192,1], index: 17, kind: input, shape index: {}]   ;;  %s6627_s18 = inlined_call_operand.vmem [shape: f32[192,64], index: 18, kind: input, shape index: {}]   ;;  %s6628_s19 = inlined_call_operand.vmem [shape: f32[192,1], index: 19, kind: input, shape index: {}]   ;;  %s6629_s20 = inlined_call_operand.vmem [shape: f32[64,1], index: 20, kind: input, shape index: {}]   ;;  %s6630_s21 = inlined_call_operand.<no memory space> [shape: f32[1,1], index: 21, kind: input, shape index: {}]   ;;  %s6631_s22 = inlined_call_operand.vmem [shape: f32[2,3,16], index: 22, kind: output, shape index: {}]  }
   0x1   :  { %6661 = sst [smem:[#allocation241_spill]] %s6609_s0  ;;  %v27_v0 = vstv %s6630_s21 }
   0x2   :  { %6662 = sst [smem:[#allocation242_spill]] %s6610_s1  ;;  %28 = vst [vmem:[#allocation3] sm:$0x1] %v27_v0 }
   0x3   :  { %6663 = sst [smem:[#allocation243_spill]] %s6611_s2 }
   0x4   :  { %6664 = sst [smem:[#allocation244_spill]] %s6612_s3 }
   0x5   :  { %6665 = sst [smem:[#allocation245_spill]] %s6613_s4 }
   0x6   :  { %6666 = sst [smem:[#allocation246_spill]] %s6614_s5 }
   0x7   :  { %6667 = sst [smem:[#allocation247_spill]] %s6615_s6 }
   0x8   :  { %6668 = sst [smem:[#allocation248_spill]] %s6616_s7 }
   0x9 LB: > { %s3750_s30 = sadd.s32 4294967295, %s4601_s29   ;;  %p3754_p0 = scmp.ge.s32.totalorder %s4601_s29, 1  ;;  %s4601_s29 = sphi %s4764_s29, %s34_s29  }
   0xa   : > { %p622_p1 = scmp.lt.s32.totalorder %s4601_s29, 3 }
   0xc   : > { %p623_p2 = pnand %p3754_p0, %p622_p1 }
   0xd   : > { %p686_p3 = scmp.lt.s32.totalorder (!%p623_p2), %s3750_s30, 1  ;;  %s6669_s21 = sld [smem:[#allocation243_spill]] (!%p623_p2) }
   0xe   : > { %626 = sbr.rel (%p623_p2) target bundleno = 2128 (0x850), region = 108  ;;  %s6670_s5 = sld [smem:[#allocation244_spill]] (!%p623_p2) }
   0xf   : > { %s6671_s25 = sld [smem:[#allocation245_spill]] (!%p623_p2) }
  0x10   : > { %s6676_s28 = sld [smem:[#allocation246_spill]] (!%p623_p2) }
  0x11   : > { %s6682_s26 = sld [smem:[#allocation247_spill]] (!%p623_p2) }
  0x12   : > { %s6687_s7 = sld [smem:[#allocation248_spill]] (!%p623_p2) }
  0x13   : > { %v698_v1 = vld [vmem:[%s6669_s21] sm:$0xf]  ;;  %s7156_s30 = smov (!%p686_p3, %s3750_s30), 1  ;;  %v4866_v23 = vld [vmem:[%s6617_s8 + $0x8] sm:$0xff]  ;;  %s6694_s27 = sld [smem:[#allocation242_spill]]  ;;  %v4881_v24 = vld [vmem:[%s6617_s8 + $0x10] sm:$0xff] }
  0x14   : > { %v700_v2 = vld [vmem:[%s6670_s5] sm:$0xf]  ;;  %v4781_v4 = vunpack.c.l.bf16 %v698_v1  ;;  %s4309_s23 = smul.u32 12, %s7156_s30  ;;  %s3756_s3 = sshll.u32 %s7156_s30, 2  ;;  %6693 = vst [vmem:[#allocation22_spill] sm:$0xff] %v4866_v23  ;;  %6695 = vst [vmem:[#allocation23_spill] sm:$0xff] %v4881_v24 }
  0x15   : > { %v3914_v3 = vld [vmem:[%s6671_s25] sm:$0xff]   ;;  %v4783_v5 = vunpack.c.l.bf16 %v700_v2  ;;  %v704_v8 = vld [vmem:[%s6671_s25 + $0x8] sm:$0xf]  ;;  %s4876_s4 = scalar_lea.vmem %s6631_s22, %s3756_s3  ;;  %v4886_v25 = vld [vmem:[%s6617_s8 + $0x18] sm:$0xff]  ;;  %s6857_s0 = sld [smem:[#allocation241_spill]] }
  0x16   : > { %6672 = vst [vmem:[#allocation4_spill] sm:$0xff] %v4781_v4  ;;  %v4785_v6 = vunpack.c.l.bf16 %v3914_v3  ;;  %v4787_v7 = vunpack.c.h.bf16 %v3914_v3  ;;  %v4795_v9 = vld [vmem:[%s6676_s28] sm:$0xff]  ;;  %v4800_v10 = vld [vmem:[%s6676_s28 + $0x8] sm:$0xff]  ;;  %v4804_v11 = vunpack.c.l.bf16 %v704_v8  ;;  %v4809_v12 = vld [vmem:[%s6676_s28 + $0x10] sm:$0xff] }
  0x17   : > { %6673 = vst [vmem:[#allocation5_spill] sm:$0xff] %v4783_v5  ;;  %6677 = vst [vmem:[#allocation8_spill] sm:$0xff] %v4795_v9  ;;  %v4814_v13 = vld [vmem:[%s6676_s28 + $0x18] sm:$0xff]  ;;  %v4819_v14 = vld [vmem:[%s6682_s26] sm:$0xff] }
  0x18   : > { %6674 = vst [vmem:[#allocation6_spill] sm:$0xff] %v4785_v6  ;;  %6675 = vst [vmem:[#allocation7_spill] sm:$0xff] %v4787_v7  ;;  %v4824_v15 = vld [vmem:[%s6682_s26 + $0x8] sm:$0xff]  ;;  %v4829_v16 = vld [vmem:[%s6682_s26 + $0x10] sm:$0xff] }
  0x19   : > { %6678 = vst [vmem:[#allocation9_spill] sm:$0xff] %v4800_v10  ;;  %6679 = vst [vmem:[#allocation10_spill] sm:$0xff] %v4804_v11  ;;  %v4834_v17 = vld [vmem:[%s6682_s26 + $0x18] sm:$0xff]  ;;  %v4840_v18 = vld [vmem:[%s6687_s7] sm:$0xff]  ;;  %s4871_s25 = scalar_lea.vmem %s6694_s27, %s4309_s23  ;;  %s5752_s23 = smov 0  }
  0x1a   : > { %6680 = vst [vmem:[#allocation11_spill] sm:$0xff] %v4809_v12  ;;  %6681 = vst [vmem:[#allocation12_spill] sm:$0xff] %v4814_v13  ;;  %v4845_v19 = vld [vmem:[%s6687_s7 + $0x8] sm:$0xff]  ;;  %v4850_v20 = vld [vmem:[%s6687_s7 + $0x10] sm:$0xff] }
  0x1b   : > { %6683 = vst [vmem:[#allocation13_spill] sm:$0xff] %v4819_v14  ;;  %6684 = vst [vmem:[#allocation14_spill] sm:$0xff] %v4824_v15  ;;  %v4856_v21 = vld [vmem:[%s6687_s7 + $0x18] sm:$0xff]  ;;  %v4861_v22 = vld [vmem:[%s6617_s8] sm:$0xff]  ;;  %s688_s21 = scalar_lea.vmem %s6857_s0, %s7156_s30 }
  0x1c   : > { %6685 = vst [vmem:[#allocation15_spill] sm:$0xff] %v4829_v16  ;;  %6686 = vst [vmem:[#allocation16_spill] sm:$0xff] %v4834_v17  ;;  %v4891_v26 = vld [vmem:[%s6618_s9] sm:$0xff]  ;;  %v4896_v27 = vld [vmem:[%s6618_s9 + $0x8] sm:$0xff] }
  0x1d   : > { %6688 = vst [vmem:[#allocation17_spill] sm:$0xff] %v4840_v18  ;;  %6689 = vst [vmem:[#allocation18_spill] sm:$0xff] %v4845_v19  ;;  %v4901_v28 = vld [vmem:[%s6618_s9 + $0x10] sm:$0xff]  ;;  %v4906_v29 = vld [vmem:[%s6618_s9 + $0x18] sm:$0xff] }
  0x1e   : > { %6690 = vst [vmem:[#allocation19_spill] sm:$0xff] %v4850_v20  ;;  %6691 = vst [vmem:[#allocation20_spill] sm:$0xff] %v4856_v21  ;;  %v4911_v30 = vld [vmem:[%s6619_s10] sm:$0xff]  ;;  %v4916_v31 = vld [vmem:[%s6619_s10 + $0x8] sm:$0xff] }
  0x1f   : > { %6692 = vst [vmem:[#allocation21_spill] sm:$0xff] %v4861_v22  ;;  %6696 = vst [vmem:[#allocation24_spill] sm:$0xff] %v4886_v25  ;;  %v4921_v32 = vld [vmem:[%s6619_s10 + $0x10] sm:$0xff]  ;;  %v4926_v33 = vld [vmem:[%s6619_s10 + $0x18] sm:$0x3f] }
  0x20   : > { %6697 = vst [vmem:[#allocation25_spill] sm:$0xff] %v4891_v26  ;;  %6698 = vst [vmem:[#allocation26_spill] sm:$0xff] %v4896_v27  ;;  %v4931_v34 = vld [vmem:[%s6620_s11] sm:$0xff]  ;;  %v4936_v35 = vld [vmem:[%s6620_s11 + $0x8] sm:$0xff] }
  0x21   : > { %6699 = vst [vmem:[#allocation27_spill] sm:$0xff] %v4901_v28  ;;  %6700 = vst [vmem:[#allocation28_spill] sm:$0xff] %v4906_v29  ;;  %v4941_v36 = vld [vmem:[%s6620_s11 + $0x10] sm:$0xff]  ;;  %v4946_v37 = vld [vmem:[%s6620_s11 + $0x18] sm:$0x3f] }
  0x22   : > { %6701 = vst [vmem:[#allocation29_spill] sm:$0xff] %v4911_v30  ;;  %6702 = vst [vmem:[#allocation30_spill] sm:$0xff] %v4916_v31  ;;  %v4951_v38 = vld [vmem:[%s6621_s12] sm:$0xff]  ;;  %v4956_v39 = vld [vmem:[%s6621_s12 + $0x8] sm:$0x1f] }
  0x23   : > { %6703 = vst [vmem:[#allocation31_spill] sm:$0xff] %v4921_v32  ;;  %6704 = vst [vmem:[#allocation32_spill] sm:$0xff] %v4926_v33  ;;  %v4961_v40 = vld [vmem:[%s6622_s13] sm:$0xff]  ;;  %v4966_v41 = vld [vmem:[%s6622_s13 + $0x8] sm:$0x1f] }
  0x24   : > { %6705 = vst [vmem:[#allocation33_spill] sm:$0xff] %v4931_v34  ;;  %6706 = vst [vmem:[#allocation34_spill] sm:$0xff] %v4936_v35  ;;  %v4971_v42 = vld [vmem:[%s6623_s14] sm:$0xff]  ;;  %v4976_v43 = vld [vmem:[%s6623_s14 + $0x8] sm:$0xff] }
  0x25   : > { %6707 = vst [vmem:[#allocation35_spill] sm:$0xff] %v4941_v36  ;;  %6708 = vst [vmem:[#allocation36_spill] sm:$0xff] %v4946_v37  ;;  %v4981_v44 = vld [vmem:[%s6623_s14 + $0x10] sm:$0xff]  ;;  %v4986_v45 = vld [vmem:[%s6623_s14 + $0x18] sm:$0xff] }
  0x26   : > { %6709 = vst [vmem:[#allocation37_spill] sm:$0xff] %v4951_v38  ;;  %6710 = vst [vmem:[#allocation38_spill] sm:$0xff] %v4956_v39  ;;  %v4991_v46 = vld [vmem:[%s6623_s14 + $0x20] sm:$0xff]  ;;  %v4996_v47 = vld [vmem:[%s6623_s14 + $0x28] sm:$0xff] }
  0x27   : > { %6711 = vst [vmem:[#allocation39_spill] sm:$0xff] %v4961_v40  ;;  %6712 = vst [vmem:[#allocation40_spill] sm:$0xff] %v4966_v41  ;;  %v5001_v48 = vld [vmem:[%s6623_s14 + $0x30] sm:$0xff]  ;;  %v5006_v49 = vld [vmem:[%s6623_s14 + $0x38] sm:$0xff] }
  0x28   : > { %6713 = vst [vmem:[#allocation41_spill] sm:$0xff] %v4971_v42  ;;  %6714 = vst [vmem:[#allocation42_spill] sm:$0xff] %v4976_v43  ;;  %v5011_v50 = vld [vmem:[%s6623_s14 + $0x40] sm:$0xff]  ;;  %v5016_v51 = vld [vmem:[%s6623_s14 + $0x48] sm:$0xff] }
  0x29   : > { %6715 = vst [vmem:[#allocation43_spill] sm:$0xff] %v4981_v44  ;;  %6716 = vst [vmem:[#allocation44_spill] sm:$0xff] %v4986_v45  ;;  %v5021_v52 = vld [vmem:[%s6623_s14 + $0x50] sm:$0xff]  ;;  %v5026_v53 = vld [vmem:[%s6623_s14 + $0x58] sm:$0xff] }
  0x2a   : > { %6717 = vst [vmem:[#allocation45_spill] sm:$0xff] %v4991_v46  ;;  %6718 = vst [vmem:[#allocation46_spill] sm:$0xff] %v4996_v47  ;;  %v5031_v54 = vld [vmem:[%s6623_s14 + $0x60] sm:$0xff]  ;;  %v5036_v55 = vld [vmem:[%s6623_s14 + $0x68] sm:$0xff] }
  0x2b   : > { %6719 = vst [vmem:[#allocation47_spill] sm:$0xff] %v5001_v48  ;;  %6720 = vst [vmem:[#allocation48_spill] sm:$0xff] %v5006_v49  ;;  %v5041_v56 = vld [vmem:[%s6623_s14 + $0x70] sm:$0xff]  ;;  %v5046_v57 = vld [vmem:[%s6623_s14 + $0x78] sm:$0xff] }
  0x2c   : > { %6721 = vst [vmem:[#allocation49_spill] sm:$0xff] %v5011_v50  ;;  %6722 = vst [vmem:[#allocation50_spill] sm:$0xff] %v5016_v51  ;;  %v5051_v58 = vld [vmem:[%s6623_s14 + $0x80] sm:$0xff]  ;;  %v5056_v59 = vld [vmem:[%s6623_s14 + $0x88] sm:$0xff] }
  0x2d   : > { %6723 = vst [vmem:[#allocation51_spill] sm:$0xff] %v5021_v52  ;;  %6724 = vst [vmem:[#allocation52_spill] sm:$0xff] %v5026_v53  ;;  %v5061_v60 = vld [vmem:[%s6623_s14 + $0x90] sm:$0xff]  ;;  %v5066_v61 = vld [vmem:[%s6623_s14 + $0x98] sm:$0xff] }
  0x2e   : > { %6725 = vst [vmem:[#allocation53_spill] sm:$0xff] %v5031_v54  ;;  %6726 = vst [vmem:[#allocation54_spill] sm:$0xff] %v5036_v55  ;;  %v5071_v62 = vld [vmem:[%s6623_s14 + $0xa0] sm:$0xff]  ;;  %v5076_v63 = vld [vmem:[%s6623_s14 + $0xa8] sm:$0xff] }
  0x2f   : > { %6727 = vst [vmem:[#allocation55_spill] sm:$0xff] %v5041_v56  ;;  %6728 = vst [vmem:[#allocation56_spill] sm:$0xff] %v5046_v57  ;;  %v5081_v0 = vld [vmem:[%s6623_s14 + $0xb0] sm:$0xff]  ;;  %v5086_v1 = vld [vmem:[%s6623_s14 + $0xb8] sm:$0xff] }
  0x30   : > { %6729 = vst [vmem:[#allocation57_spill] sm:$0xff] %v5051_v58  ;;  %6730 = vst [vmem:[#allocation58_spill] sm:$0xff] %v5056_v59  ;;  %v5091_v2 = vld [vmem:[%s6624_s15] sm:$0xff]  ;;  %v5096_v3 = vld [vmem:[%s6624_s15 + $0x8] sm:$0xff] }
  0x31   : > { %6731 = vst [vmem:[#allocation59_spill] sm:$0xff] %v5061_v60  ;;  %6732 = vst [vmem:[#allocation60_spill] sm:$0xff] %v5066_v61  ;;  %v5101_v8 = vld [vmem:[%s6624_s15 + $0x10] sm:$0xff]  ;;  %v5126_v61 = vld [vmem:[%s6624_s15 + $0x38] sm:$0xff] }
  0x32   : > { %6733 = vst [vmem:[#allocation61_spill] sm:$0xff] %v5071_v62  ;;  %6734 = vst [vmem:[#allocation62_spill] sm:$0xff] %v5076_v63  ;;  %v5116_v63 = vld [vmem:[%s6624_s15 + $0x28] sm:$0xff]  ;;  %v5121_v62 = vld [vmem:[%s6624_s15 + $0x30] sm:$0xff] }
  0x33   : > { %6735 = vst [vmem:[#allocation63_spill] sm:$0xff] %v5081_v0  ;;  %6736 = vst [vmem:[#allocation64_spill] sm:$0xff] %v5086_v1  ;;  %v5106_v0 = vld [vmem:[%s6624_s15 + $0x18] sm:$0xff]  ;;  %v5111_v1 = vld [vmem:[%s6624_s15 + $0x20] sm:$0xff] }
  0x34   : > { %6737 = vst [vmem:[#allocation65_spill] sm:$0xff] %v5091_v2  ;;  %6738 = vst [vmem:[#allocation66_spill] sm:$0xff] %v5096_v3  ;;  %v5131_v60 = vld [vmem:[%s6624_s15 + $0x40] sm:$0xff]  ;;  %v5136_v59 = vld [vmem:[%s6624_s15 + $0x48] sm:$0xff] }
  0x35   : > { %6739 = vst [vmem:[#allocation67_spill] sm:$0xff] %v5101_v8  ;;  %6740 = vst [vmem:[#allocation68_spill] sm:$0xff] %v5106_v0  ;;  %v5141_v58 = vld [vmem:[%s6624_s15 + $0x50] sm:$0xff]  ;;  %v5146_v57 = vld [vmem:[%s6624_s15 + $0x58] sm:$0xff] }
  0x36   : > { %6741 = vst [vmem:[#allocation69_spill] sm:$0xff] %v5111_v1  ;;  %6742 = vst [vmem:[#allocation70_spill] sm:$0xff] %v5116_v63  ;;  %v5151_v56 = vld [vmem:[%s6624_s15 + $0x60] sm:$0xff]  ;;  %v5156_v55 = vld [vmem:[%s6624_s15 + $0x68] sm:$0xff] }
  0x37   : > { %6743 = vst [vmem:[#allocation71_spill] sm:$0xff] %v5121_v62  ;;  %6744 = vst [vmem:[#allocation72_spill] sm:$0xff] %v5126_v61  ;;  %v5161_v54 = vld [vmem:[%s6624_s15 + $0x70] sm:$0xff]  ;;  %v5166_v53 = vld [vmem:[%s6624_s15 + $0x78] sm:$0xff] }
  0x38   : > { %6745 = vst [vmem:[#allocation73_spill] sm:$0xff] %v5131_v60  ;;  %6746 = vst [vmem:[#allocation74_spill] sm:$0xff] %v5136_v59  ;;  %v5171_v52 = vld [vmem:[%s6624_s15 + $0x80] sm:$0xff]  ;;  %v5176_v51 = vld [vmem:[%s6624_s15 + $0x88] sm:$0xff] }
  0x39   : > { %6747 = vst [vmem:[#allocation75_spill] sm:$0xff] %v5141_v58  ;;  %6748 = vst [vmem:[#allocation76_spill] sm:$0xff] %v5146_v57  ;;  %v5181_v50 = vld [vmem:[%s6624_s15 + $0x90] sm:$0xff]  ;;  %v5186_v49 = vld [vmem:[%s6624_s15 + $0x98] sm:$0xff] }
  0x3a   : > { %6749 = vst [vmem:[#allocation77_spill] sm:$0xff] %v5151_v56  ;;  %6750 = vst [vmem:[#allocation78_spill] sm:$0xff] %v5156_v55  ;;  %v5191_v48 = vld [vmem:[%s6624_s15 + $0xa0] sm:$0xff]  ;;  %v5196_v47 = vld [vmem:[%s6624_s15 + $0xa8] sm:$0xff] }
  0x3b   : > { %6751 = vst [vmem:[#allocation79_spill] sm:$0xff] %v5161_v54  ;;  %6752 = vst [vmem:[#allocation80_spill] sm:$0xff] %v5166_v53  ;;  %v5201_v46 = vld [vmem:[%s6624_s15 + $0xb0] sm:$0xff]  ;;  %v5206_v45 = vld [vmem:[%s6624_s15 + $0xb8] sm:$0xff] }
  0x3c   : > { %6753 = vst [vmem:[#allocation81_spill] sm:$0xff] %v5171_v52  ;;  %6754 = vst [vmem:[#allocation82_spill] sm:$0xff] %v5176_v51  ;;  %v5211_v44 = vld [vmem:[%s6625_s16] sm:$0xff]  ;;  %v5216_v43 = vld [vmem:[%s6625_s16 + $0x8] sm:$0xff] }
  0x3d   : > { %6755 = vst [vmem:[#allocation83_spill] sm:$0xff] %v5181_v50  ;;  %6756 = vst [vmem:[#allocation84_spill] sm:$0xff] %v5186_v49  ;;  %v5221_v42 = vld [vmem:[%s6625_s16 + $0x10] sm:$0xff]  ;;  %v5226_v39 = vld [vmem:[%s6625_s16 + $0x18] sm:$0xff] }
  0x3e   : > { %6757 = vst [vmem:[#allocation85_spill] sm:$0xff] %v5191_v48  ;;  %6758 = vst [vmem:[#allocation86_spill] sm:$0xff] %v5196_v47  ;;  %v5291_v47 = vld [vmem:[%s6625_s16 + $0x80] sm:$0xff]  ;;  %v5296_v48 = vld [vmem:[%s6625_s16 + $0x88] sm:$0xff] }
  0x3f   : > { %6759 = vst [vmem:[#allocation87_spill] sm:$0xff] %v5201_v46  ;;  %6760 = vst [vmem:[#allocation88_spill] sm:$0xff] %v5206_v45  ;;  %v5231_v45 = vld [vmem:[%s6625_s16 + $0x20] sm:$0xff]  ;;  %v5286_v46 = vld [vmem:[%s6625_s16 + $0x78] sm:$0xff] }
  0x40   : > { %6761 = vst [vmem:[#allocation89_spill] sm:$0xff] %v5211_v44  ;;  %6762 = vst [vmem:[#allocation90_spill] sm:$0xff] %v5216_v43  ;;  %v5236_v44 = vld [vmem:[%s6625_s16 + $0x28] sm:$0xff]  ;;  %v5241_v43 = vld [vmem:[%s6625_s16 + $0x30] sm:$0xff] }
  0x41   : > { %6763 = vst [vmem:[#allocation91_spill] sm:$0xff] %v5221_v42  ;;  %6764 = vst [vmem:[#allocation92_spill] sm:$0xff] %v5226_v39  ;;  %v5246_v42 = vld [vmem:[%s6625_s16 + $0x38] sm:$0xff]  ;;  %v5251_v39 = vld [vmem:[%s6625_s16 + $0x40] sm:$0xff] }
  0x42   : > { %6765 = vst [vmem:[#allocation93_spill] sm:$0xff] %v5231_v45  ;;  %6766 = vst [vmem:[#allocation94_spill] sm:$0xff] %v5236_v44  ;;  %v5256_v45 = vld [vmem:[%s6625_s16 + $0x48] sm:$0xff]  ;;  %v5261_v44 = vld [vmem:[%s6625_s16 + $0x50] sm:$0xff] }
  0x43   : > { %6767 = vst [vmem:[#allocation95_spill] sm:$0xff] %v5241_v43  ;;  %6768 = vst [vmem:[#allocation96_spill] sm:$0xff] %v5246_v42  ;;  %v5266_v43 = vld [vmem:[%s6625_s16 + $0x58] sm:$0xff]  ;;  %v5271_v42 = vld [vmem:[%s6625_s16 + $0x60] sm:$0xff] }
  0x44   : > { %6769 = vst [vmem:[#allocation97_spill] sm:$0xff] %v5251_v39  ;;  %6770 = vst [vmem:[#allocation98_spill] sm:$0xff] %v5256_v45  ;;  %v5276_v39 = vld [vmem:[%s6625_s16 + $0x68] sm:$0xff]  ;;  %v5281_v45 = vld [vmem:[%s6625_s16 + $0x70] sm:$0xff] }
  0x45   : > { %6771 = vst [vmem:[#allocation99_spill] sm:$0xff] %v5261_v44  ;;  %6772 = vst [vmem:[#allocation100_spill] sm:$0xff] %v5266_v43  ;;  %v5301_v49 = vld [vmem:[%s6625_s16 + $0x90] sm:$0xff]  ;;  %v5306_v50 = vld [vmem:[%s6625_s16 + $0x98] sm:$0xff] }
  0x46   : > { %6773 = vst [vmem:[#allocation101_spill] sm:$0xff] %v5271_v42  ;;  %6774 = vst [vmem:[#allocation102_spill] sm:$0xff] %v5276_v39  ;;  %v5311_v51 = vld [vmem:[%s6625_s16 + $0xa0] sm:$0xff]  ;;  %v5316_v52 = vld [vmem:[%s6625_s16 + $0xa8] sm:$0xff] }
  0x47   : > { %6775 = vst [vmem:[#allocation103_spill] sm:$0xff] %v5281_v45  ;;  %6776 = vst [vmem:[#allocation104_spill] sm:$0xff] %v5286_v46  ;;  %v5321_v53 = vld [vmem:[%s6625_s16 + $0xb0] sm:$0xff]  ;;  %v5326_v54 = vld [vmem:[%s6625_s16 + $0xb8] sm:$0xff] }
  0x48   : > { %6777 = vst [vmem:[#allocation105_spill] sm:$0xff] %v5291_v47  ;;  %6778 = vst [vmem:[#allocation106_spill] sm:$0xff] %v5296_v48  ;;  %v5331_v55 = vld [vmem:[%s6626_s17] sm:$0xff]  ;;  %v5336_v56 = vld [vmem:[%s6626_s17 + $0x8] sm:$0xff] }
  0x49   : > { %6779 = vst [vmem:[#allocation107_spill] sm:$0xff] %v5301_v49  ;;  %6780 = vst [vmem:[#allocation108_spill] sm:$0xff] %v5306_v50  ;;  %v5341_v57 = vld [vmem:[%s6626_s17 + $0x10] sm:$0xff]  ;;  %v5346_v58 = vld [vmem:[%s6626_s17 + $0x18] sm:$0xff] }
  0x4a   : > { %6781 = vst [vmem:[#allocation109_spill] sm:$0xff] %v5311_v51  ;;  %6782 = vst [vmem:[#allocation110_spill] sm:$0xff] %v5316_v52  ;;  %v5351_v59 = vld [vmem:[%s6626_s17 + $0x20] sm:$0xff]  ;;  %v5476_v60 = vld [vmem:[%s6627_s18 + $0x28] sm:$0xff] }
  0x4b   : > { %6783 = vst [vmem:[#allocation111_spill] sm:$0xff] %v5321_v53  ;;  %6784 = vst [vmem:[#allocation112_spill] sm:$0xff] %v5326_v54  ;;  %v5481_v61 = vld [vmem:[%s6627_s18 + $0x30] sm:$0xff]  ;;  %v5486_v62 = vld [vmem:[%s6627_s18 + $0x38] sm:$0xff] }
  0x4c   : > { %6785 = vst [vmem:[#allocation113_spill] sm:$0xff] %v5331_v55  ;;  %6786 = vst [vmem:[#allocation114_spill] sm:$0xff] %v5336_v56  ;;  %v5356_v55 = vld [vmem:[%s6626_s17 + $0x28] sm:$0xff]  ;;  %v5361_v56 = vld [vmem:[%s6626_s17 + $0x30] sm:$0xff] }
  0x4d   : > { %6787 = vst [vmem:[#allocation115_spill] sm:$0xff] %v5341_v57  ;;  %6788 = vst [vmem:[#allocation116_spill] sm:$0xff] %v5346_v58  ;;  %v5366_v57 = vld [vmem:[%s6626_s17 + $0x38] sm:$0xff]  ;;  %v5371_v58 = vld [vmem:[%s6626_s17 + $0x40] sm:$0xff] }
  0x4e   : > { %6789 = vst [vmem:[#allocation117_spill] sm:$0xff] %v5351_v59  ;;  %6790 = vst [vmem:[#allocation118_spill] sm:$0xff] %v5356_v55  ;;  %v5376_v59 = vld [vmem:[%s6626_s17 + $0x48] sm:$0xff]  ;;  %v5381_v55 = vld [vmem:[%s6626_s17 + $0x50] sm:$0xff] }
  0x4f   : > { %6791 = vst [vmem:[#allocation119_spill] sm:$0xff] %v5361_v56  ;;  %6792 = vst [vmem:[#allocation120_spill] sm:$0xff] %v5366_v57  ;;  %v5386_v56 = vld [vmem:[%s6626_s17 + $0x58] sm:$0xff]  ;;  %v5391_v57 = vld [vmem:[%s6626_s17 + $0x60] sm:$0xff] }
  0x50   : > { %6793 = vst [vmem:[#allocation121_spill] sm:$0xff] %v5371_v58  ;;  %6794 = vst [vmem:[#allocation122_spill] sm:$0xff] %v5376_v59  ;;  %v5396_v58 = vld [vmem:[%s6626_s17 + $0x68] sm:$0xff]  ;;  %v5401_v59 = vld [vmem:[%s6626_s17 + $0x70] sm:$0xff] }
  0x51   : > { %6795 = vst [vmem:[#allocation123_spill] sm:$0xff] %v5381_v55  ;;  %6796 = vst [vmem:[#allocation124_spill] sm:$0xff] %v5386_v56  ;;  %v5406_v55 = vld [vmem:[%s6626_s17 + $0x78] sm:$0xff]  ;;  %v5411_v56 = vld [vmem:[%s6626_s17 + $0x80] sm:$0xff] }
  0x52   : > { %6797 = vst [vmem:[#allocation125_spill] sm:$0xff] %v5391_v57  ;;  %6798 = vst [vmem:[#allocation126_spill] sm:$0xff] %v5396_v58  ;;  %v5416_v57 = vld [vmem:[%s6626_s17 + $0x88] sm:$0xff]  ;;  %v5421_v58 = vld [vmem:[%s6626_s17 + $0x90] sm:$0xff] }
  0x53   : > { %6799 = vst [vmem:[#allocation127_spill] sm:$0xff] %v5401_v59  ;;  %6800 = vst [vmem:[#allocation128_spill] sm:$0xff] %v5406_v55  ;;  %v5426_v59 = vld [vmem:[%s6626_s17 + $0x98] sm:$0xff]  ;;  %v5431_v55 = vld [vmem:[%s6626_s17 + $0xa0] sm:$0xff] }
  0x54   : > { %6801 = vst [vmem:[#allocation129_spill] sm:$0xff] %v5411_v56  ;;  %6802 = vst [vmem:[#allocation130_spill] sm:$0xff] %v5416_v57  ;;  %v5436_v56 = vld [vmem:[%s6626_s17 + $0xa8] sm:$0xff]  ;;  %v5441_v57 = vld [vmem:[%s6626_s17 + $0xb0] sm:$0xff] }
  0x55   : > { %6803 = vst [vmem:[#allocation131_spill] sm:$0xff] %v5421_v58  ;;  %6804 = vst [vmem:[#allocation132_spill] sm:$0xff] %v5426_v59  ;;  %v5446_v58 = vld [vmem:[%s6626_s17 + $0xb8] sm:$0xff]  ;;  %v5451_v59 = vld [vmem:[%s6627_s18] sm:$0xff] }
  0x56   : > { %6805 = vst [vmem:[#allocation133_spill] sm:$0xff] %v5431_v55  ;;  %6806 = vst [vmem:[#allocation134_spill] sm:$0xff] %v5436_v56  ;;  %v5456_v55 = vld [vmem:[%s6627_s18 + $0x8] sm:$0xff]  ;;  %v5461_v56 = vld [vmem:[%s6627_s18 + $0x10] sm:$0xff] }
  0x57   : > { %6807 = vst [vmem:[#allocation135_spill] sm:$0xff] %v5441_v57  ;;  %6808 = vst [vmem:[#allocation136_spill] sm:$0xff] %v5446_v58  ;;  %v5466_v57 = vld [vmem:[%s6627_s18 + $0x18] sm:$0xff]  ;;  %v5471_v58 = vld [vmem:[%s6627_s18 + $0x20] sm:$0xff] }
  0x58   : > { %6809 = vst [vmem:[#allocation137_spill] sm:$0xff] %v5451_v59  ;;  %6810 = vst [vmem:[#allocation138_spill] sm:$0xff] %v5456_v55  ;;  %v5491_v63 = vld [vmem:[%s6627_s18 + $0x40] sm:$0xff]  ;;  %v5496_v1 = vld [vmem:[%s6627_s18 + $0x48] sm:$0xff] }
  0x59   : > { %6811 = vst [vmem:[#allocation139_spill] sm:$0xff] %v5461_v56  ;;  %6812 = vst [vmem:[#allocation140_spill] sm:$0xff] %v5466_v57  ;;  %v5501_v0 = vld [vmem:[%s6627_s18 + $0x50] sm:$0xff]  ;;  %v5506_v8 = vld [vmem:[%s6627_s18 + $0x58] sm:$0xff] }
  0x5a   : > { %6813 = vst [vmem:[#allocation141_spill] sm:$0xff] %v5471_v58  ;;  %6814 = vst [vmem:[#allocation142_spill] sm:$0xff] %v5476_v60  ;;  %v5511_v3 = vld [vmem:[%s6627_s18 + $0x60] sm:$0xff]  ;;  %v5516_v2 = vld [vmem:[%s6627_s18 + $0x68] sm:$0xff] }
  0x5b   : > { %6815 = vst [vmem:[#allocation143_spill] sm:$0xff] %v5481_v61  ;;  %6816 = vst [vmem:[#allocation144_spill] sm:$0xff] %v5486_v62  ;;  %v5521_v40 = vld [vmem:[%s6627_s18 + $0x70] sm:$0xff]  ;;  %v5526_v41 = vld [vmem:[%s6627_s18 + $0x78] sm:$0xff]  ;;  %v5748_v62 = vmov 0.0  }
  0x5c   : > { %6817 = vst [vmem:[#allocation145_spill] sm:$0xff] %v5491_v63  ;;  %6818 = vst [vmem:[#allocation146_spill] sm:$0xff] %v5496_v1  ;;  %v5531_v38 = vld [vmem:[%s6627_s18 + $0x80] sm:$0xff]  ;;  %v5742_v1 = vmov 0.0   ;;  %v5744_v63 = vmov 0.0  }
  0x5d   : > { %6819 = vst [vmem:[#allocation147_spill] sm:$0xff] %v5501_v0  ;;  %6820 = vst [vmem:[#allocation148_spill] sm:$0xff] %v5506_v8  ;;  %v893_v8 = vld [vmem:[%s688_s21] sm:$0x1]   ;;  %v5738_v0 = vmov 0.0  }
  0x5e   : > { %6821 = vst [vmem:[#allocation149_spill] sm:$0xff] %v5511_v3  ;;  %6822 = vst [vmem:[#allocation150_spill] sm:$0xff] %v5516_v2  ;;  %v5536_v3 = vld [vmem:[%s6627_s18 + $0x88] sm:$0xff]  ;;  %v5541_v2 = vld [vmem:[%s6627_s18 + $0x90] sm:$0xff] }
  0x5f   : > { %6823 = vst [vmem:[#allocation151_spill] sm:$0xff] %v5521_v40  ;;  %6824 = vst [vmem:[#allocation152_spill] sm:$0xff] %v5526_v41  ;;  %v5546_v40 = vld [vmem:[%s6627_s18 + $0x98] sm:$0xff]  ;;  %v5551_v41 = vld [vmem:[%s6627_s18 + $0xa0] sm:$0xff] }
  0x60   : > { %6825 = vst [vmem:[#allocation153_spill] sm:$0xff] %v5531_v38  ;;  %6826 = vst [vmem:[#allocation154_spill] sm:$0xff] %v5536_v3  ;;  %v5556_v38 = vld [vmem:[%s6627_s18 + $0xa8] sm:$0xff]  ;;  %v5561_v3 = vld [vmem:[%s6627_s18 + $0xb0] sm:$0xff] }
  0x61   : > { %6827 = vst [vmem:[#allocation155_spill] sm:$0xff] %v5541_v2  ;;  %6828 = vst [vmem:[#allocation156_spill] sm:$0xff] %v5546_v40  ;;  %v5566_v2 = vld [vmem:[%s6627_s18 + $0xb8] sm:$0xff]  ;;  %v5571_v40 = vld [vmem:[%s6628_s19] sm:$0xff] }
  0x62   : > { %6829 = vst [vmem:[#allocation157_spill] sm:$0xff] %v5551_v41  ;;  %6830 = vst [vmem:[#allocation158_spill] sm:$0xff] %v5556_v38  ;;  %v5576_v41 = vld [vmem:[%s6628_s19 + $0x8] sm:$0xff]  ;;  %v5581_v38 = vld [vmem:[%s6628_s19 + $0x10] sm:$0xff] }
  0x63   : > { %6831 = vst [vmem:[#allocation159_spill] sm:$0xff] %v5561_v3  ;;  %6832 = vst [vmem:[#allocation160_spill] sm:$0xff] %v5566_v2  ;;  %v5586_v3 = vld [vmem:[%s6628_s19 + $0x18] sm:$0xff]  ;;  %v5591_v2 = vld [vmem:[%s6628_s19 + $0x20] sm:$0xff] }
  0x64   : > { %6833 = vst [vmem:[#allocation161_spill] sm:$0xff] %v5571_v40  ;;  %6834 = vst [vmem:[#allocation162_spill] sm:$0xff] %v5576_v41  ;;  %v5596_v40 = vld [vmem:[%s6628_s19 + $0x28] sm:$0xff]  ;;  %v5601_v41 = vld [vmem:[%s6628_s19 + $0x30] sm:$0xff] }
  0x65   : > { %6835 = vst [vmem:[#allocation163_spill] sm:$0xff] %v5581_v38  ;;  %6836 = vst [vmem:[#allocation164_spill] sm:$0xff] %v5586_v3  ;;  %v5606_v38 = vld [vmem:[%s6628_s19 + $0x38] sm:$0xff]  ;;  %v5611_v3 = vld [vmem:[%s6628_s19 + $0x40] sm:$0xff] }
  0x66   : > { %6837 = vst [vmem:[#allocation165_spill] sm:$0xff] %v5591_v2  ;;  %6838 = vst [vmem:[#allocation166_spill] sm:$0xff] %v5596_v40  ;;  %v5616_v40 = vld [vmem:[%s6628_s19 + $0x48] sm:$0xff] }
  0x67   : > { %6839 = vst [vmem:[#allocation167_spill] sm:$0xff] %v5601_v41  ;;  %6840 = vst [vmem:[#allocation168_spill] sm:$0xff] %v5606_v38  ;;  %v5621_v41 = vld [vmem:[%s6628_s19 + $0x50] sm:$0xff]  ;;  %v5626_v38 = vld [vmem:[%s6628_s19 + $0x58] sm:$0xff] }
  0x68   : > { %6841 = vst [vmem:[#allocation169_spill] sm:$0xff] %v5611_v3  ;;  %6842 = vst [vmem:[#allocation170_spill] sm:$0xff] %v5616_v40  ;;  %v5631_v3 = vld [vmem:[%s6628_s19 + $0x60] sm:$0xff]  ;;  %v5636_v2 = vld [vmem:[%s6628_s19 + $0x68] sm:$0xff] }
  0x69   : > { %6843 = vst [vmem:[#allocation171_spill] sm:$0xff] %v5621_v41  ;;  %6844 = vst [vmem:[#allocation172_spill] sm:$0xff] %v5626_v38  ;;  %v5641_v40 = vld [vmem:[%s6628_s19 + $0x70] sm:$0xff]  ;;  %v5646_v41 = vld [vmem:[%s6628_s19 + $0x78] sm:$0xff] }
  0x6a   : > { %6845 = vst [vmem:[#allocation173_spill] sm:$0xff] %v5631_v3  ;;  %6846 = vst [vmem:[#allocation174_spill] sm:$0xff] %v5636_v2  ;;  %v5651_v38 = vld [vmem:[%s6628_s19 + $0x80] sm:$0xff]  ;;  %v5656_v3 = vld [vmem:[%s6628_s19 + $0x88] sm:$0xff] }
  0x6b   : > { %6847 = vst [vmem:[#allocation175_spill] sm:$0xff] %v5641_v40  ;;  %6848 = vst [vmem:[#allocation176_spill] sm:$0xff] %v5646_v41  ;;  %v5661_v2 = vld [vmem:[%s6628_s19 + $0x90] sm:$0xff]  ;;  %v5666_v40 = vld [vmem:[%s6628_s19 + $0x98] sm:$0xff] }
  0x6c   : > { %6849 = vst [vmem:[#allocation177_spill] sm:$0xff] %v5651_v38  ;;  %6850 = vst [vmem:[#allocation178_spill] sm:$0xff] %v5656_v3  ;;  %v5671_v41 = vld [vmem:[%s6628_s19 + $0xa0] sm:$0xff]  ;;  %v5676_v38 = vld [vmem:[%s6628_s19 + $0xa8] sm:$0xff] }
  0x6d   : > { %6851 = vst [vmem:[#allocation179_spill] sm:$0xff] %v5661_v2  ;;  %6852 = vst [vmem:[#allocation180_spill] sm:$0xff] %v5666_v40  ;;  %v5681_v3 = vld [vmem:[%s6628_s19 + $0xb0] sm:$0xff]  ;;  %v5686_v2 = vld [vmem:[%s6628_s19 + $0xb8] sm:$0xff] }
  0x6e   : > { %6853 = vst [vmem:[#allocation181_spill] sm:$0xff] %v5671_v41  ;;  %6854 = vst [vmem:[#allocation182_spill] sm:$0xff] %v5676_v38  ;;  %v5695_v41 = vld [vmem:[%s6629_s20] sm:$0xff]  ;;  %v5700_v38 = vld [vmem:[%s6629_s20 + $0x8] sm:$0xff] }
  0x6f   : > { %6855 = vst [vmem:[#allocation183_spill] sm:$0xff] %v5681_v3  ;;  %6856 = vst [vmem:[#allocation184_spill] sm:$0xff] %v5686_v2  ;;  %v5705_v3 = vld [vmem:[%s6629_s20 + $0x10] sm:$0xff]  ;;  %v5710_v2 = vld [vmem:[%s6629_s20 + $0x18] sm:$0xff] }
  0x70   : > { %6858 = vst [vmem:[#allocation185_spill] sm:$0xff] %v5695_v41  ;;  %6859 = vst [vmem:[#allocation186_spill] sm:$0xff] %v5700_v38  ;;  %v5715_v40 = vld [vmem:[%s6629_s20 + $0x20] sm:$0xff]  ;;  %v5720_v41 = vld [vmem:[%s6629_s20 + $0x28] sm:$0xff] }
  0x71   : > { %6860 = vst [vmem:[#allocation187_spill] sm:$0xff] %v5705_v3  ;;  %6861 = vst [vmem:[#allocation188_spill] sm:$0xff] %v5710_v2  ;;  %v5725_v38 = vld [vmem:[%s6629_s20 + $0x30] sm:$0xff]  ;;  %v5730_v3 = vld [vmem:[%s6629_s20 + $0x38] sm:$0xff] }
  0x72   : > { %6862 = vst [vmem:[#allocation189_spill] sm:$0xff] %v5715_v40  ;;  %6863 = vst [vmem:[#allocation190_spill] sm:$0xff] %v5720_v41  ;;  %v5732_v2 = vld [vmem:[#allocation3] sm:$0x1]  ;;  %v5736_v40 = vmov 0.0   ;;  %v5740_v41 = vmov 0.0  }
  0x73   : > { %6864 = vst [vmem:[#allocation191_spill] sm:$0xff] %v5725_v38  ;;  %6865 = vst [vmem:[#allocation192_spill] sm:$0xff] %v5730_v3  ;;  %v5746_v38 = vmov 0.0   ;;  %v5750_v3 = vmov 0.0  }
  0x74   : > { %6866 = vst [vmem:[#allocation193_spill] sm:$0xff] %v5732_v2 }
  0x75 LB: >> { %v6867_v33 = vld [vmem:[#allocation32_spill] sm:$0xff]  ;;  %v6868_v32 = vld [vmem:[#allocation31_spill] sm:$0xff]  ;;  %v6869_v31 = vld [vmem:[#allocation30_spill] sm:$0xff]  ;;  %6880 = vst [vmem:[#allocation194_spill] sm:$0xff] %v4609_v40  ;;  %vm940_vm0 = vcmask 23552   ;;  %s3757_s21 = sshll.u32 %s4641_s23, 2  ;;  %s3650_s7 = scalar_lea.vmem %s4876_s4, %s4641_s23  ;;  %v4613_v0 = vphi %v5738_v0, %v3568_v0   ;;  %v4609_v40 = vphi %v5736_v40, %v3569_v40   ;;  %v4605_v8 = vphi %v893_v8, %v3649_v8   ;;  %s4641_s23 = sphi %s5752_s23, %s899_s23   ;;  %v4637_v3 = vphi %v5750_v3, %v6559_v3   ;;  %v4633_v62 = vphi %v5748_v62, %v7154_v62   ;;  %v4629_v38 = vphi %v5746_v38, %v7153_v38   ;;  %v4625_v63 = vphi %v5744_v63, %v6563_v63   ;;  %v4621_v1 = vphi %v5742_v1, %v3566_v1   ;;  %v4617_v41 = vphi %v5740_v41, %v3567_v41  }
  0x76   : >> { %v6870_v30 = vld [vmem:[#allocation29_spill] sm:$0xff]  ;;  %v6871_v13 = vld [vmem:[#allocation12_spill] sm:$0xff]  ;;  %v6872_v12 = vld [vmem:[#allocation11_spill] sm:$0xff]  ;;  %6881 = vst [vmem:[#allocation195_spill] sm:$0xff] %v4613_v0  ;;  %vm953_vm1 = vcmask 1042432   ;;  %v4643_v2 = vmov 0   ;;  %s910_s6 = scalar_lea.vmem %s4871_s25, %s3757_s21 }
  0x77   : >> { %v6873_v11 = vld [vmem:[#allocation10_spill] sm:$0xff]  ;;  %v6874_v10 = vld [vmem:[#allocation9_spill] sm:$0xff]  ;;  %v6875_v9 = vld [vmem:[#allocation8_spill] sm:$0xff]  ;;  %6882 = vst [vmem:[#allocation196_spill] sm:$0xff] %v4617_v41  ;;  %4402 = vset.pattern.permute.xlu1 %v4643_v2  ;;  %4401 = vset.pattern.permute.xlu0 %v4643_v2  ;;  %v932_v2 = vlaneseq  ;;  %vm1163_vm2 = vcmask 64512   ;;  %s4644_s28 = smov 120  }
  0x78   : >> { %v6876_v7 = vld [vmem:[#allocation7_spill] sm:$0xff]  ;;  %v6877_v6 = vld [vmem:[#allocation6_spill] sm:$0xff]  ;;  %v6878_v5 = vld [vmem:[#allocation5_spill] sm:$0xff]  ;;  %6883 = vst [vmem:[#allocation197_spill] sm:$0xff] %v4621_v1  ;;  %vm1406_vm3 = vcmask 261120   ;;  %vm1528_vm4 = vcmask 195584  }
  0x79   : >> { %v6879_v4 = vld [vmem:[#allocation4_spill] sm:$0xff]  ;;  %6884 = vst [vmem:[#allocation198_spill] sm:$0xff] %v4625_v63  ;;  %6885 = vst [vmem:[#allocation199_spill] sm:$0xff] %v4629_v38  ;;  %v6888_v18 = vld [vmem:[#allocation17_spill] sm:$0xff]  ;;  %vm1629_vm5 = vcmask 62464   ;;  %vm3152_vm6 = vcmask 523264  }
  0x7a   : >> { %6886 = vst [vmem:[#allocation200_spill] sm:$0xff] %v4633_v62  ;;  %6887 = vst [vmem:[#allocation201_spill] sm:$0xff] %v4637_v3  ;;  %4068 = vmatprep.mubr.msk.f32.mxu0 %vm940_vm0, %v6888_v18  ;;  %v6889_v26 = vld [vmem:[#allocation25_spill] sm:$0xff]  ;;  %v6890_v15 = vld [vmem:[#allocation14_spill] sm:$0xff]  ;;  %s4645_s26 = smov 8   ;;  %vm2103_vm7 = vcmask 244736  }
  0x7b   : >> { %4076 = vmatprep.mubr.msk.f32.mxu1 %vm940_vm0, %v6889_v26  ;;  %919 = vperm.xlu1 %4402, %v6890_v15   ;;  %v6891_v14 = vld [vmem:[#allocation13_spill] sm:$0xff]  ;;  %v5790_v61 = vld [vmem:[%s910_s6] sm:$0x7]  ;;  %v6892_v19 = vld [vmem:[#allocation18_spill] sm:$0xff]  ;;  %vm2087_vm8 = vcmask 128064   ;;  %vm2083_vm9 = vcmask 130112  }
  0x7c   : >> { %914 = vperm.xlu0 %4401, %v6891_v14   ;;  %4066 = vmatprep.subr.msk.mxu0 %vm953_vm1, %v5790_v61  ;;  %v6893_v27 = vld [vmem:[#allocation26_spill] sm:$0xff]  ;;  %v6894_v20 = vld [vmem:[#allocation19_spill] sm:$0xff]  ;;  %v6897_v22 = vld [vmem:[#allocation21_spill] sm:$0xff]  ;;  %v5827_v14 = vshrl.u32 %v932_v2, 7  ;;  %vm2110_vm10 = vcmask 1045504   ;;  %vm2458_vm11 = vcmask 105472  }
  0x7d   : >> { %4074 = vmatprep.subr.msk.mxu1 %vm953_vm1, %v5790_v61  ;;  %4067 = vmatpush3.msk.msra.mxu0 %vm953_vm1, %v5790_v61  ;;  %v6895_v28 = vld [vmem:[#allocation27_spill] sm:$0xff]  ;;  %v6896_v23 = vld [vmem:[#allocation22_spill] sm:$0xff]  ;;  %v6898_v21 = vld [vmem:[#allocation20_spill] sm:$0xff]  ;;  %vm2531_vm12 = vcmask 1044480   ;;  %vm3618_vm13 = vcmask 130048   ;;  %vm3651_vm14 = vcmask 122880  }
  0x7e   : >> { %4075 = vmatpush3.msk.msra.mxu1 %vm953_vm1, %v5790_v61  ;;  %4069 = vmatmul.mubr.msk.f32.vlgmr.msra.gmra.mxu0 %vm940_vm0, %v6892_v19  ;;  %v6899_v29 = vld [vmem:[#allocation28_spill] sm:$0xff]  ;;  %v6900_v24 = vld [vmem:[#allocation23_spill] sm:$0xff]  ;;  %v6904_v35 = vld [vmem:[#allocation34_spill] sm:$0xff]  ;;  %6908 = vst [vmem:[#allocation202_spill] sm:$0xff] %v5827_v14  ;;  %s899_s23 = sadd.s32 1, %s4641_s23  }
  0x7f   : >> { %4077 = vmatmul.mubr.msk.f32.vlgmr.msra.gmra.mxu1 %vm940_vm0, %v6893_v27  ;;  %4071 = vmatprep.mubr.msk.f32.mxu0 %vm940_vm0, %v6894_v20  ;;  %v6901_v16 = vld [vmem:[#allocation15_spill] sm:$0xff]  ;;  %v6902_v25 = vld [vmem:[#allocation24_spill] sm:$0xff]  ;;  %v6905_v34 = vld [vmem:[#allocation33_spill] sm:$0xff]  ;;  %p896_p4 = scmp.ge.s32.totalorder %s899_s23, 3  }
  0x80   : >> { %4079 = vmatprep.mubr.msk.f32.mxu1 %vm940_vm0, %v6895_v28  ;;  %1049 = vperm.xlu1 %4402, %v6896_v23   ;;  %v6903_v17 = vld [vmem:[#allocation16_spill] sm:$0xff]  ;;  %v6907_v36 = vld [vmem:[#allocation35_spill] sm:$0xff]  ;;  %v6911_v42 = vld [vmem:[#allocation101_spill] sm:$0xff] }
  0x81   : >> { %1044 = vperm.xlu0 %4401, %v6897_v22   ;;  %4082 = vmatprep.subr.mxu0 %v6878_v5  ;;  %v6906_v37 = vld [vmem:[#allocation36_spill] sm:$0xff]  ;;  %v6909_v44 = vld [vmem:[#allocation99_spill] sm:$0xff]  ;;  %v6912_v39 = vld [vmem:[#allocation102_spill] sm:$0xff] }
  0x82   : >> { %4090 = vmatprep.subr.mxu1 %v6879_v4  ;;  %4072 = vmatmul.mubr.msk.f32.gmra.mxu0 %vm940_vm0, %v6898_v21  ;;  %v6910_v43 = vld [vmem:[#allocation100_spill] sm:$0xff]  ;;  %v6913_v45 = vld [vmem:[#allocation103_spill] sm:$0xff]  ;;  %v6915_v47 = vld [vmem:[#allocation105_spill] sm:$0xff] }
  0x83   : >> { %4080 = vmatmul.mubr.msk.f32.gmra.mxu1 %vm940_vm0, %v6899_v29  ;;  %4083 = vmatpush3.msra.mxu0 %v6878_v5  ;;  %v6914_v46 = vld [vmem:[#allocation104_spill] sm:$0xff]  ;;  %v6916_v48 = vld [vmem:[#allocation106_spill] sm:$0xff]  ;;  %v6917_v49 = vld [vmem:[#allocation107_spill] sm:$0xff] }
  0x84   : >> { %4091 = vmatpush3.msra.mxu1 %v6879_v4  ;;  %1054 = vperm.xlu1 %4402, %v6900_v24   ;;  %v6918_v50 = vld [vmem:[#allocation108_spill] sm:$0xff]  ;;  %v6919_v51 = vld [vmem:[#allocation109_spill] sm:$0xff]  ;;  %v6920_v52 = vld [vmem:[#allocation110_spill] sm:$0xff] }
  0x85   : >> { %924 = vperm.xlu0 %4401, %v6901_v16   ;;  %4112 = vmatprep.subr.mxu1 %v6873_v11  ;;  %v6638_v16 = vsub.s32 0, %v5827_v14  ;;  %v6921_v53 = vld [vmem:[#allocation111_spill] sm:$0xff]  ;;  %v6922_v54 = vld [vmem:[#allocation112_spill] sm:$0xff]  ;;  %v6923_v59 = vld [vmem:[#allocation137_spill] sm:$0xff] }
  0x86   : >> { %v6924_v55 = vld [vmem:[#allocation138_spill] sm:$0xff]  ;;  %v6925_v56 = vld [vmem:[#allocation139_spill] sm:$0xff]  ;;  %v6926_v57 = vld [vmem:[#allocation140_spill] sm:$0xff] }
  0x87   : >> { %v6927_v58 = vld [vmem:[#allocation141_spill] sm:$0xff]  ;;  %v6928_v60 = vld [vmem:[#allocation142_spill] sm:$0xff] }
  0x88   : >> { %1059 = vperm.xlu1 %4402, %v6902_v25  }
  0x89   : >> { %929 = vperm.xlu0 %4401, %v6903_v17   ;;  %v5832_v17 = vrot.slane %v4605_v8, %v6638_v16 }
  0x8c   : >> { %1393 = vperm.xlu1 %4402, %v6904_v35  }
  0x8d   : >> { %1388 = vperm.xlu0 %4401, %v6905_v34  }
  0x90   : >> { %1403 = vperm.xlu1 %4402, %v6906_v37  }
  0x91   : >> { %1398 = vperm.xlu0 %4401, %v6907_v36  }
  0xf6   : >> { %v920_v15 = vpop.permute.xlu1 %919 }
  0xf7   : >> { %v915_v18 = vpop.permute.xlu0 %914  ;;  %v937_v21 = vmul.f32 %v5832_v17, %v920_v15 }
  0xf8   : >> { %v936_v2 = vmul.f32 %v5832_v17, %v915_v18 }
  0xfb   : >> { %v1050_v19 = vpop.permute.xlu1 %1049 }
  0xfc   : >> { %v1045_v20 = vpop.permute.xlu0 %1044  ;;  %v1063_v22 = vmul.f32 %v1050_v19, %v5832_v17 }
  0xfd   : >> { %v1062_v27 = vmul.f32 %v1045_v20, %v5832_v17 }
  0xff   : >> { %v1055_v23 = vpop.permute.xlu1 %1054 }
 0x100   : >> { %v925_v24 = vpop.permute.xlu0 %924  ;;  %v1064_v16 = vmul.f32 %v1055_v23, %v5832_v17 }
 0x101   : >> { %v938_v18 = vmul.f32 %v5832_v17, %v925_v24 }
 0x103   : >> { %v1060_v37 = vpop.permute.xlu1 %1059 }
 0x104   : >> { %v930_v20 = vpop.permute.xlu0 %929 }
 0x13e   : >> { %v4070_v25 = vpop.f32.mrf.mxu0 }
 0x13f   : >> { %v4078_v26 = vpop.f32.mrf.mxu1  ;;  %v1029_v28 = vadd.f32 %v4070_v25, %v937_v21  ;;  %v1065_v21 = vmul.f32 %v1060_v37, %v5832_v17 }
 0x140   : >> { %v1150_v29 = vadd.f32 %v4078_v26, %v1063_v22  ;;  %v1023_v34 = vpop.f32.mrf.mxu0  ;;  %v939_v22 = vmul.f32 %v5832_v17, %v930_v20 }
 0x141   : >> { %v1144_v35 = vpop.f32.mrf.mxu1  ;;  %v1024_v36 = vadd.f32 %v1023_v34, %v936_v2  ;;  %1734 = vrot.lane.b32.xlu1 %v1029_v28, %s4644_s28 }
 0x142   : >> { %v1145_v8 = vadd.f32 %v1144_v35, %v1062_v27  ;;  %1633 = vrot.lane.b32.xlu0 %v1150_v29, %s4644_s28  ;;  %v4073_v15 = vpop.f32.mrf.mxu0 }
 0x143   : >> { %v4081_v19 = vpop.f32.mrf.mxu1  ;;  %4092 = vmatprep.mubr.msk.f32.mxu1 %vm1163_vm2, %v1024_v36  ;;  %v1039_v24 = vadd.f32 %v4073_v15, %v939_v22 }
 0x144   : >> { %4084 = vmatprep.mubr.msk.f32.mxu0 %vm1163_vm2, %v1145_v8  ;;  %v1033_v25 = vpop.f32.mrf.mxu0  ;;  %4093 = vmatmul.mubr.msk.f32.vlgmr.msra.gmra.mxu1 %vm1163_vm2, %v1029_v28  ;;  %v1160_v34 = vadd.f32 %v4081_v19, %v1065_v21 }
 0x145   : >> { %v1154_v26 = vpop.f32.mrf.mxu1  ;;  %4085 = vmatmul.mubr.msk.f32.vlgmr.msra.gmra.mxu0 %vm1163_vm2, %v1150_v29  ;;  %v1034_v27 = vadd.f32 %v1033_v25, %v938_v18  ;;  %1732 = vrot.lane.b32.xlu1 %v1024_v36, %s4644_s28 }
 0x146   : >> { %v1155_v23 = vadd.f32 %v1154_v26, %v1064_v16  ;;  %1631 = vrot.lane.b32.xlu0 %v1145_v8, %s4644_s28  ;;  %4113 = vmatpush3.msra.mxu1 %v6873_v11 }
 0x147   : >> { %4095 = vmatprep.mubr.msk.f32.mxu1 %vm1163_vm2, %v1034_v27  ;;  %4114 = vmatprep.subr.mxu1 %v6876_v7 }
 0x148   : >> { %4087 = vmatprep.mubr.msk.f32.mxu0 %vm1163_vm2, %v1155_v23  ;;  %4096 = vmatmul.mubr.msk.f32.gmra.mxu1 %vm1163_vm2, %v1039_v24 }
 0x149   : >> { %4088 = vmatmul.mubr.msk.f32.gmra.mxu0 %vm1163_vm2, %v1160_v34  ;;  %1736 = vrot.lane.b32.xlu1 %v1034_v27, %s4644_s28 }
 0x14a   : >> { %1635 = vrot.lane.b32.xlu0 %v1155_v23, %s4644_s28  ;;  %4115 = vmatpush3.msra.mxu1 %v6876_v7 }
 0x14b   : >> { %4116 = vmatprep.subr.mxu1 %v6877_v6  ;;  %4106 = vmatprep.mubr.msk.f32.mxu0 %vm1406_vm3, %v6870_v30 }
 0x14c   : >> { %4117 = vmatpush3.msra.mxu1 %v6877_v6 }
 0x14d   : >> { %1738 = vrot.lane.b32.xlu1 %v1039_v24, %s4644_s28  ;;  %4132 = vmatprep.subr.mxu1 %v6879_v4 }
 0x14e   : >> { %1637 = vrot.lane.b32.xlu0 %v1160_v34, %s4644_s28 }
 0x204   : >> { %v4094_v28 = vpop.f32.mrf.mxu1 }
 0x205   : >> { %v4086_v16 = vpop.f32.mrf.mxu0 }
 0x206   : >> { %v1345_v29 = vadd.f32 %v4094_v28, %v4086_v16  ;;  %v1339_v36 = vpop.f32.mrf.mxu1 }
 0x207   : >> { %v1242_v35 = vpop.f32.mrf.mxu0 }
 0x208   : >> { %v1359_v37 = vadd.f32 %v1345_v29, %v6874_v10  ;;  %v1340_v2 = vadd.f32 %v1339_v36, %v1242_v35  ;;  %v4097_v15 = vpop.f32.mrf.mxu1 }
 0x209   : >> { %v4089_v8 = vpop.f32.mrf.mxu0 }
 0x20a   : >> { %v1358_v19 = vadd.f32 %v1340_v2, %v6875_v9  ;;  %v1355_v18 = vadd.f32 %v4097_v15, %v4089_v8  ;;  %v3777_v20 = vmul.f32 -1.442695, %v1359_v37  ;;  %v1349_v22 = vpop.f32.mrf.mxu1  ;;  %v5870_v15 = vpop.permute.xlu0 %1388 }
 0x20b   : >> { %v1252_v21 = vpop.f32.mrf.mxu0 }
 0x20c   : >> { %v1361_v25 = vadd.f32 %v1355_v18, %v6871_v13  ;;  %v1350_v26 = vadd.f32 %v1349_v22, %v1252_v21  ;;  %v3776_v27 = vmul.f32 -1.442695, %v1358_v19  ;;  %4403 = vpow2.f32 %v3777_v20 }
 0x20e   : >> { %v3779_v23 = vmul.f32 -1.442695, %v1361_v25  ;;  %v1360_v24 = vadd.f32 %v1350_v26, %v6872_v12  ;;  %v5872_v19 = vpop.permute.xlu0 %1398 }
 0x210   : >> { %4405 = vpow2.f32 %v3779_v23  ;;  %v3778_v34 = vmul.f32 -1.442695, %v1360_v24  ;;  %v5888_v24 = vpop.permute.xlu1 %1393 }
 0x211   : >> { %4407 = vpow2.f32 %v3776_v27 }
 0x212   : >> { %4409 = vpow2.f32 %v3778_v34  ;;  %v1634_v21 = vpop.permute.xlu0 %1633 }
 0x216   : >> { %v1632_v26 = vpop.permute.xlu0 %1631 }
 0x219   : >> { %v4404_v16 = vpop.eup %4403 }
 0x21a   : >> { %v1375_v37 = vadd.f32 1.0, %v4404_v16  ;;  %v1636_v27 = vpop.permute.xlu0 %1635 }
 0x21d   : >> { %v4406_v28 = vpop.eup %4405 }
 0x21e   : >> { %v4408_v29 = vpop.eup %4407  ;;  %v1377_v35 = vadd.f32 1.0, %v4406_v28  ;;  %v1638_v23 = vpop.permute.xlu0 %1637 }
 0x21f   : >> { %v4410_v36 = vpop.eup %4409  ;;  %v1374_v8 = vadd.f32 1.0, %v4408_v29 }
 0x220   : >> { %4411 = vrcp.f32 %v1377_v35  ;;  %v1376_v2 = vadd.f32 1.0, %v4410_v36  ;;  %v5892_v36 = vpop.permute.xlu1 %1403 }
 0x222   : >> { %4413 = vrcp.f32 %v1376_v2 }
 0x223   : >> { %4415 = vrcp.f32 %v1375_v37 }
 0x224   : >> { %4417 = vrcp.f32 %v1374_v8 }
 0x22d   : >> { %v4412_v18 = vpop.eup %4411 }
 0x22e   : >> { %4098 = vmatprep.subr.mxu0 %v4412_v18 }
 0x22f   : >> { %v4414_v20 = vpop.eup %4413  ;;  %4099 = vmatpush3.msra.mxu0 %v4412_v18 }
 0x230   : >> { %4100 = vmatprep.subr.mxu0 %v4414_v20  ;;  %v4416_v22 = vpop.eup %4415 }
 0x231   : >> { %4101 = vmatpush3.msra.mxu0 %v4414_v20  ;;  %v4418_v25 = vpop.eup %4417 }
 0x232   : >> { %4102 = vmatprep.subr.mxu0 %v4416_v22 }
 0x233   : >> { %4103 = vmatpush3.msra.mxu0 %v4416_v22 }
 0x234   : >> { %4104 = vmatprep.subr.mxu0 %v4418_v25 }
 0x235   : >> { %4105 = vmatpush3.msra.mxu0 %v4418_v25 }
 0x236   : >> { %4107 = vmatmul.mubr.msk.f32.vlgmr.msra.gmra.mxu0 %vm1406_vm3, %v6869_v31  ;;  %4124 = vmatprep.subr.mxu0 %v6878_v5 }
 0x237   : >> { %4109 = vmatprep.mubr.msk.f32.mxu0 %vm1406_vm3, %v6868_v32  ;;  %4125 = vmatpush3.msra.mxu0 %v6878_v5 }
 0x23a   : >> { %4110 = vmatmul.mubr.msk.f32.gmra.mxu0 %vm1406_vm3, %v6867_v33 }
 0x23b   : >> { %4126 = vmatprep.mubr.msk.f32.mxu0 %vm1163_vm2, %v1632_v26 }
 0x23e   : >> { %4127 = vmatmul.mubr.msk.f32.vlgmr.msra.gmra.mxu0 %vm1163_vm2, %v1634_v21 }
 0x23f   : >> { %4129 = vmatprep.mubr.msk.f32.mxu0 %vm1163_vm2, %v1636_v27 }
 0x242   : >> { %4130 = vmatmul.mubr.msk.f32.gmra.mxu0 %vm1163_vm2, %v1638_v23 }
 0x243   : >> { %4148 = vmatprep.mubr.msk.f32.mxu0 %vm1406_vm3, %v6870_v30 }
 0x2f6   : >> { %v4108_v34 = vpop.f32.mrf.mxu0 }
 0x2f7   : >> { %v1491_v16 = vadd.f32 %v4108_v34, %v5888_v24 }
 0x2f8   : >> { %v1485_v28 = vpop.f32.mrf.mxu0 }
 0x2f9   : >> { %v3785_v29 = vmul.f32 -1.442695, %v1491_v16  ;;  %v1486_v35 = vadd.f32 %v1485_v28, %v5870_v15 }
 0x2fa   : >> { %v4111_v37 = vpop.f32.mrf.mxu0 }
 0x2fb   : >> { %4419 = vpow2.f32 %v3785_v29  ;;  %v3784_v2 = vmul.f32 -1.442695, %v1486_v35  ;;  %v1501_v8 = vadd.f32 %v4111_v37, %v5892_v36  ;;  %v1735_v35 = vpop.permute.xlu1 %1734 }
 0x2fc   : >> { %v1495_v18 = vpop.f32.mrf.mxu0 }
 0x2fd   : >> { %4421 = vpow2.f32 %v3784_v2  ;;  %v3787_v20 = vmul.f32 -1.442695, %v1501_v8  ;;  %v1496_v21 = vadd.f32 %v1495_v18, %v5872_v19 }
 0x2ff   : >> { %4423 = vpow2.f32 %v3787_v20  ;;  %v3786_v22 = vmul.f32 -1.442695, %v1496_v21  ;;  %v1733_v8 = vpop.permute.xlu1 %1732 }
 0x301   : >> { %4425 = vpow2.f32 %v3786_v22 }
 0x303   : >> { %v1737_v21 = vpop.permute.xlu1 %1736 }
 0x307   : >> { %v1739_v22 = vpop.permute.xlu1 %1738 }
 0x308   : >> { %v4420_v25 = vpop.eup %4419 }
 0x309   : >> { %v1517_v27 = vadd.f32 1.0, %v4420_v25 }
 0x30a   : >> { %v4422_v26 = vpop.eup %4421 }
 0x30b   : >> { %v1516_v23 = vadd.f32 1.0, %v4422_v26  ;;  %v4128_v26 = vpop.f32.mrf.mxu0 }
 0x30c   : >> { %v4424_v34 = vpop.eup %4423 }
 0x30d   : >> { %4427 = vrcp.f32 %v1516_v23  ;;  %v1519_v28 = vadd.f32 1.0, %v4424_v34  ;;  %v1713_v34 = vpop.f32.mrf.mxu0 }
 0x30e   : >> { %v4426_v16 = vpop.eup %4425  ;;  %4429 = vrcp.f32 %v1517_v27 }
 0x30f   : >> { %v1518_v29 = vadd.f32 1.0, %v4426_v16 }
 0x311   : >> { %4431 = vrcp.f32 %v1518_v29 }
 0x312   : >> { %4433 = vrcp.f32 %v1519_v28 }
 0x31a   : >> { %v4428_v37 = vpop.eup %4427 }
 0x31b   : >> { %v4430_v2 = vpop.eup %4429  ;;  %4118 = vmatprep.mubr.msk.f32.mxu1 %vm1528_vm4, %v4428_v37 }
 0x31c   : >> { %4119 = vmatmul.mubr.msk.f32.vlgmr.msra.gmra.mxu1 %vm1528_vm4, %v4430_v2 }
 0x31d   : >> { %4133 = vmatpush3.msra.mxu1 %v6879_v4 }
 0x31e   : >> { %v4432_v18 = vpop.eup %4431  ;;  %4154 = vmatprep.subr.mxu1 %v6873_v11 }
 0x31f   : >> { %v4434_v20 = vpop.eup %4433  ;;  %4121 = vmatprep.mubr.msk.f32.mxu1 %vm1528_vm4, %v4432_v18 }
 0x320   : >> { %4122 = vmatmul.mubr.msk.f32.gmra.mxu1 %vm1528_vm4, %v4434_v20 }
 0x321   : >> { %4134 = vmatprep.mubr.msk.f32.mxu1 %vm1163_vm2, %v1733_v8 }
 0x324   : >> { %4135 = vmatmul.mubr.msk.f32.vlgmr.msra.gmra.mxu1 %vm1163_vm2, %v1735_v35  ;;  %v4131_v35 = vpop.f32.mrf.mxu0 }
 0x325   : >> { %4137 = vmatprep.mubr.msk.f32.mxu1 %vm1163_vm2, %v1737_v21  ;;  %4155 = vmatpush3.msra.mxu1 %v6873_v11 }
 0x326   : >> { %4156 = vmatprep.subr.mxu1 %v6876_v7 }
 0x327   : >> { %4157 = vmatpush3.msra.mxu1 %v6876_v7 }
 0x328   : >> { %4138 = vmatmul.mubr.msk.f32.gmra.mxu1 %vm1163_vm2, %v1739_v22  ;;  %4158 = vmatprep.subr.mxu1 %v6877_v6  ;;  %v1723_v22 = vpop.f32.mrf.mxu0 }
 0x329   : >> { %4159 = vmatpush3.msra.mxu1 %v6877_v6 }
 0x32a   : >> { %4307 = vmatprep.subr.msk.mxu1 %vm953_vm1, %v5790_v61 }
 0x3dc   : >> { %v4120_v25 = vpop.f32.mrf.mxu1 }
 0x3dd   : >> { %1627 = vst.msk [vmem:[#allocation2 + $0x8] sm:$0xff] %vm1163_vm2, %v4120_v25 }
 0x3de   : >> { %v1607_v27 = vpop.f32.mrf.mxu1 }
 0x3df   : >> { %1626 = vst.msk [vmem:[#allocation2] sm:$0xff] %vm1163_vm2, %v1607_v27 }
 0x3e0   : >> { %v4123_v23 = vpop.f32.mrf.mxu1 }
 0x3e1   : >> { %1630 = vst.msk [vmem:[#allocation2 + $0x18] sm:$0x3f] %vm1629_vm5, %v4123_v23 }
 0x3e2   : >> { %v1617_v16 = vpop.f32.mrf.mxu1 }
 0x3e3   : >> { %1628 = vst.msk [vmem:[#allocation2 + $0x10] sm:$0xff] %vm1163_vm2, %v1617_v16 }
 0x3e4   : >> { %v4136_v28 = vpop.f32.mrf.mxu1 }
 0x3e5   : >> { %v1820_v29 = vadd.f32 %v4136_v28, %v4128_v26 }
 0x3e6   : >> { %v1814_v37 = vpop.f32.mrf.mxu1 }
 0x3e7   : >> { %v1834_v2 = vadd.f32 %v1820_v29, %v6874_v10  ;;  %v1815_v8 = vadd.f32 %v1814_v37, %v1713_v34 }
 0x3e8   : >> { %v4139_v18 = vpop.f32.mrf.mxu1 }
 0x3e9   : >> { %v1833_v20 = vadd.f32 %v1815_v8, %v6875_v9  ;;  %v1830_v21 = vadd.f32 %v4139_v18, %v4131_v35  ;;  %v3801_v25 = vmul.f32 -1.442695, %v1834_v2 }
 0x3ea   : >> { %v1824_v27 = vpop.f32.mrf.mxu1 }
 0x3eb   : >> { %v1836_v23 = vadd.f32 %v1830_v21, %v6871_v13  ;;  %v1825_v4 = vadd.f32 %v1824_v27, %v1723_v22  ;;  %v3800_v5 = vmul.f32 -1.442695, %v1833_v20  ;;  %4435 = vpow2.f32 %v3801_v25 }
 0x3ed   : >> { %v3803_v6 = vmul.f32 -1.442695, %v1836_v23  ;;  %v1835_v16 = vadd.f32 %v1825_v4, %v6872_v12 }
 0x3ef   : >> { %4437 = vpow2.f32 %v3803_v6  ;;  %v3802_v26 = vmul.f32 -1.442695, %v1835_v16 }
 0x3f0   : >> { %4439 = vpow2.f32 %v3800_v5 }
 0x3f1   : >> { %4441 = vpow2.f32 %v3802_v26 }
 0x3f8   : >> { %v4436_v34 = vpop.eup %4435 }
 0x3f9   : >> { %v1850_v8 = vadd.f32 1.0, %v4436_v34 }
 0x3fc   : >> { %v4438_v28 = vpop.eup %4437 }
 0x3fd   : >> { %v4440_v29 = vpop.eup %4439  ;;  %v1852_v37 = vadd.f32 1.0, %v4438_v28 }
 0x3fe   : >> { %v4442_v35 = vpop.eup %4441  ;;  %v1849_v18 = vadd.f32 1.0, %v4440_v29 }
 0x3ff   : >> { %4443 = vrcp.f32 %v1852_v37  ;;  %v1851_v2 = vadd.f32 1.0, %v4442_v35 }
 0x401   : >> { %4445 = vrcp.f32 %v1851_v2 }
 0x402   : >> { %4447 = vrcp.f32 %v1850_v8 }
 0x403   : >> { %4449 = vrcp.f32 %v1849_v18 }
 0x40c   : >> { %v4444_v20 = vpop.eup %4443 }
 0x40d   : >> { %4140 = vmatprep.subr.mxu0 %v4444_v20 }
 0x40e   : >> { %v4446_v4 = vpop.eup %4445  ;;  %4141 = vmatpush3.msra.mxu0 %v4444_v20 }
 0x40f   : >> { %4142 = vmatprep.subr.mxu0 %v4446_v4  ;;  %v4448_v6 = vpop.eup %4447 }
 0x410   : >> { %4143 = vmatpush3.msra.mxu0 %v4446_v4  ;;  %v4450_v5 = vpop.eup %4449 }
 0x411   : >> { %4144 = vmatprep.subr.mxu0 %v4448_v6 }
 0x412   : >> { %4145 = vmatpush3.msra.mxu0 %v4448_v6 }
 0x413   : >> { %4146 = vmatprep.subr.mxu0 %v4450_v5 }
 0x414   : >> { %4147 = vmatpush3.msra.mxu0 %v4450_v5 }
 0x415   : >> { %4149 = vmatmul.mubr.msk.f32.vlgmr.msra.gmra.mxu0 %vm1406_vm3, %v6869_v31 }
 0x416   : >> { %4151 = vmatprep.mubr.msk.f32.mxu0 %vm1406_vm3, %v6868_v32 }
 0x419   : >> { %4152 = vmatmul.mubr.msk.f32.gmra.mxu0 %vm1406_vm3, %v6867_v33 }
 0x4d5   : >> { %v4150_v21 = vpop.f32.mrf.mxu0 }
 0x4d6   : >> { %v1933_v22 = vadd.f32 %v4150_v21, %v5888_v24 }
 0x4d7   : >> { %v1927_v25 = vpop.f32.mrf.mxu0 }
 0x4d8   : >> { %v3809_v27 = vmul.f32 -1.442695, %v1933_v22  ;;  %v1928_v23 = vadd.f32 %v1927_v25, %v5870_v15  ;;  %v6929_v22 = vld [vmem:[#allocation143_spill] sm:$0xff]  ;;  %v6930_v25 = vld [vmem:[#allocation144_spill] sm:$0xff] }
 0x4d9   : >> { %v4153_v16 = vpop.f32.mrf.mxu0 }
 0x4da   : >> { %4451 = vpow2.f32 %v3809_v27  ;;  %v3808_v26 = vmul.f32 -1.442695, %v1928_v23  ;;  %v1943_v34 = vadd.f32 %v4153_v16, %v5892_v36  ;;  %v6931_v27 = vld [vmem:[#allocation145_spill] sm:$0xff]  ;;  %v6932_v23 = vld [vmem:[#allocation146_spill] sm:$0xff]  ;;  %v6933_v16 = vld [vmem:[#allocation147_spill] sm:$0xff] }
 0x4db   : >> { %v1937_v28 = vpop.f32.mrf.mxu0 }
 0x4dc   : >> { %4453 = vpow2.f32 %v3808_v26  ;;  %v3811_v29 = vmul.f32 -1.442695, %v1943_v34  ;;  %v1938_v37 = vadd.f32 %v1937_v28, %v5872_v19  ;;  %v6934_v26 = vld [vmem:[#allocation148_spill] sm:$0xff]  ;;  %v6935_v34 = vld [vmem:[#allocation149_spill] sm:$0xff]  ;;  %v6936_v28 = vld [vmem:[#allocation150_spill] sm:$0xff] }
 0x4de   : >> { %4455 = vpow2.f32 %v3811_v29  ;;  %v3810_v35 = vmul.f32 -1.442695, %v1938_v37  ;;  %v6937_v29 = vld [vmem:[#allocation151_spill] sm:$0xff]  ;;  %v6938_v37 = vld [vmem:[#allocation152_spill] sm:$0xff] }
 0x4e0   : >> { %4457 = vpow2.f32 %v3810_v35  ;;  %v6939_v35 = vld [vmem:[#allocation153_spill] sm:$0xff] }
 0x4e7   : >> { %v4452_v8 = vpop.eup %4451 }
 0x4e8   : >> { %v1959_v24 = vadd.f32 1.0, %v4452_v8  ;;  %v6940_v8 = vld [vmem:[#allocation154_spill] sm:$0xff] }
 0x4e9   : >> { %v4454_v2 = vpop.eup %4453 }
 0x4ea   : >> { %v1958_v18 = vadd.f32 1.0, %v4454_v2  ;;  %v6941_v2 = vld [vmem:[#allocation155_spill] sm:$0xff] }
 0x4eb   : >> { %v4456_v20 = vpop.eup %4455 }
 0x4ec   : >> { %4459 = vrcp.f32 %v1958_v18  ;;  %v1961_v4 = vadd.f32 1.0, %v4456_v20  ;;  %v6943_v18 = vld [vmem:[#allocation157_spill] sm:$0xff]  ;;  %v6944_v20 = vld [vmem:[#allocation158_spill] sm:$0xff] }
 0x4ed   : >> { %v4458_v15 = vpop.eup %4457  ;;  %4461 = vrcp.f32 %v1959_v24  ;;  %v6942_v24 = vld [vmem:[#allocation156_spill] sm:$0xff] }
 0x4ee   : >> { %v1960_v6 = vadd.f32 1.0, %v4458_v15  ;;  %v6945_v15 = vld [vmem:[#allocation159_spill] sm:$0xff] }
 0x4f0   : >> { %4463 = vrcp.f32 %v1960_v6 }
 0x4f1   : >> { %4465 = vrcp.f32 %v1961_v4  ;;  %v6946_v4 = vld [vmem:[#allocation160_spill] sm:$0xff] }
 0x4f9   : >> { %v4460_v36 = vpop.eup %4459 }
 0x4fa   : >> { %v4462_v5 = vpop.eup %4461  ;;  %4160 = vmatprep.mubr.msk.f32.mxu1 %vm1528_vm4, %v4460_v36 }
 0x4fb   : >> { %4161 = vmatmul.mubr.msk.f32.vlgmr.msra.gmra.mxu1 %vm1528_vm4, %v4462_v5 }
 0x4fc   : >> { %4308 = vmatpush3.msk.msra.mxu1 %vm953_vm1, %v5790_v61 }
 0x4fd   : >> { %v4464_v19 = vpop.eup %4463  ;;  %4255 = vmatprep.subr.mxu1 %v4609_v40 }
 0x4fe   : >> { %v4466_v21 = vpop.eup %4465  ;;  %4163 = vmatprep.mubr.msk.f32.mxu1 %vm1528_vm4, %v4464_v19 }
 0x4ff   : >> { %4164 = vmatmul.mubr.msk.f32.gmra.mxu1 %vm1528_vm4, %v4466_v21  ;;  %v6947_v21 = vld [vmem:[#allocation37_spill] sm:$0xff] }
 0x500   : >> { %4194 = vmatprep.mubr.msk.f32.mxu1 %vm940_vm0, %v6909_v44  ;;  %4174 = vmatprep.mubr.msk.f32.mxu0 %vm2103_vm7, %v6947_v21  ;;  %v6970_v21 = vld [vmem:[#allocation85_spill] sm:$0xff] }
 0x503   : >> { %4195 = vmatmul.mubr.msk.f32.vlgmr.msra.gmra.mxu1 %vm940_vm0, %v6910_v43 }
 0x504   : >> { %4197 = vmatprep.mubr.msk.f32.mxu1 %vm940_vm0, %v6911_v42  ;;  %4256 = vmatpush3.msra.mxu1 %v4609_v40 }
 0x505   : >> { %4257 = vmatprep.subr.mxu1 %v4613_v0 }
 0x506   : >> { %4258 = vmatpush3.msra.mxu1 %v4613_v0 }
 0x507   : >> { %4198 = vmatmul.mubr.msk.f32.gmra.mxu1 %vm940_vm0, %v6912_v39  ;;  %4259 = vmatprep.subr.mxu1 %v4617_v41 }
 0x508   : >> { %4200 = vmatprep.mubr.msk.f32.mxu1 %vm940_vm0, %v6913_v45  ;;  %4260 = vmatpush3.msra.mxu1 %v4617_v41 }
 0x509   : >> { %4261 = vmatprep.subr.mxu1 %v4621_v1 }
 0x50a   : >> { %4262 = vmatpush3.msra.mxu1 %v4621_v1 }
 0x50b   : >> { %4201 = vmatmul.mubr.msk.f32.gmra.mxu1 %vm940_vm0, %v6914_v46  ;;  %4263 = vmatprep.subr.mxu1 %v4625_v63 }
 0x50c   : >> { %4203 = vmatprep.mubr.msk.f32.mxu1 %vm940_vm0, %v6915_v47  ;;  %4264 = vmatpush3.msra.mxu1 %v4625_v63 }
 0x50d   : >> { %4265 = vmatprep.subr.mxu1 %v4629_v38 }
 0x50e   : >> { %4266 = vmatpush3.msra.mxu1 %v4629_v38 }
 0x50f   : >> { %4204 = vmatmul.mubr.msk.f32.gmra.mxu1 %vm940_vm0, %v6916_v48  ;;  %4267 = vmatprep.subr.mxu1 %v4633_v62 }
 0x510   : >> { %4206 = vmatprep.mubr.msk.f32.mxu1 %vm940_vm0, %v6917_v49  ;;  %4268 = vmatpush3.msra.mxu1 %v4633_v62 }
 0x511   : >> { %4269 = vmatprep.subr.mxu1 %v4637_v3 }
 0x512   : >> { %4270 = vmatpush3.msra.mxu1 %v4637_v3 }
 0x513   : >> { %4207 = vmatmul.mubr.msk.f32.gmra.mxu1 %vm940_vm0, %v6918_v50 }
 0x514   : >> { %4209 = vmatprep.mubr.msk.f32.mxu1 %vm940_vm0, %v6919_v51 }
 0x517   : >> { %4210 = vmatmul.mubr.msk.f32.gmra.mxu1 %vm940_vm0, %v6920_v52 }
 0x518   : >> { %4212 = vmatprep.mubr.msk.f32.mxu1 %vm940_vm0, %v6921_v53 }
 0x51b   : >> { %4213 = vmatmul.mubr.msk.f32.gmra.mxu1 %vm940_vm0, %v6922_v54 }
 0x51c   : >> { %4271 = vmatprep.mubr.msk.f32.mxu1 %vm3152_vm6, %v6923_v59 }
 0x51f   : >> { %4272 = vmatmul.mubr.msk.f32.vlgmr.msra.gmra.mxu1 %vm3152_vm6, %v6924_v55 }
 0x520   : >> { %4274 = vmatprep.mubr.msk.f32.mxu1 %vm3152_vm6, %v6925_v56 }
 0x523   : >> { %4275 = vmatmul.mubr.msk.f32.gmra.mxu1 %vm3152_vm6, %v6926_v57 }
 0x524   : >> { %4277 = vmatprep.mubr.msk.f32.mxu1 %vm3152_vm6, %v6927_v58 }
 0x527   : >> { %4278 = vmatmul.mubr.msk.f32.gmra.mxu1 %vm3152_vm6, %v6928_v60 }
 0x528   : >> { %4280 = vmatprep.mubr.msk.f32.mxu1 %vm3152_vm6, %v6929_v22  ;;  %v6948_v22 = vld [vmem:[#allocation40_spill] sm:$0xff] }
 0x52b   : >> { %4281 = vmatmul.mubr.msk.f32.gmra.mxu1 %vm3152_vm6, %v6930_v25  ;;  %v6949_v25 = vld [vmem:[#allocation39_spill] sm:$0xff] }
 0x52c   : >> { %4283 = vmatprep.mubr.msk.f32.mxu1 %vm3152_vm6, %v6931_v27  ;;  %v6950_v27 = vld [vmem:[#allocation65_spill] sm:$0xff] }
 0x52f   : >> { %4284 = vmatmul.mubr.msk.f32.gmra.mxu1 %vm3152_vm6, %v6932_v23  ;;  %v6951_v23 = vld [vmem:[#allocation66_spill] sm:$0xff] }
 0x530   : >> { %4286 = vmatprep.mubr.msk.f32.mxu1 %vm3152_vm6, %v6933_v16  ;;  %v6952_v16 = vld [vmem:[#allocation67_spill] sm:$0xff] }
 0x533   : >> { %4287 = vmatmul.mubr.msk.f32.gmra.mxu1 %vm3152_vm6, %v6934_v26  ;;  %v6953_v26 = vld [vmem:[#allocation68_spill] sm:$0xff] }
 0x534   : >> { %4289 = vmatprep.mubr.msk.f32.mxu1 %vm3152_vm6, %v6935_v34  ;;  %v6954_v34 = vld [vmem:[#allocation69_spill] sm:$0xff] }
 0x537   : >> { %4290 = vmatmul.mubr.msk.f32.gmra.mxu1 %vm3152_vm6, %v6936_v28  ;;  %v6955_v28 = vld [vmem:[#allocation70_spill] sm:$0xff] }
 0x538   : >> { %4292 = vmatprep.mubr.msk.f32.mxu1 %vm3152_vm6, %v6937_v29  ;;  %v6956_v29 = vld [vmem:[#allocation71_spill] sm:$0xff] }
 0x53b   : >> { %4293 = vmatmul.mubr.msk.f32.gmra.mxu1 %vm3152_vm6, %v6938_v37  ;;  %v6957_v37 = vld [vmem:[#allocation72_spill] sm:$0xff] }
 0x53c   : >> { %4295 = vmatprep.mubr.msk.f32.mxu1 %vm3152_vm6, %v6939_v35  ;;  %v6958_v35 = vld [vmem:[#allocation73_spill] sm:$0xff] }
 0x53f   : >> { %4296 = vmatmul.mubr.msk.f32.gmra.mxu1 %vm3152_vm6, %v6940_v8  ;;  %v6959_v8 = vld [vmem:[#allocation74_spill] sm:$0xff] }
 0x540   : >> { %4298 = vmatprep.mubr.msk.f32.mxu1 %vm3152_vm6, %v6941_v2  ;;  %v6960_v2 = vld [vmem:[#allocation75_spill] sm:$0xff] }
 0x543   : >> { %4299 = vmatmul.mubr.msk.f32.gmra.mxu1 %vm3152_vm6, %v6942_v24  ;;  %v6961_v24 = vld [vmem:[#allocation76_spill] sm:$0xff] }
 0x544   : >> { %4301 = vmatprep.mubr.msk.f32.mxu1 %vm3152_vm6, %v6943_v18  ;;  %v6962_v18 = vld [vmem:[#allocation77_spill] sm:$0xff] }
 0x547   : >> { %4302 = vmatmul.mubr.msk.f32.gmra.mxu1 %vm3152_vm6, %v6944_v20  ;;  %v6963_v20 = vld [vmem:[#allocation78_spill] sm:$0xff] }
 0x548   : >> { %4304 = vmatprep.mubr.msk.f32.mxu1 %vm3152_vm6, %v6945_v15  ;;  %v6964_v15 = vld [vmem:[#allocation79_spill] sm:$0xff] }
 0x54b   : >> { %4305 = vmatmul.mubr.msk.f32.gmra.mxu1 %vm3152_vm6, %v6946_v4  ;;  %v6965_v4 = vld [vmem:[#allocation80_spill] sm:$0xff] }
 0x5bb   : >> { %v4162_v6 = vpop.f32.mrf.mxu1 }
 0x5bd   : >> { %v2048_v36 = vpop.f32.mrf.mxu1 }
 0x5bf   : >> { %v4165_v5 = vpop.f32.mrf.mxu1 }
 0x5c0   : >> { %2077 = vrot.lane.b32.xlu0 %v4165_v5, %s4645_s26  ;;  %v6968_v5 = vld [vmem:[#allocation83_spill] sm:$0xff] }
 0x5c1   : >> { %v2058_v19 = vpop.f32.mrf.mxu1 }
 0x5c2   : >> { %2075 = vrot.lane.b32.xlu1 %v2058_v19, %s4645_s26  ;;  %v6969_v19 = vld [vmem:[#allocation84_spill] sm:$0xff] }
 0x5c4   : >> { %2073 = vrot.lane.b32.xlu0 %v4162_v6, %s4645_s26  ;;  %v6966_v6 = vld [vmem:[#allocation81_spill] sm:$0xff] }
 0x5c6   : >> { %2071 = vrot.lane.b32.xlu1 %v2048_v36, %s4645_s26  ;;  %v6967_v36 = vld [vmem:[#allocation82_spill] sm:$0xff] }
 0x5c8   : >> { %2100 = vperm.xlu0 %4401, %v6948_v22   ;;  %v6971_v22 = vld [vmem:[#allocation86_spill] sm:$0xff] }
 0x5ca   : >> { %2095 = vperm.xlu1 %4402, %v6949_v25   ;;  %v6972_v25 = vld [vmem:[#allocation87_spill] sm:$0xff] }
 0x5cc   : >> { %2722 = vperm.xlu0 %4401, %v6950_v27   ;;  %v6973_v27 = vld [vmem:[#allocation88_spill] sm:$0xff] }
 0x5ce   : >> { %2727 = vperm.xlu1 %4402, %v6951_v23   ;;  %v6974_v23 = vld [vmem:[#allocation113_spill] sm:$0xff] }
 0x5d0   : >> { %2732 = vperm.xlu0 %4401, %v6952_v16   ;;  %v6975_v16 = vld [vmem:[#allocation114_spill] sm:$0xff] }
 0x5d2   : >> { %2737 = vperm.xlu1 %4402, %v6953_v26   ;;  %v6976_v26 = vld [vmem:[#allocation115_spill] sm:$0xff] }
 0x5d4   : >> { %2742 = vperm.xlu0 %4401, %v6954_v34   ;;  %v6977_v34 = vld [vmem:[#allocation116_spill] sm:$0xff] }
 0x5d6   : >> { %2747 = vperm.xlu1 %4402, %v6955_v28   ;;  %v6978_v28 = vld [vmem:[#allocation117_spill] sm:$0xff] }
 0x5d8   : >> { %2752 = vperm.xlu0 %4401, %v6956_v29   ;;  %v6979_v29 = vld [vmem:[#allocation118_spill] sm:$0xff] }
 0x5da   : >> { %2757 = vperm.xlu1 %4402, %v6957_v37   ;;  %v6980_v37 = vld [vmem:[#allocation119_spill] sm:$0xff] }
 0x5dc   : >> { %2762 = vperm.xlu0 %4401, %v6958_v35   ;;  %v6981_v35 = vld [vmem:[#allocation120_spill] sm:$0xff] }
 0x5de   : >> { %2767 = vperm.xlu1 %4402, %v6959_v8   ;;  %v6982_v8 = vld [vmem:[#allocation121_spill] sm:$0xff] }
 0x5e0   : >> { %2772 = vperm.xlu0 %4401, %v6960_v2   ;;  %v6983_v2 = vld [vmem:[#allocation122_spill] sm:$0xff] }
 0x5e2   : >> { %2777 = vperm.xlu1 %4402, %v6961_v24   ;;  %v6984_v24 = vld [vmem:[#allocation123_spill] sm:$0xff] }
 0x5e4   : >> { %2782 = vperm.xlu0 %4401, %v6962_v18   ;;  %v6985_v18 = vld [vmem:[#allocation124_spill] sm:$0xff] }
 0x5e6   : >> { %2787 = vperm.xlu1 %4402, %v6963_v20   ;;  %v6986_v20 = vld [vmem:[#allocation125_spill] sm:$0xff] }
 0x5e8   : >> { %2792 = vperm.xlu0 %4401, %v6964_v15   ;;  %v6987_v15 = vld [vmem:[#allocation126_spill] sm:$0xff] }
 0x5ea   : >> { %2797 = vperm.xlu1 %4402, %v6965_v4   ;;  %v6988_v4 = vld [vmem:[#allocation127_spill] sm:$0xff] }
 0x5ec   : >> { %2802 = vperm.xlu0 %4401, %v6966_v6   ;;  %v6989_v6 = vld [vmem:[#allocation128_spill] sm:$0xff] }
 0x5ee   : >> { %2807 = vperm.xlu1 %4402, %v6967_v36   ;;  %v6990_v36 = vld [vmem:[#allocation129_spill] sm:$0xff] }
 0x5f0   : >> { %2812 = vperm.xlu0 %4401, %v6968_v5   ;;  %v6991_v5 = vld [vmem:[#allocation130_spill] sm:$0xff] }
 0x5f2   : >> { %2817 = vperm.xlu1 %4402, %v6969_v19   ;;  %v6992_v19 = vld [vmem:[#allocation131_spill] sm:$0xff] }
 0x5f4   : >> { %2822 = vperm.xlu0 %4401, %v6970_v21   ;;  %v6993_v21 = vld [vmem:[#allocation161_spill] sm:$0xff] }
 0x5f6   : >> { %2827 = vperm.xlu1 %4402, %v6971_v22   ;;  %v6994_v22 = vld [vmem:[#allocation162_spill] sm:$0xff] }
 0x5f8   : >> { %2832 = vperm.xlu0 %4401, %v6972_v25   ;;  %v6995_v25 = vld [vmem:[#allocation163_spill] sm:$0xff] }
 0x5fa   : >> { %2837 = vperm.xlu1 %4402, %v6973_v27   ;;  %v6996_v27 = vld [vmem:[#allocation164_spill] sm:$0xff] }
 0x5fc   : >> { %2890 = vperm.xlu0 %4401, %v6974_v23   ;;  %v6997_v23 = vld [vmem:[#allocation165_spill] sm:$0xff] }
 0x5fe   : >> { %2895 = vperm.xlu1 %4402, %v6975_v16   ;;  %v6998_v16 = vld [vmem:[#allocation166_spill] sm:$0xff] }
 0x600   : >> { %2900 = vperm.xlu0 %4401, %v6976_v26   ;;  %v6999_v26 = vld [vmem:[#allocation167_spill] sm:$0xff] }
 0x602   : >> { %2905 = vperm.xlu1 %4402, %v6977_v34   ;;  %v7000_v34 = vld [vmem:[#allocation168_spill] sm:$0xff] }
 0x604   : >> { %2910 = vperm.xlu0 %4401, %v6978_v28  }
 0x606   : >> { %2915 = vperm.xlu1 %4402, %v6979_v29   ;;  %v7001_v29 = vld [vmem:[#allocation169_spill] sm:$0xff] }
 0x608   : >> { %2920 = vperm.xlu0 %4401, %v6980_v37   ;;  %v7002_v37 = vld [vmem:[#allocation170_spill] sm:$0xff] }
 0x60a   : >> { %2925 = vperm.xlu1 %4402, %v6981_v35  }
 0x60c   : >> { %2930 = vperm.xlu0 %4401, %v6982_v8  }
 0x60e   : >> { %2935 = vperm.xlu1 %4402, %v6983_v2   ;;  %v7003_v2 = vld [vmem:[#allocation171_spill] sm:$0xff] }
 0x610   : >> { %2940 = vperm.xlu0 %4401, %v6984_v24   ;;  %v7004_v24 = vld [vmem:[#allocation172_spill] sm:$0xff] }
 0x612   : >> { %2945 = vperm.xlu1 %4402, %v6985_v18  }
 0x614   : >> { %2950 = vperm.xlu0 %4401, %v6986_v20   ;;  %v7005_v20 = vld [vmem:[#allocation173_spill] sm:$0xff] }
 0x616   : >> { %2955 = vperm.xlu1 %4402, %v6987_v15  }
 0x618   : >> { %2960 = vperm.xlu0 %4401, %v6988_v4   ;;  %v7006_v4 = vld [vmem:[#allocation174_spill] sm:$0xff] }
 0x61a   : >> { %2965 = vperm.xlu1 %4402, %v6989_v6  }
 0x61c   : >> { %2970 = vperm.xlu0 %4401, %v6990_v36   ;;  %v7007_v36 = vld [vmem:[#allocation175_spill] sm:$0xff] }
 0x61e   : >> { %2975 = vperm.xlu1 %4402, %v6991_v5  }
 0x620   : >> { %2980 = vperm.xlu0 %4401, %v6992_v19   ;;  %v7008_v19 = vld [vmem:[#allocation176_spill] sm:$0xff] }
 0x622   : >> { %3034 = vperm.xlu1 %4402, %v6993_v21  }
 0x624   : >> { %3039 = vperm.xlu0 %4401, %v6994_v22   ;;  %v7009_v22 = vld [vmem:[#allocation177_spill] sm:$0xff] }
 0x626   : >> { %3044 = vperm.xlu1 %4402, %v6995_v25   ;;  %v7010_v25 = vld [vmem:[#allocation38_spill] sm:$0xff] }
 0x628   : >> { %3049 = vperm.xlu0 %4401, %v6996_v27   ;;  %v7011_v27 = vld [vmem:[#allocation178_spill] sm:$0xff] }
 0x62a   : >> { %3054 = vperm.xlu1 %4402, %v6997_v23   ;;  %v7012_v23 = vld [vmem:[#allocation89_spill] sm:$0xff] }
 0x62c   : >> { %3059 = vperm.xlu0 %4401, %v6998_v16   ;;  %v7013_v16 = vld [vmem:[#allocation179_spill] sm:$0xff] }
 0x62e   : >> { %3064 = vperm.xlu1 %4402, %v6999_v26   ;;  %v7014_v26 = vld [vmem:[#allocation90_spill] sm:$0xff] }
 0x630   : >> { %3069 = vperm.xlu0 %4401, %v7000_v34   ;;  %v7015_v34 = vld [vmem:[#allocation180_spill] sm:$0xff] }
 0x632   : >> { %v2078_v28 = vpop.permute.xlu0 %2077  ;;  %3074 = vperm.xlu1 %4402, %v7001_v29   ;;  %v7017_v29 = vld [vmem:[#allocation132_spill] sm:$0xff] }
 0x633   : >> { %2088 = vst.msk [vmem:[#allocation2 + $0x18] sm:$0x3f] %vm2087_vm8, %v2078_v28  ;;  %v7016_v28 = vld [vmem:[#allocation91_spill] sm:$0xff] }
 0x634   : >> { %3079 = vperm.xlu0 %4401, %v7002_v37   ;;  %v2076_v35 = vpop.permute.xlu1 %2075  ;;  %v7018_v37 = vld [vmem:[#allocation92_spill] sm:$0xff] }
 0x635   : >> { %2086 = vst.msk [vmem:[#allocation2 + $0x10] sm:$0xff] %vm2083_vm9, %v2076_v35  ;;  %v7019_v35 = vld [vmem:[#allocation181_spill] sm:$0xff] }
 0x636   : >> { %v2074_v8 = vpop.permute.xlu0 %2073  ;;  %3084 = vperm.xlu1 %4402, %v7003_v2   ;;  %v7022_v2 = vld [vmem:[#allocation94_spill] sm:$0xff] }
 0x637   : >> { %2085 = vst.msk [vmem:[#allocation2 + $0x8] sm:$0xff] %vm2083_vm9, %v2074_v8  ;;  %v7021_v8 = vld [vmem:[#allocation133_spill] sm:$0xff] }
 0x638   : >> { %3089 = vperm.xlu0 %4401, %v7004_v24   ;;  %v2072_v18 = vpop.permute.xlu1 %2071  ;;  %v7023_v24 = vld [vmem:[#allocation182_spill] sm:$0xff] }
 0x639   : >> { %2084 = vst.msk [vmem:[#allocation2] sm:$0xff] %vm2083_vm9, %v2072_v18  ;;  %v7024_v18 = vld [vmem:[#allocation95_spill] sm:$0xff] }
 0x63a   : >> { %3094 = vperm.xlu1 %4402, %v7005_v20   ;;  %v2092_v15 = vld [vmem:[#allocation2 + $0x18] sm:$0x3f] }
 0x63b   : >> { %4166 = vmatprep.subr.msk.mxu0 %vm2110_vm10, %v2092_v15  ;;  %v7025_v20 = vld [vmem:[#allocation134_spill] sm:$0xff] }
 0x63c   : >> { %3099 = vperm.xlu0 %4401, %v7006_v4   ;;  %4167 = vmatpush3.msk.msra.mxu0 %vm2110_vm10, %v2092_v15  ;;  %v2091_v6 = vld [vmem:[#allocation2 + $0x10] sm:$0xff]  ;;  %v7026_v15 = vld [vmem:[#allocation96_spill] sm:$0xff]  ;;  %v7027_v4 = vld [vmem:[#allocation183_spill] sm:$0xff] }
 0x63d   : >> { %4168 = vmatprep.subr.mxu0 %v2091_v6 }
 0x63e   : >> { %3104 = vperm.xlu1 %4402, %v7007_v36   ;;  %4169 = vmatpush3.msra.mxu0 %v2091_v6  ;;  %v2090_v5 = vld [vmem:[#allocation2 + $0x8] sm:$0xff]  ;;  %v7029_v36 = vld [vmem:[#allocation135_spill] sm:$0xff] }
 0x63f   : >> { %4170 = vmatprep.subr.mxu0 %v2090_v5  ;;  %v7028_v6 = vld [vmem:[#allocation97_spill] sm:$0xff] }
 0x640   : >> { %3109 = vperm.xlu0 %4401, %v7008_v19   ;;  %4171 = vmatpush3.msra.mxu0 %v2090_v5  ;;  %v2089_v21 = vld [vmem:[#allocation2] sm:$0xff]  ;;  %v7030_v5 = vld [vmem:[#allocation98_spill] sm:$0xff] }
 0x641   : >> { %4172 = vmatprep.subr.mxu0 %v2089_v21  ;;  %v7031_v19 = vld [vmem:[#allocation184_spill] sm:$0xff] }
 0x642   : >> { %3114 = vperm.xlu1 %4402, %v7009_v22   ;;  %4173 = vmatpush3.msra.mxu0 %v2089_v21  ;;  %v7032_v21 = vld [vmem:[#allocation136_spill] sm:$0xff]  ;;  %v7033_v22 = vld [vmem:[#allocation185_spill] sm:$0xff] }
 0x643   : >> { %4175 = vmatmul.mubr.msk.f32.vlgmr.msra.gmra.mxu0 %vm2103_vm7, %v7010_v25  ;;  %4177 = vmatprep.subr.msk.mxu0 %vm953_vm1, %v5790_v61  ;;  %v7034_v25 = vld [vmem:[#allocation186_spill] sm:$0xff] }
 0x644   : >> { %3119 = vperm.xlu0 %4401, %v7011_v27   ;;  %4178 = vmatpush3.msk.msra.mxu0 %vm953_vm1, %v5790_v61  ;;  %v7020_v61 = vld [vmem:[#allocation93_spill] sm:$0xff]  ;;  %v7035_v27 = vld [vmem:[#allocation187_spill] sm:$0xff] }
 0x645   : >> { %4179 = vmatprep.mubr.msk.f32.mxu0 %vm940_vm0, %v7012_v23  ;;  %v7036_v23 = vld [vmem:[#allocation188_spill] sm:$0xff] }
 0x646   : >> { %3124 = vperm.xlu1 %4402, %v7013_v16   ;;  %v7037_v16 = vld [vmem:[#allocation189_spill] sm:$0xff] }
 0x647   : >> { %4180 = vmatmul.mubr.msk.f32.vlgmr.msra.gmra.mxu0 %vm940_vm0, %v7014_v26  ;;  %v7038_v26 = vld [vmem:[#allocation190_spill] sm:$0xff] }
 0x648   : >> { %3129 = vperm.xlu0 %4401, %v7015_v34   ;;  %4182 = vmatprep.mubr.msk.f32.mxu0 %vm940_vm0, %v7016_v28  ;;  %v7039_v34 = vld [vmem:[#allocation191_spill] sm:$0xff]  ;;  %v7040_v28 = vld [vmem:[#allocation192_spill] sm:$0xff] }
 0x64a   : >> { %2985 = vperm.xlu1 %4402, %v7017_v29   ;;  %v7041_v29 = vld [vmem:[#allocation193_spill] sm:$0xff] }
 0x64b   : >> { %4183 = vmatmul.mubr.msk.f32.gmra.mxu0 %vm940_vm0, %v7018_v37  ;;  %v7042_v37 = vld [vmem:[#allocation41_spill] sm:$0xff] }
 0x64c   : >> { %3134 = vperm.xlu0 %4401, %v7019_v35   ;;  %4185 = vmatprep.mubr.msk.f32.mxu0 %vm940_vm0, %v7020_v61  ;;  %v2101_v35 = vpop.permute.xlu0 %2100 }
 0x64e   : >> { %2990 = vperm.xlu1 %4402, %v7021_v8  }
 0x64f   : >> { %4186 = vmatmul.mubr.msk.f32.gmra.mxu0 %vm940_vm0, %v7022_v2  ;;  %v2096_v2 = vpop.permute.xlu1 %2095 }
 0x650   : >> { %3139 = vperm.xlu0 %4401, %v7023_v24   ;;  %4188 = vmatprep.mubr.msk.f32.mxu0 %vm940_vm0, %v7024_v18 }
 0x652   : >> { %2995 = vperm.xlu1 %4402, %v7025_v20  }
 0x653   : >> { %4189 = vmatmul.mubr.msk.f32.gmra.mxu0 %vm940_vm0, %v7026_v15 }
 0x654   : >> { %3144 = vperm.xlu0 %4401, %v7027_v4   ;;  %4191 = vmatprep.mubr.msk.f32.mxu0 %vm940_vm0, %v7028_v6 }
 0x656   : >> { %3000 = vperm.xlu1 %4402, %v7029_v36  }
 0x657   : >> { %4192 = vmatmul.mubr.msk.f32.gmra.mxu0 %vm940_vm0, %v7030_v5 }
 0x658   : >> { %3149 = vperm.xlu0 %4401, %v7031_v19   ;;  %4219 = vmatprep.mubr.msk.f32.mxu0 %vm2458_vm11, %v7042_v37  ;;  %v7052_v37 = vld [vmem:[#allocation51_spill] sm:$0xff] }
 0x65a   : >> { %3005 = vperm.xlu1 %4402, %v7032_v21  }
 0x65c   : >> { %3572 = vperm.xlu0 %4401, %v7033_v22   ;;  %v7043_v22 = vld [vmem:[#allocation42_spill] sm:$0xff] }
 0x65e   : >> { %3577 = vperm.xlu1 %4402, %v7034_v25   ;;  %v7044_v25 = vld [vmem:[#allocation43_spill] sm:$0xff] }
 0x660   : >> { %3582 = vperm.xlu0 %4401, %v7035_v27   ;;  %v7045_v27 = vld [vmem:[#allocation44_spill] sm:$0xff] }
 0x662   : >> { %3587 = vperm.xlu1 %4402, %v7036_v23   ;;  %v7046_v23 = vld [vmem:[#allocation45_spill] sm:$0xff] }
 0x664   : >> { %3592 = vperm.xlu0 %4401, %v7037_v16   ;;  %v7047_v16 = vld [vmem:[#allocation46_spill] sm:$0xff] }
 0x666   : >> { %3597 = vperm.xlu1 %4402, %v7038_v26   ;;  %v7048_v26 = vld [vmem:[#allocation47_spill] sm:$0xff] }
 0x668   : >> { %3602 = vperm.xlu0 %4401, %v7039_v34   ;;  %v7049_v34 = vld [vmem:[#allocation48_spill] sm:$0xff] }
 0x66a   : >> { %3607 = vperm.xlu1 %4402, %v7040_v28   ;;  %v7050_v28 = vld [vmem:[#allocation49_spill] sm:$0xff] }
 0x66c   : >> { %3642 = vperm.xlu0 %4401, %v7041_v29   ;;  %v7051_v29 = vld [vmem:[#allocation50_spill] sm:$0xff] }
 0x703   : >> { %v4176_v61 = vpop.f32.mrf.mxu0 }
 0x704   : >> { %v2186_v8 = vadd.f32 %v4176_v61, %v2101_v35  ;;  %v7053_v35 = vld [vmem:[#allocation52_spill] sm:$0xff]  ;;  %v7054_v61 = vld [vmem:[#allocation53_spill] sm:$0xff] }
 0x705   : >> { %v2180_v24 = vpop.f32.mrf.mxu0 }
 0x706   : >> { %v3820_v18 = vmul.f32 -1.442695, %v2186_v8  ;;  %v2181_v20 = vadd.f32 %v2180_v24, %v2096_v2  ;;  %v7055_v8 = vld [vmem:[#allocation54_spill] sm:$0xff]  ;;  %v7056_v2 = vld [vmem:[#allocation55_spill] sm:$0xff]  ;;  %v7057_v24 = vld [vmem:[#allocation56_spill] sm:$0xff] }
 0x707   : >> { %v4181_v1 = vpop.f32.mrf.mxu0 }
 0x708   : >> { %4467 = vpow2.f32 %v3820_v18  ;;  %v3819_v15 = vmul.f32 -1.442695, %v2181_v20  ;;  %v7058_v18 = vld [vmem:[#allocation57_spill] sm:$0xff]  ;;  %v6173_v20 = vpop.permute.xlu0 %2722 }
 0x709   : >> { %v2339_v63 = vpop.f32.mrf.mxu0 }
 0x70a   : >> { %4469 = vpow2.f32 %v3819_v15  ;;  %v7059_v15 = vld [vmem:[#allocation58_spill] sm:$0xff] }
 0x715   : >> { %v4468_v4 = vpop.eup %4467 }
 0x716   : >> { %v2196_v6 = vadd.f32 1.0, %v4468_v4  ;;  %v7060_v4 = vld [vmem:[#allocation59_spill] sm:$0xff] }
 0x717   : >> { %v4470_v36 = vpop.eup %4469 }
 0x718   : >> { %4471 = vrcp.f32 %v2196_v6  ;;  %v2195_v5 = vadd.f32 1.0, %v4470_v36  ;;  %v6179_v6 = vpop.permute.xlu1 %2727  ;;  %v6181_v36 = vpop.permute.xlu0 %2732 }
 0x71a   : >> { %4473 = vrcp.f32 %v2195_v5  ;;  %v7061_v5 = vld [vmem:[#allocation60_spill] sm:$0xff] }
 0x725   : >> { %v4472_v19 = vpop.eup %4471 }
 0x726   : >> { %4215 = vmatprep.subr.msk.mxu0 %vm2531_vm12, %v4472_v19 }
 0x727   : >> { %v4474_v21 = vpop.eup %4473  ;;  %4216 = vmatpush3.msk.msra.mxu0 %vm2531_vm12, %v4472_v19  ;;  %v7062_v19 = vld [vmem:[#allocation61_spill] sm:$0xff] }
 0x728   : >> { %4217 = vmatprep.subr.mxu0 %v4474_v21 }
 0x729   : >> { %4218 = vmatpush3.msra.mxu0 %v4474_v21  ;;  %v6187_v21 = vpop.permute.xlu1 %2737 }
 0x72a   : >> { %4220 = vmatmul.mubr.msk.f32.vlgmr.msra.gmra.mxu0 %vm2458_vm11, %v7043_v22  ;;  %v7063_v22 = vld [vmem:[#allocation62_spill] sm:$0xff] }
 0x72b   : >> { %4222 = vmatprep.mubr.msk.f32.mxu0 %vm2458_vm11, %v7044_v25  ;;  %v7064_v25 = vld [vmem:[#allocation63_spill] sm:$0xff] }
 0x72e   : >> { %4223 = vmatmul.mubr.msk.f32.gmra.mxu0 %vm2458_vm11, %v7045_v27  ;;  %v6193_v27 = vpop.permute.xlu0 %2742 }
 0x72f   : >> { %4225 = vmatprep.mubr.msk.f32.mxu0 %vm2458_vm11, %v7046_v23  ;;  %v7065_v23 = vld [vmem:[#allocation64_spill] sm:$0xff] }
 0x732   : >> { %4226 = vmatmul.mubr.msk.f32.gmra.mxu0 %vm2458_vm11, %v7047_v16  ;;  %v6197_v16 = vpop.permute.xlu1 %2747 }
 0x733   : >> { %4228 = vmatprep.mubr.msk.f32.mxu0 %vm2458_vm11, %v7048_v26  ;;  %v6199_v26 = vpop.permute.xlu0 %2752 }
 0x736   : >> { %4229 = vmatmul.mubr.msk.f32.gmra.mxu0 %vm2458_vm11, %v7049_v34  ;;  %v6201_v34 = vpop.permute.xlu1 %2757 }
 0x737   : >> { %4231 = vmatprep.mubr.msk.f32.mxu0 %vm2458_vm11, %v7050_v28  ;;  %v6203_v28 = vpop.permute.xlu0 %2762 }
 0x73a   : >> { %4232 = vmatmul.mubr.msk.f32.gmra.mxu0 %vm2458_vm11, %v7051_v29  ;;  %v6205_v29 = vpop.permute.xlu1 %2767 }
 0x73b   : >> { %4234 = vmatprep.mubr.msk.f32.mxu0 %vm2458_vm11, %v7052_v37  ;;  %v6207_v37 = vpop.permute.xlu0 %2772 }
 0x73e   : >> { %4235 = vmatmul.mubr.msk.f32.gmra.mxu0 %vm2458_vm11, %v7053_v35  ;;  %v6209_v35 = vpop.permute.xlu1 %2777 }
 0x73f   : >> { %4237 = vmatprep.mubr.msk.f32.mxu0 %vm2458_vm11, %v7054_v61  ;;  %v6211_v61 = vpop.permute.xlu0 %2782 }
 0x742   : >> { %4238 = vmatmul.mubr.msk.f32.gmra.mxu0 %vm2458_vm11, %v7055_v8  ;;  %v6213_v8 = vpop.permute.xlu1 %2787 }
 0x743   : >> { %4240 = vmatprep.mubr.msk.f32.mxu0 %vm2458_vm11, %v7056_v2  ;;  %v6215_v2 = vpop.permute.xlu0 %2792 }
 0x746   : >> { %4241 = vmatmul.mubr.msk.f32.gmra.mxu0 %vm2458_vm11, %v7057_v24  ;;  %v6217_v24 = vpop.permute.xlu1 %2797 }
 0x747   : >> { %4243 = vmatprep.mubr.msk.f32.mxu0 %vm2458_vm11, %v7058_v18  ;;  %v6219_v18 = vpop.permute.xlu0 %2802 }
 0x74a   : >> { %4244 = vmatmul.mubr.msk.f32.gmra.mxu0 %vm2458_vm11, %v7059_v15  ;;  %v6221_v15 = vpop.permute.xlu1 %2807 }
 0x74b   : >> { %4246 = vmatprep.mubr.msk.f32.mxu0 %vm2458_vm11, %v7060_v4  ;;  %v6223_v4 = vpop.permute.xlu0 %2812 }
 0x74e   : >> { %4247 = vmatmul.mubr.msk.f32.gmra.mxu0 %vm2458_vm11, %v7061_v5  ;;  %v6225_v5 = vpop.permute.xlu1 %2817 }
 0x74f   : >> { %4249 = vmatprep.mubr.msk.f32.mxu0 %vm2458_vm11, %v7062_v19  ;;  %v6227_v19 = vpop.permute.xlu0 %2822 }
 0x752   : >> { %4250 = vmatmul.mubr.msk.f32.gmra.mxu0 %vm2458_vm11, %v7063_v22  ;;  %v6229_v22 = vpop.permute.xlu1 %2827 }
 0x753   : >> { %4252 = vmatprep.mubr.msk.f32.mxu0 %vm2458_vm11, %v7064_v25  ;;  %v6231_v25 = vpop.permute.xlu0 %2832 }
 0x754   : >> { %7066 = vst [vmem:[#allocation203_spill] sm:$0xff] %v6231_v25 }
 0x756   : >> { %4253 = vmatmul.mubr.msk.f32.gmra.mxu0 %vm2458_vm11, %v7065_v23  ;;  %v6233_v23 = vpop.f32.mrf.mxu1  ;;  %v6235_v7 = vpop.permute.xlu1 %2837 }
 0x757   : >> { %7067 = vst [vmem:[#allocation204_spill] sm:$0xff] %v6233_v23  ;;  %7068 = vst [vmem:[#allocation205_spill] sm:$0xff] %v6235_v7  ;;  %v6239_v10 = vpop.permute.xlu0 %2890 }
 0x758   : >> { %v6237_v9 = vpop.f32.mrf.mxu1 }
 0x759   : >> { %7069 = vst [vmem:[#allocation206_spill] sm:$0xff] %v6237_v9 }
 0x75a   : >> { %v6241_v11 = vpop.f32.mrf.mxu1  ;;  %v6243_v12 = vpop.permute.xlu1 %2895 }
 0x75b   : >> { %7070 = vst [vmem:[#allocation207_spill] sm:$0xff] %v6241_v11  ;;  %v6245_v13 = vpop.permute.xlu0 %2900 }
 0x75c   : >> { %v6247_v30 = vpop.f32.mrf.mxu1 }
 0x75d   : >> { %7071 = vst [vmem:[#allocation208_spill] sm:$0xff] %v6247_v30 }
 0x75e   : >> { %v6249_v31 = vpop.permute.xlu1 %2905  ;;  %v6251_v32 = vpop.f32.mrf.mxu1 }
 0x75f   : >> { %7072 = vst [vmem:[#allocation209_spill] sm:$0xff] %v6251_v32  ;;  %v6253_v33 = vpop.permute.xlu0 %2910 }
 0x760   : >> { %v6255_v39 = vpop.f32.mrf.mxu1 }
 0x761   : >> { %7073 = vst [vmem:[#allocation210_spill] sm:$0xff] %v6255_v39 }
 0x762   : >> { %v6257_v42 = vpop.permute.xlu1 %2915  ;;  %v6261_v44 = vpop.f32.mrf.mxu1 }
 0x763   : >> { %v6259_v43 = vpop.permute.xlu0 %2920  ;;  %7075 = vst [vmem:[#allocation212_spill] sm:$0xff] %v6261_v44 }
 0x764   : >> { %7074 = vst [vmem:[#allocation211_spill] sm:$0xff] %v6259_v43  ;;  %v6265_v46 = vpop.f32.mrf.mxu1  ;;  %v2841_v43 = vmul.f32 %v6179_v6, %v5832_v17 }
 0x765   : >> { %7076 = vst [vmem:[#allocation213_spill] sm:$0xff] %v6265_v46 }
 0x766   : >> { %v6263_v45 = vpop.permute.xlu1 %2925  ;;  %v6269_v48 = vpop.f32.mrf.mxu1 }
 0x767   : >> { %v6267_v47 = vpop.permute.xlu0 %2930  ;;  %7078 = vst [vmem:[#allocation215_spill] sm:$0xff] %v6269_v48 }
 0x768   : >> { %7077 = vst [vmem:[#allocation214_spill] sm:$0xff] %v6267_v47  ;;  %v6275_v51 = vpop.f32.mrf.mxu1 }
 0x769   : >> { %7081 = vst [vmem:[#allocation218_spill] sm:$0xff] %v6275_v51 }
 0x76a   : >> { %v6271_v49 = vpop.permute.xlu1 %2935  ;;  %v6279_v53 = vpop.f32.mrf.mxu1 }
 0x76b   : >> { %7079 = vst [vmem:[#allocation216_spill] sm:$0xff] %v6271_v49  ;;  %v6273_v50 = vpop.permute.xlu0 %2940  ;;  %7083 = vst [vmem:[#allocation220_spill] sm:$0xff] %v6279_v53 }
 0x76c   : >> { %7080 = vst [vmem:[#allocation217_spill] sm:$0xff] %v6273_v50  ;;  %v6283_v55 = vpop.f32.mrf.mxu1 }
 0x76d   : >> { %7085 = vst [vmem:[#allocation222_spill] sm:$0xff] %v6283_v55  ;;  %v4184_v55 = vpop.f32.mrf.mxu0 }
 0x76e   : >> { %v6277_v52 = vpop.permute.xlu1 %2945  ;;  %v6289_v58 = vpop.f32.mrf.mxu1 }
 0x76f   : >> { %7082 = vst [vmem:[#allocation219_spill] sm:$0xff] %v6277_v52  ;;  %v6281_v54 = vpop.permute.xlu0 %2950  ;;  %7088 = vst [vmem:[#allocation225_spill] sm:$0xff] %v6289_v58 }
 0x770   : >> { %7084 = vst [vmem:[#allocation221_spill] sm:$0xff] %v6281_v54  ;;  %v6293_v60 = vpop.f32.mrf.mxu1 }
 0x771   : >> { %7090 = vst [vmem:[#allocation227_spill] sm:$0xff] %v6293_v60  ;;  %v2349_v60 = vpop.f32.mrf.mxu0 }
 0x772   : >> { %v6285_v56 = vpop.permute.xlu1 %2955  ;;  %v4273_v0 = vpop.f32.mrf.mxu1 }
 0x773   : >> { %7086 = vst [vmem:[#allocation223_spill] sm:$0xff] %v6285_v56  ;;  %v6287_v57 = vpop.permute.xlu0 %2960  ;;  %v6309_v48 = vpop.f32.mrf.mxu0 }
 0x774   : >> { %7087 = vst [vmem:[#allocation224_spill] sm:$0xff] %v6287_v57  ;;  %v3291_v38 = vpop.f32.mrf.mxu1 }
 0x775   : >> { %v6317_v46 = vpop.f32.mrf.mxu0 }
 0x776   : >> { %v6291_v59 = vpop.permute.xlu1 %2965  ;;  %v6301_v62 = vpop.f32.mrf.mxu1 }
 0x777   : >> { %7089 = vst [vmem:[#allocation226_spill] sm:$0xff] %v6291_v59  ;;  %v6295_v14 = vpop.permute.xlu0 %2970  ;;  %v6323_v59 = vpop.f32.mrf.mxu0 }
 0x778   : >> { %7091 = vst [vmem:[#allocation228_spill] sm:$0xff] %v6295_v14  ;;  %v6303_v58 = vpop.f32.mrf.mxu1 }
 0x779   : >> { %v6329_v56 = vpop.f32.mrf.mxu0 }
 0x77a   : >> { %v6297_v40 = vpop.permute.xlu1 %2975  ;;  %v6307_v14 = vpop.f32.mrf.mxu1 }
 0x77b   : >> { %7092 = vst [vmem:[#allocation229_spill] sm:$0xff] %v6297_v40  ;;  %v6299_v41 = vpop.permute.xlu0 %2980  ;;  %v6337_v11 = vpop.f32.mrf.mxu0 }
 0x77c   : >> { %7093 = vst [vmem:[#allocation230_spill] sm:$0xff] %v6299_v41  ;;  %v6313_v41 = vpop.f32.mrf.mxu1 }
 0x77d   : >> { %v6343_v47 = vpop.f32.mrf.mxu0 }
 0x77e   : >> { %v3035_v3 = vpop.permute.xlu1 %3034  ;;  %v6319_v25 = vpop.f32.mrf.mxu1  ;;  %7101 = vst [vmem:[#allocation238_spill] sm:$0xff] %v6343_v47  ;;  %v2845_v47 = vmul.f32 %v6197_v16, %v5832_v17 }
 0x77f   : >> { %v3040_v7 = vpop.permute.xlu0 %3039 }
 0x780   : >> { %v6327_v54 = vpop.f32.mrf.mxu1 }
 0x781   : >> { %7095 = vst [vmem:[#allocation232_spill] sm:$0xff] %v6327_v54 }
 0x782   : >> { %v6305_v53 = vpop.permute.xlu1 %3044  ;;  %v6333_v50 = vpop.f32.mrf.mxu1 }
 0x783   : >> { %v3050_v51 = vpop.permute.xlu0 %3049  ;;  %7097 = vst [vmem:[#allocation234_spill] sm:$0xff] %v6333_v50  ;;  %v2840_v50 = vmul.f32 %v6173_v20, %v5832_v17  ;;  %v6369_v20 = vmul.f32 %v6203_v28, %v5832_v17  ;;  %v6390_v28 = vmul.f32 %v6211_v61, %v5832_v17 }
 0x784   : >> { %v6339_v52 = vpop.f32.mrf.mxu1 }
 0x785   : >> { %7099 = vst [vmem:[#allocation236_spill] sm:$0xff] %v6339_v52 }
 0x786   : >> { %v6311_v40 = vpop.permute.xlu1 %3054  ;;  %v6349_v54 = vpop.f32.mrf.mxu1 }
 0x787   : >> { %v6315_v57 = vpop.permute.xlu0 %3059 }
 0x78a   : >> { %v6321_v44 = vpop.permute.xlu1 %3064 }
 0x78b   : >> { %7094 = vst [vmem:[#allocation231_spill] sm:$0xff] %v6321_v44  ;;  %v6325_v39 = vpop.permute.xlu0 %3069 }
 0x78e   : >> { %v6331_v32 = vpop.permute.xlu1 %3074 }
 0x78f   : >> { %7096 = vst [vmem:[#allocation233_spill] sm:$0xff] %v6331_v32  ;;  %v6335_v30 = vpop.permute.xlu0 %3079 }
 0x790   : >> { %7098 = vst [vmem:[#allocation235_spill] sm:$0xff] %v6335_v30  ;;  %v2842_v30 = vmul.f32 %v6181_v36, %v5832_v17  ;;  %v6373_v36 = vmul.f32 %v6205_v29, %v5832_v17  ;;  %v3292_v29 = vadd.f32 %v3291_v38, %v3035_v3  ;;  %v3307_v38 = vadd.f32 %v6301_v62, %v3050_v51 }
 0x792   : >> { %v6341_v9 = vpop.permute.xlu1 %3084 }
 0x793   : >> { %7100 = vst [vmem:[#allocation237_spill] sm:$0xff] %v6341_v9  ;;  %v6345_v23 = vpop.permute.xlu0 %3089  ;;  %v2843_v9 = vmul.f32 %v6187_v21, %v5832_v17 }
 0x794   : >> { %7102 = vst [vmem:[#allocation239_spill] sm:$0xff] %v6345_v23  ;;  %v2844_v23 = vmul.f32 %v6193_v27, %v5832_v17 }
 0x796   : >> { %v6375_v21 = vpop.permute.xlu1 %3094 }
 0x797   : >> { %7103 = vst [vmem:[#allocation240_spill] sm:$0xff] %v6375_v21 }
 0x79a   : >> { %v6421_v51 = vpop.permute.xlu1 %3104 }
 0x7ea   : >> { %v4221_v49 = vpop.f32.mrf.mxu0 }
 0x7eb   : >> { %v2607_v32 = vadd.f32 %v4221_v49, %v4181_v1  ;;  %v6363_v49 = vmul.f32 %v6199_v26, %v5832_v17  ;;  %v2847_v1 = vmul.f32 %v6201_v34, %v5832_v17  ;;  %v6382_v26 = vmul.f32 %v6207_v37, %v5832_v17 }
 0x7ec   : >> { %v2601_v52 = vpop.f32.mrf.mxu0  ;;  %v6386_v34 = vmul.f32 %v6209_v35, %v5832_v17  ;;  %v6401_v37 = vmul.f32 %v6215_v2, %v5832_v17  ;;  %v6405_v35 = vmul.f32 %v6217_v24, %v5832_v17  ;;  %v6417_v2 = vmul.f32 %v6221_v15, %v5832_v17 }
 0x7ed   : >> { %v2865_v6 = vadd.f32 %v2841_v43, %v2607_v32  ;;  %v2602_v44 = vadd.f32 %v2601_v52, %v2339_v63  ;;  %v3297_v32 = vadd.f32 %v4273_v0, %v3040_v7  ;;  %v6377_v43 = vpop.f32.mrf.mxu1  ;;  %v6392_v7 = vpop.permute.xlu0 %3099  ;;  %v3302_v24 = vadd.f32 %v6303_v58, %v6305_v53 }
 0x7ee   : >> { %v4224_v27 = vpop.f32.mrf.mxu0  ;;  %v6431_v15 = vmul.f32 %v6225_v5, %v5832_v17  ;;  %v3317_v5 = vadd.f32 %v6307_v14, %v6315_v57 }
 0x7ef   : >> { %v3009_v52 = vadd.f32 %v6243_v12, %v2865_v6  ;;  %v2864_v63 = vadd.f32 %v2840_v50, %v2602_v44  ;;  %v2617_v16 = vadd.f32 %v4224_v27, %v4184_v55  ;;  %v6397_v55 = vmul.f32 %v6213_v8, %v5832_v17  ;;  %v6408_v61 = vpop.f32.mrf.mxu1 }
 0x7f0   : >> { %v2611_v0 = vpop.f32.mrf.mxu0  ;;  %v6413_v8 = vmul.f32 %v6219_v18, %v5832_v17  ;;  %v6427_v18 = vmul.f32 %v6223_v4, %v5832_v17  ;;  %v6439_v4 = vmul.f32 %v6227_v19, %v5832_v17  ;;  %v6449_v19 = vpop.permute.xlu1 %3114 }
 0x7f1   : >> { %v3411_v21 = vadd.f32 %v3297_v32, %v3009_v52  ;;  %v3008_v12 = vadd.f32 %v6239_v10, %v2864_v63  ;;  %v2867_v44 = vadd.f32 %v2843_v9, %v2617_v16  ;;  %v2612_v50 = vadd.f32 %v2611_v0, %v2349_v60  ;;  %v6433_v32 = vpop.permute.xlu0 %3109  ;;  %v3351_v52 = vpop.f32.mrf.mxu1 }
 0x7f2   : >> { %v4227_v3 = vpop.f32.mrf.mxu0 }
 0x7f3   : >> { %v3896_v10 = vmul.f32 -1.442695, %v3411_v21  ;;  %v3410_v9 = vadd.f32 %v3292_v29, %v3008_v12  ;;  %v3011_v60 = vadd.f32 %v6249_v31, %v2867_v44  ;;  %v2866_v6 = vadd.f32 %v2842_v30, %v2612_v50 }
 0x7f4   : >> { %v2627_v62 = vadd.f32 %v4227_v3, %v6309_v48  ;;  %v2621_v21 = vpop.f32.mrf.mxu0  ;;  %v3312_v50 = vadd.f32 %v6313_v41, %v6311_v40  ;;  %v6457_v40 = vmul.f32 %v6229_v22, %v5832_v17  ;;  %v7104_v41 = vld [vmem:[#allocation231_spill] sm:$0xff] }
 0x7f5   : >> { %4475 = vpow2.f32 %v3896_v10  ;;  %v3895_v27 = vmul.f32 -1.442695, %v3410_v9  ;;  %v3413_v31 = vadd.f32 %v3307_v38, %v3011_v60  ;;  %v3010_v30 = vadd.f32 %v6245_v13, %v2866_v6  ;;  %v6461_v3 = vpop.permute.xlu0 %3119  ;;  %v7106_v6 = vld [vmem:[#allocation211_spill] sm:$0xff] }
 0x7f6   : >> { %v2869_v53 = vadd.f32 %v2845_v47, %v2627_v62  ;;  %v2622_v58 = vadd.f32 %v2621_v21, %v6317_v46  ;;  %v4230_v48 = vpop.f32.mrf.mxu0  ;;  %v7109_v21 = vld [vmem:[#allocation236_spill] sm:$0xff]  ;;  %v7110_v22 = vld [vmem:[#allocation235_spill] sm:$0xff] }
 0x7f7   : >> { %4477 = vpow2.f32 %v3895_v27  ;;  %v3898_v63 = vmul.f32 -1.442695, %v3413_v31  ;;  %v3412_v16 = vadd.f32 %v3302_v24, %v3010_v30  ;;  %v2637_v13 = vadd.f32 %v4230_v48, %v6323_v59  ;;  %v7111_v31 = vld [vmem:[#allocation234_spill] sm:$0xff] }
 0x7f8   : >> { %v3013_v29 = vadd.f32 %v6257_v42, %v2869_v53  ;;  %v2868_v0 = vadd.f32 %v2844_v23, %v2622_v58  ;;  %v2631_v47 = vpop.f32.mrf.mxu0  ;;  %v3327_v59 = vadd.f32 %v6319_v25, %v6325_v39  ;;  %v4294_v42 = vpop.f32.mrf.mxu1  ;;  %v7105_v39 = vld [vmem:[#allocation232_spill] sm:$0xff]  ;;  %v3337_v30 = vadd.f32 %v7111_v31, %v7110_v22 }
 0x7f9   : >> { %4479 = vpow2.f32 %v3898_v63  ;;  %v3897_v46 = vmul.f32 -1.442695, %v3412_v16  ;;  %v2871_v12 = vadd.f32 %v2847_v1, %v2637_v13  ;;  %v2632_v44 = vadd.f32 %v2631_v47, %v6329_v56  ;;  %v7112_v13 = vld [vmem:[#allocation216_spill] sm:$0xff]  ;;  %v7114_v47 = vld [vmem:[#allocation239_spill] sm:$0xff] }
 0x7fa   : >> { %v3415_v38 = vadd.f32 %v3317_v5, %v3013_v29  ;;  %v3012_v14 = vadd.f32 %v6253_v33, %v2868_v0  ;;  %v4233_v57 = vpop.f32.mrf.mxu0  ;;  %v3322_v25 = vadd.f32 %v7105_v39, %v7104_v41  ;;  %v6470_v48 = vpop.f32.mrf.mxu1  ;;  %v7118_v39 = vld [vmem:[#allocation206_spill] sm:$0xff]  ;;  %v7121_v22 = vld [vmem:[#allocation208_spill] sm:$0xff] }
 0x7fb   : >> { %4481 = vpow2.f32 %v3897_v46  ;;  %v3015_v23 = vadd.f32 %v6263_v45, %v2871_v12  ;;  %v2870_v1 = vadd.f32 %v6363_v49, %v2632_v44  ;;  %v2647_v56 = vadd.f32 %v4233_v57, %v6337_v11  ;;  %v7107_v49 = vld [vmem:[#allocation238_spill] sm:$0xff]  ;;  %v7108_v11 = vld [vmem:[#allocation233_spill] sm:$0xff]  ;;  %v6478_v12 = vpop.permute.xlu1 %3124  ;;  %v7115_v44 = vld [vmem:[#allocation204_spill] sm:$0xff]  ;;  %v6485_v41 = vpop.permute.xlu0 %3129 }
 0x7fc   : >> { %v3900_v10 = vmul.f32 -1.442695, %v3415_v38  ;;  %v3414_v33 = vadd.f32 %v3312_v50, %v3012_v14  ;;  %v2641_v9 = vpop.f32.mrf.mxu0  ;;  %v3332_v27 = vadd.f32 %v7109_v21, %v7108_v11  ;;  %v3347_v46 = vadd.f32 %v6349_v54, %v7114_v47  ;;  %v7116_v57 = vld [vmem:[#allocation214_spill] sm:$0xff] }
 0x7fd   : >> { %v3417_v60 = vadd.f32 %v3327_v59, %v3015_v23  ;;  %v3014_v24 = vadd.f32 %v7106_v6, %v2870_v1  ;;  %v2873_v45 = vadd.f32 %v6373_v36, %v2647_v56  ;;  %v2642_v62 = vadd.f32 %v2641_v9, %v7107_v49  ;;  %v7113_v36 = vld [vmem:[#allocation237_spill] sm:$0xff]  ;;  %v7117_v56 = vld [vmem:[#allocation240_spill] sm:$0xff] }
 0x7fe   : >> { %4483 = vpow2.f32 %v3900_v10  ;;  %v3899_v53 = vmul.f32 -1.442695, %v3414_v33  ;;  %v4236_v58 = vpop.f32.mrf.mxu0  ;;  %v3342_v0 = vadd.f32 %v6377_v43, %v7113_v36  ;;  %v3357_v43 = vadd.f32 %v6408_v61, %v6392_v7  ;;  %v6489_v33 = vpop.f32.mrf.mxu1  ;;  %v7120_v61 = vld [vmem:[#allocation207_spill] sm:$0xff] }
 0x7ff   : >> { %v3902_v63 = vmul.f32 -1.442695, %v3417_v60  ;;  %v3416_v16 = vadd.f32 %v3322_v25, %v3014_v24  ;;  %v3017_v5 = vadd.f32 %v7112_v13, %v2873_v45  ;;  %v2872_v29 = vadd.f32 %v6369_v20, %v2642_v62  ;;  %v6502_v47 = vpop.permute.xlu0 %3134 }
 0x800   : >> { %4485 = vpow2.f32 %v3899_v53  ;;  %v2657_v50 = vadd.f32 %v4236_v58, %v7115_v44  ;;  %v2651_v59 = vpop.f32.mrf.mxu0  ;;  %v3352_v20 = vadd.f32 %v3351_v52, %v7117_v56  ;;  %v3367_v45 = vadd.f32 %v4294_v42, %v6433_v32  ;;  %v7119_v52 = vld [vmem:[#allocation219_spill] sm:$0xff]  ;;  %v6496_v53 = vpop.permute.xlu1 %2985  ;;  %v7122_v58 = vld [vmem:[#allocation217_spill] sm:$0xff]  ;;  %v7126_v56 = vld [vmem:[#allocation210_spill] sm:$0xff] }
 0x801   : >> { %4487 = vpow2.f32 %v3902_v63  ;;  %v3901_v38 = vmul.f32 -1.442695, %v3416_v16  ;;  %v3419_v14 = vadd.f32 %v3337_v30, %v3017_v5  ;;  %v3016_v23 = vadd.f32 %v7116_v57, %v2872_v29  ;;  %v3371_v16 = vpop.f32.mrf.mxu1  ;;  %v7123_v5 = vld [vmem:[#allocation209_spill] sm:$0xff] }
 0x802   : >> { %v4476_v1 = vpop.eup %4475  ;;  %v2875_v54 = vadd.f32 %v6386_v34, %v2657_v50  ;;  %v2652_v25 = vadd.f32 %v2651_v59, %v7118_v39  ;;  %v4239_v10 = vpop.f32.mrf.mxu0  ;;  %v7124_v59 = vld [vmem:[#allocation223_spill] sm:$0xff] }
 0x803   : >> { %v3475_v9 = vadd.f32 1.0, %v4476_v1  ;;  %4489 = vpow2.f32 %v3901_v38  ;;  %v3904_v60 = vmul.f32 -1.442695, %v3419_v14  ;;  %v3418_v6 = vadd.f32 %v3332_v27, %v3016_v23 }
 0x804   : >> { %v4478_v24 = vpop.eup %4477  ;;  %v3019_v49 = vadd.f32 %v7119_v52, %v2875_v54  ;;  %v2874_v7 = vadd.f32 %v6382_v26, %v2652_v25  ;;  %v2667_v62 = vadd.f32 %v4239_v10, %v7120_v61  ;;  %v2661_v11 = vpop.f32.mrf.mxu0 }
 0x805   : >> { %4491 = vrcp.f32 %v3475_v9  ;;  %v3474_v34 = vadd.f32 1.0, %v4478_v24  ;;  %v3903_v21 = vmul.f32 -1.442695, %v3418_v6  ;;  %v2662_v31 = vadd.f32 %v2661_v11, %v7121_v22  ;;  %v4300_v10 = vpop.f32.mrf.mxu1  ;;  %v7128_v6 = vld [vmem:[#allocation212_spill] sm:$0xff]  ;;  %v6510_v52 = vpop.permute.xlu1 %2990 }
 0x806   : >> { %v4480_v30 = vpop.eup %4479  ;;  %4493 = vpow2.f32 %v3904_v60  ;;  %v3421_v27 = vadd.f32 %v3347_v46, %v3019_v49  ;;  %v3018_v63 = vadd.f32 %v7122_v58, %v2874_v7  ;;  %v2877_v32 = vadd.f32 %v6397_v55, %v2667_v62  ;;  %v4242_v42 = vpop.f32.mrf.mxu0  ;;  %v7125_v55 = vld [vmem:[#allocation221_spill] sm:$0xff]  ;;  %v7129_v62 = vld [vmem:[#allocation203_spill] sm:$0xff] }
 0x807   : >> { %4495 = vrcp.f32 %v3474_v34  ;;  %v3477_v26 = vadd.f32 1.0, %v4480_v30  ;;  %v2876_v13 = vadd.f32 %v6390_v28, %v2662_v31  ;;  %v2677_v29 = vadd.f32 %v4242_v42, %v7123_v5  ;;  %v6520_v30 = vpop.permute.xlu0 %3139  ;;  %v3381_v42 = vpop.f32.mrf.mxu1 }
 0x808   : >> { %v4482_v36 = vpop.eup %4481  ;;  %4497 = vpow2.f32 %v3903_v21  ;;  %v3906_v44 = vmul.f32 -1.442695, %v3421_v27  ;;  %v3420_v50 = vadd.f32 %v3342_v0, %v3018_v63  ;;  %v3021_v46 = vadd.f32 %v7124_v59, %v2877_v32  ;;  %v2671_v38 = vpop.f32.mrf.mxu0  ;;  %v7127_v0 = vld [vmem:[#allocation226_spill] sm:$0xff]  ;;  %v7130_v21 = vld [vmem:[#allocation213_spill] sm:$0xff]  ;;  %v7131_v63 = vld [vmem:[#allocation224_spill] sm:$0xff] }
 0x809   : >> { %4499 = vrcp.f32 %v3477_v26  ;;  %v3476_v14 = vadd.f32 1.0, %v4482_v36  ;;  %v3020_v57 = vadd.f32 %v7125_v55, %v2876_v13  ;;  %v2879_v23 = vadd.f32 %v6405_v35, %v2677_v29  ;;  %v4303_v59 = vpop.f32.mrf.mxu1 }
 0x80a   : >> { %4501 = vpow2.f32 %v3906_v44  ;;  %v3905_v1 = vmul.f32 -1.442695, %v3420_v50  ;;  %v3423_v28 = vadd.f32 %v3357_v43, %v3021_v46  ;;  %v2672_v54 = vadd.f32 %v2671_v38, %v7126_v56  ;;  %v4245_v39 = vpop.f32.mrf.mxu0  ;;  %v7133_v38 = vld [vmem:[#allocation218_spill] sm:$0xff] }
 0x80b   : >> { %v4484_v25 = vpop.eup %4483  ;;  %4503 = vrcp.f32 %v3476_v14  ;;  %v3422_v9 = vadd.f32 %v3352_v20, %v3020_v57  ;;  %v3023_v60 = vadd.f32 %v7127_v0, %v2879_v23  ;;  %v2687_v24 = vadd.f32 %v4245_v39, %v7128_v6  ;;  %v7135_v0 = vld [vmem:[#allocation228_spill] sm:$0xff] }
 0x80c   : >> { %v3479_v49 = vadd.f32 1.0, %v4484_v25  ;;  %4505 = vpow2.f32 %v3905_v1  ;;  %v3908_v7 = vmul.f32 -1.442695, %v3423_v28  ;;  %v2878_v35 = vadd.f32 %v6401_v37, %v2672_v54  ;;  %v2681_v61 = vpop.f32.mrf.mxu0  ;;  %v7134_v54 = vld [vmem:[#allocation229_spill] sm:$0xff]  ;;  %v6533_v25 = vpop.permute.xlu0 %3144 }
 0x80d   : >> { %v4486_v43 = vpop.eup %4485  ;;  %v6515_v11 = vmul.f32 %v7129_v62, %v5832_v17  ;;  %v3362_v20 = vadd.f32 %v6470_v48, %v6421_v51  ;;  %v3425_v34 = vadd.f32 %v3367_v45, %v3023_v60  ;;  %v2682_v22 = vadd.f32 %v2681_v61, %v7130_v21  ;;  %v7132_v45 = vld [vmem:[#allocation215_spill] sm:$0xff]  ;;  %v7137_v62 = vld [vmem:[#allocation222_spill] sm:$0xff] }
 0x80e   : >> { %v4488_v31 = vpop.eup %4487  ;;  %4507 = vrcp.f32 %v3479_v49  ;;  %v3478_v27 = vadd.f32 1.0, %v4486_v43  ;;  %v3907_v58 = vmul.f32 -1.442695, %v3422_v9  ;;  %v3022_v37 = vadd.f32 %v7131_v63, %v2878_v35  ;;  %v4248_v32 = vpop.f32.mrf.mxu0 }
 0x80f   : >> { %v3481_v26 = vadd.f32 1.0, %v4488_v31  ;;  %4509 = vpow2.f32 %v3908_v7  ;;  %v3910_v13 = vmul.f32 -1.442695, %v3425_v34  ;;  %v2881_v5 = vadd.f32 %v6417_v2, %v2687_v24  ;;  %v2996_v2 = vpop.permute.xlu1 %2995 }
 0x810   : >> { %v4490_v29 = vpop.eup %4489  ;;  %4511 = vrcp.f32 %v3478_v27  ;;  %v3424_v51 = vadd.f32 %v3362_v20, %v3022_v37  ;;  %v2880_v48 = vadd.f32 %v6413_v8, %v2682_v22  ;;  %v2697_v36 = vadd.f32 %v4248_v32, %v7132_v45  ;;  %v2691_v44 = vpop.f32.mrf.mxu0  ;;  %v7139_v32 = vld [vmem:[#allocation205_spill] sm:$0xff] }
 0x811   : >> { %v3377_v50 = vadd.f32 %v6489_v33, %v6461_v3  ;;  %4513 = vrcp.f32 %v3481_v26  ;;  %v3480_v46 = vadd.f32 1.0, %v4490_v29  ;;  %v2692_v14 = vadd.f32 %v2691_v44, %v7133_v38  ;;  %v7140_v29 = vld [vmem:[#allocation230_spill] sm:$0xff] }
 0x812   : >> { %v4492_v55 = vpop.eup %4491  ;;  %v3372_v57 = vadd.f32 %v3371_v16, %v6449_v19  ;;  %4515 = vpow2.f32 %v3907_v58  ;;  %v3909_v23 = vmul.f32 -1.442695, %v3424_v51  ;;  %v2883_v1 = vadd.f32 %v6431_v15, %v2697_v36  ;;  %v4251_v8 = vpop.f32.mrf.mxu0  ;;  %v7136_v16 = vld [vmem:[#allocation220_spill] sm:$0xff]  ;;  %v7138_v58 = vld [vmem:[#allocation225_spill] sm:$0xff] }
 0x813   : >> { %v4494_v28 = vpop.eup %4493  ;;  %v3387_v56 = vadd.f32 %v4300_v10, %v6485_v41  ;;  %4517 = vrcp.f32 %v3480_v46  ;;  %v3025_v3 = vadd.f32 %v7134_v54, %v2881_v5  ;;  %v3523_v33 = vmul.f32 %v4492_v55, %v3377_v50  ;;  %v3391_v15 = vpop.f32.mrf.mxu1  ;;  %v7141_v50 = vld [vmem:[#allocation227_spill] sm:$0xff] }
 0x814   : >> { %v4496_v39 = vpop.eup %4495  ;;  %v3483_v9 = vadd.f32 1.0, %v4494_v28  ;;  %4519 = vpow2.f32 %v3910_v13  ;;  %v3024_v19 = vadd.f32 %v7135_v0, %v2880_v48  ;;  %v2707_v60 = vadd.f32 %v4251_v8, %v7136_v16  ;;  %v2701_v6 = vpop.f32.mrf.mxu0 }
 0x815   : >> { %v4498_v24 = vpop.eup %4497  ;;  %4521 = vpow2.f32 %v3909_v23  ;;  %v3531_v49 = vadd.f32 %v3523_v33, %v3025_v3  ;;  %v3522_v7 = vmul.f32 %v4496_v39, %v3372_v57  ;;  %v2882_v41 = vadd.f32 %v6427_v18, %v2692_v14  ;;  %v4306_v22 = vpop.f32.mrf.mxu1 }
 0x816   : >> { %v4500_v10 = vpop.eup %4499  ;;  %v3382_v35 = vadd.f32 %v3381_v42, %v6478_v12  ;;  %v3482_v61 = vadd.f32 1.0, %v4498_v24  ;;  %v3027_v43 = vadd.f32 %v6496_v53, %v2883_v1  ;;  %v2702_v20 = vadd.f32 %v2701_v6, %v7137_v62  ;;  %v4254_v34 = vpop.f32.mrf.mxu0 }
 0x817   : >> { %v4502_v21 = vpop.eup %4501  ;;  %4523 = vtanh.f32 %v3531_v49  ;;  %v3530_v31 = vadd.f32 %v3522_v7, %v3024_v19  ;;  %v3525_v27 = vmul.f32 %v4500_v10, %v3387_v56  ;;  %v2717_v63 = vadd.f32 %v4254_v34, %v7138_v58  ;;  %v3001_v26 = vpop.permute.xlu1 %3000  ;;  %v7143_v34 = vld [vmem:[#allocation201_spill] sm:$0xff] }
 0x818   : >> { %v4504_v37 = vpop.eup %4503  ;;  %v2863_v18 = vmul.f32 %v7139_v32, %v5832_v17  ;;  %4525 = vrcp.f32 %v3483_v9  ;;  %v3485_v12 = vadd.f32 1.0, %v4502_v21  ;;  %v2885_v42 = vadd.f32 %v6457_v40, %v2707_v60  ;;  %v2711_v53 = vpop.f32.mrf.mxu0 }
 0x819   : >> { %v4506_v13 = vpop.eup %4505  ;;  %4527 = vtanh.f32 %v3530_v31  ;;  %v3533_v5 = vadd.f32 %v3525_v27, %v3027_v43  ;;  %v3026_v51 = vadd.f32 %v7140_v29, %v2882_v41  ;;  %v3524_v48 = vmul.f32 %v4504_v37, %v3382_v35  ;;  %v3150_v36 = vpop.permute.xlu0 %3149  ;;  %v7142_v35 = vld [vmem:[#allocation200_spill] sm:$0xff] }
 0x81a   : >> { %v3397_v45 = vadd.f32 %v4303_v59, %v6520_v30  ;;  %4529 = vrcp.f32 %v3482_v61  ;;  %v2884_v44 = vadd.f32 %v6439_v4, %v2702_v20  ;;  %v2712_v17 = vadd.f32 %v2711_v53, %v7141_v50  ;;  %v3401_v23 = vpop.f32.mrf.mxu1  ;;  %v7147_v50 = vld [vmem:[#allocation196_spill] sm:$0xff] }
 0x81b   : >> { %v4508_v46 = vpop.eup %4507  ;;  %v3484_v38 = vadd.f32 1.0, %v4506_v13  ;;  %4531 = vtanh.f32 %v3533_v5  ;;  %v3532_v14 = vadd.f32 %v3524_v48, %v3026_v51  ;;  %v2887_v40 = vadd.f32 %v2863_v18, %v2717_v63  ;;  %v3006_v56 = vpop.permute.xlu1 %3005  ;;  %v7145_v18 = vld [vmem:[#allocation198_spill] sm:$0xff]  ;;  %v7146_v13 = vld [vmem:[#allocation199_spill] sm:$0xff] }
 0x81c   : >> { %v4510_v55 = vpop.eup %4509  ;;  %v3392_v57 = vadd.f32 %v3391_v15, %v6502_v47  ;;  %4533 = vrcp.f32 %v3485_v12  ;;  %v3029_v1 = vadd.f32 %v2996_v2, %v2885_v42  ;;  %v3527_v8 = vmul.f32 %v4508_v46, %v3397_v45 }
 0x81d   : >> { %v4512_v28 = vpop.eup %4511  ;;  %v3407_v30 = vadd.f32 %v4306_v22, %v3150_v36  ;;  %4535 = vtanh.f32 %v3532_v14  ;;  %v2886_v59 = vadd.f32 %v6515_v11, %v2712_v17  ;;  %v3487_v54 = vadd.f32 1.0, %v4510_v55  ;;  %v3573_v31 = vpop.permute.xlu0 %3572 }
 0x81e   : >> { %v4514_v4 = vpop.eup %4513  ;;  %v3535_v3 = vadd.f32 %v3527_v8, %v3029_v1  ;;  %v3028_v33 = vadd.f32 %v6510_v52, %v2884_v44  ;;  %v3526_v39 = vmul.f32 %v4512_v28, %v3392_v57  ;;  %v3402_v0 = vadd.f32 %v3401_v23, %v6533_v25  ;;  %v7148_v28 = vld [vmem:[#allocation197_spill] sm:$0xff] }
 0x81f   : >> { %v4516_v9 = vpop.eup %4515  ;;  %4537 = vrcp.f32 %v3484_v38  ;;  %v3031_v47 = vadd.f32 %v3006_v56, %v2887_v40  ;;  %v3529_v19 = vmul.f32 %v4514_v4, %v3407_v30  ;;  %v3030_v11 = vadd.f32 %v3001_v26, %v2886_v59  ;;  %v3578_v27 = vpop.permute.xlu1 %3577 }
 0x820   : >> { %v4518_v2 = vpop.eup %4517  ;;  %4539 = vtanh.f32 %v3535_v3  ;;  %v3534_v16 = vadd.f32 %v3526_v39, %v3028_v33  ;;  %v3486_v6 = vadd.f32 1.0, %v4516_v9 }
 0x821   : >> { %v4520_v60 = vpop.eup %4519  ;;  %v3537_v24 = vadd.f32 %v3529_v19, %v3031_v47  ;;  %v3528_v15 = vmul.f32 %v4518_v2, %v3402_v0  ;;  %4541 = vrcp.f32 %v3487_v54  ;;  %v3583_v36 = vpop.permute.xlu0 %3582  ;;  %v7149_v47 = vld [vmem:[#allocation194_spill] sm:$0xff] }
 0x822   : >> { %v4522_v49 = vpop.eup %4521  ;;  %4543 = vtanh.f32 %v3534_v16  ;;  %v3489_v41 = vadd.f32 1.0, %v4520_v60  ;;  %v7150_v60 = vld [vmem:[#allocation195_spill] sm:$0xff] }
 0x823   : >> { %v3536_v7 = vadd.f32 %v3528_v15, %v3030_v11  ;;  %4545 = vrcp.f32 %v3486_v6  ;;  %v3488_v25 = vadd.f32 1.0, %v4522_v49  ;;  %v3588_v44 = vpop.permute.xlu1 %3587 }
 0x824   : >> { %v4524_v52 = vpop.eup %4523  ;;  %4547 = vtanh.f32 %v3537_v24 }
 0x825   : >> { %v4526_v10 = vpop.eup %4525  ;;  %v3547_v61 = vsub.f32 %v7142_v35, %v4524_v52  ;;  %4549 = vtanh.f32 %v3536_v7  ;;  %v3593_v39 = vpop.permute.xlu0 %3592 }
 0x826   : >> { %v4528_v43 = vpop.eup %4527  ;;  %4551 = vrcp.f32 %v3489_v41 }
 0x827   : >> { %v4530_v62 = vpop.eup %4529  ;;  %v3555_v20 = vmul.f32 %v4526_v10, %v3547_v61  ;;  %v3546_v21 = vsub.f32 %v7143_v34, %v4528_v43  ;;  %4553 = vrcp.f32 %v3488_v25  ;;  %v3598_v9 = vpop.permute.xlu1 %3597 }
 0x828   : >> { %v4532_v22 = vpop.eup %4531 }
 0x829   : >> { %v4534_v58 = vpop.eup %4533  ;;  %v6555_v63 = vadd.f32 %v4524_v52, %v3555_v20   ;;  %v3554_v32 = vmul.f32 %v4530_v62, %v3546_v21  ;;  %v3549_v26 = vsub.f32 %v7145_v18, %v4532_v22  ;;  %v3603_v25 = vpop.permute.xlu0 %3602 }
 0x82a   : >> { %v4536_v12 = vpop.eup %4535 }
 0x82b   : >> { %v7144_v37 = vmov %v6555_v63  ;;  %v6559_v3 = vadd.f32 %v4528_v43, %v3554_v32   ;;  %v3557_v53 = vmul.f32 %v4534_v58, %v3549_v26  ;;  %v3548_v5 = vsub.f32 %v7146_v13, %v4536_v12  ;;  %v3608_v35 = vpop.permute.xlu1 %3607 }
 0x82c   : >> { %v3611_v42 = vmul.f32 %v3578_v27, %v7144_v37  ;;  %v4538_v29 = vpop.eup %4537 }
 0x82d   : >> { %v4540_v51 = vpop.eup %4539  ;;  %v3610_v48 = vmul.f32 %v3573_v31, %v6559_v3  ;;  %v6563_v63 = vadd.f32 %v4532_v22, %v3557_v53   ;;  %v3556_v45 = vmul.f32 %v4538_v29, %v3548_v5  ;;  %v7151_v53 = vld [vmem:[#allocation202_spill] sm:$0xff] }
 0x82e   : >> { %v3551_v17 = vsub.f32 %v7147_v50, %v4540_v51  ;;  %v4542_v46 = vpop.eup %4541  ;;  %v3620_v38 = vsel %vm3618_vm13, %v3611_v42, 0.0  ;;  %v7152_v13 = vsub.s32 0, %v7151_v53 }
 0x82f   : >> { %v3619_v14 = vsel %vm3618_vm13, %v3610_v48, 0.0  ;;  %v3564_v55 = vadd.f32 %v4536_v12, %v3556_v45   ;;  %v4544_v40 = vpop.eup %4543  ;;  %v3613_v1 = vmul.f32 %v3588_v44, %v6563_v63  ;;  %v3643_v12 = vpop.permute.xlu0 %3642 }
 0x830   : >> { %v3621_v57 = vadd.f32 %v3620_v38, %v3619_v14  ;;  %v3559_v23 = vmul.f32 %v4542_v46, %v3551_v17  ;;  %v3550_v30 = vsub.f32 %v7148_v28, %v4544_v40  ;;  %v4546_v59 = vpop.eup %4545  ;;  %v3648_v5 = vrot.slane %v3643_v12, %v7152_v13 }
 0x831   : >> { %v3612_v8 = vmul.f32 %v3583_v36, %v3564_v55  ;;  %v4548_v4 = vpop.eup %4547  ;;  %v3624_v16 = vsel %vm3618_vm13, %v3613_v1, 0.0  ;;  %v7153_v38 = vmov %v3564_v55 }
 0x832   : >> { %v3567_v41 = vadd.f32 %v4540_v51, %v3559_v23   ;;  %v3558_v54 = vmul.f32 %v4546_v59, %v3550_v30  ;;  %v4550_v33 = vpop.eup %4549  ;;  %v3553_v19 = vsub.f32 %v7149_v47, %v4548_v4 }
 0x833   : >> { %v3622_v56 = vsel %vm3618_vm13, %v3612_v8, 0.0  ;;  %v4552_v2 = vpop.eup %4551  ;;  %v3552_v6 = vsub.f32 %v7150_v60, %v4550_v33 }
 0x834   : >> { %v3623_v0 = vadd.f32 %v3622_v56, %v3621_v57  ;;  %v3566_v1 = vadd.f32 %v4544_v40, %v3558_v54   ;;  %v4554_v24 = vpop.eup %4553  ;;  %v3561_v15 = vmul.f32 %v4552_v2, %v3553_v19  ;;  %v3615_v49 = vmul.f32 %v3598_v9, %v3567_v41 }
 0x835   : >> { %v3560_v52 = vmul.f32 %v4554_v24, %v3552_v6 }
 0x836   : >> { %v3625_v11 = vadd.f32 %v3624_v16, %v3623_v0  ;;  %v3614_v7 = vmul.f32 %v3593_v39, %v3566_v1  ;;  %v3569_v40 = vadd.f32 %v4548_v4, %v3561_v15   ;;  %v3628_v43 = vsel %vm3618_vm13, %v3615_v49, 0.0 }
 0x837   : >> { %v3568_v0 = vadd.f32 %v4550_v33, %v3560_v52  }
 0x838   : >> { %v3626_v10 = vsel %vm3618_vm13, %v3614_v7, 0.0  ;;  %v3617_v62 = vmul.f32 %v3608_v35, %v3569_v40 }
 0x839   : >> { %v3627_v61 = vadd.f32 %v3626_v10, %v3625_v11  ;;  %v3616_v20 = vmul.f32 %v3603_v25, %v3568_v0 }
 0x83a   : >> { %v3632_v31 = vsel %vm3618_vm13, %v3617_v62, 0.0  ;;  %v7154_v62 = vmov %v7144_v37 }
 0x83b   : >> { %v3629_v34 = vadd.f32 %v3628_v43, %v3627_v61  ;;  %v3630_v21 = vsel %vm3618_vm13, %v3616_v20, 0.0 }
 0x83d   : >> { %v3631_v22 = vadd.f32 %v3630_v21, %v3629_v34 }
 0x83f   : >> { %v3633_v27 = vadd.f32 %v3632_v31, %v3631_v22 }
 0x841   : >> { %v3634_v58 = vrot.slane %v3633_v27, 4 }
 0x843   : >> { %v3635_v32 = vadd.f32 %v3634_v58, %v3633_v27 }
 0x845   : >> { %v3636_v18 = vrot.slane %v3635_v32, 2 }
 0x847   : >> { %v3637_v26 = vadd.f32 %v3636_v18, %v3635_v32 }
 0x849   : >> { %v3638_v42 = vrot.slane %v3637_v26, 1 }
 0x84b   : >> { %v3639_v29 = vadd.f32 %v3638_v42, %v3637_v26  ;;  %898 = sbr.rel (!%p896_p4) target bundleno = 117 (0x75), region = 150 }
 0x84d   : >> { %v3649_v8 = vadd.f32 %v3648_v5, %v3639_v29  }
 0x84f   : >> { %3652 = vst.msk [vmem:[%s3650_s7] sm:$0x1] %vm3651_vm14, %v3649_v8 }
 0x850 PF: > { %s34_s29 = sadd.s32 1, %s4601_s29  }
 0x851   : > { %p31_p5 = scmp.ge.s32.totalorder %s34_s29, 4  }
 0x853   :  { %33 = sbr.rel (!%p31_p5) target bundleno = 9 (0x9), region = 161 }

</bundles_post_ra>
